<compile_context>
chip_gen: v6e
topology: v6e:2x2x1
jax: 0.10.0
libtpu: 0.0.40
codegen_flags: <defaults>
</compile_context>

<pallas_src>
import functools

import jax
import jax.numpy as jnp
from jax.experimental import pallas as pl
from jax.experimental.pallas import tpu as pltpu


# ---------------------------------------------------------------------------
# Shared math
# ---------------------------------------------------------------------------
def _layer_norm(x, gamma, beta, eps=1e-5):
    mu = jnp.mean(x, axis=-1, keepdims=True)
    var = jnp.mean((x - mu) ** 2, axis=-1, keepdims=True)
    return (x - mu) * jax.lax.rsqrt(var + eps) * gamma + beta


# ---------------------------------------------------------------------------
# Kernel: one grid step = one direction (crs_attn1 / crs_attn2) x B_TILE batch elements
# ---------------------------------------------------------------------------
def fused_crs_att_kernel(kv_ref, q_ref, pool_ref,
                         wqkv_ref, bqkv_ref, wo_ref, w1_ref, b1_ref, w2_ref, vec_ref,
                         out_ref,
                         *, num_heads, head_dim, b_tile, seq_len, kv_chunk):
    H, hd = num_heads, head_dim
    B, L, KT = b_tile, seq_len, kv_chunk
    C = H * hd
    M = B * L
    n_kt = L // KT
    bf16 = jnp.bfloat16
    f32 = jnp.float32

    kv = kv_ref[...].reshape(M, C)                   # f32, kept for the residual (torch "x")
    kv_bf = kv.astype(bf16)
    qin_bf = q_ref[...].reshape(M, C).astype(bf16)   # torch "y" (query input)

    vecs = vec_ref[...]                              # [6, C] f32 packed per-channel vectors
    bo, ln1g, ln1b = vecs[0:1], vecs[1:2], vecs[2:3]
    b2, ln2g, ln2b = vecs[3:4], vecs[4:5], vecs[5:6]
    b1 = b1_ref[...]                                 # [1, Hd] f32
    bqkv = bqkv_ref[...]                             # [3, H, hd] f32 (q-bias pre-scaled)

    # --- multi-head cross-attention; per-head structure lives in the (host-pre-split) weights,
    #     so no activation transposes / lane slices / concats are materialized. ----------------
    attn_proj = None
    for h in range(H):
        wq_h = wqkv_ref[0, h]                        # [C, hd] bf16 (pre-scaled by 1/sqrt(hd))
        wk_h = wqkv_ref[1, h]
        wv_h = wqkv_ref[2, h]
        bq_h = bqkv[0:1, h, :]                       # [1, hd]
        bk_h = bqkv[1:2, h, :]
        bv_h = bqkv[2:3, h, :]

        q_h = jnp.dot(qin_bf, wq_h, preferred_element_type=f32) + bq_h      # [M, hd]
        q_h = q_h.reshape(B, L, hd).astype(bf16)

        if n_kt == 1:
            # Dense path (small L): one softmax over the whole key axis.
            k_h = jnp.dot(kv_bf, wk_h, preferred_element_type=f32) + bk_h
            v_h = jnp.dot(kv_bf, wv_h, preferred_element_type=f32) + bv_h
            k_h = k_h.reshape(B, L, hd).astype(bf16)
            v_h = v_h.reshape(B, L, hd).astype(bf16)
            s = jnp.einsum('bld,bmd->blm', q_h, k_h, preferred_element_type=f32)  # [B, L, L]
            e = jnp.exp(s - jnp.max(s, axis=-1, keepdims=True))
            o_h = jnp.einsum('blm,bmd->bld', e.astype(bf16), v_h,
                             preferred_element_type=f32)                          # [B, L, hd]
            o_h = o_h * pl.reciprocal(jnp.sum(e, axis=-1, keepdims=True), approx=True)
        else:
            # Flash-style path (large L, required on v7x's 64 MiB VMEM): stream KV chunks with
            # a running max / denominator so score memory is O(L*KT) instead of O(L*L).
            def body(ci, carry):
                m_i, l_i, acc = carry
                start = pl.multiple_of(ci * KT, KT)
                kv_c = kv_ref[:, pl.ds(start, KT), :].reshape(B * KT, C).astype(bf16)
                k_c = jnp.dot(kv_c, wk_h, preferred_element_type=f32) + bk_h
                v_c = jnp.dot(kv_c, wv_h, preferred_element_type=f32) + bv_h
                k_c = k_c.reshape(B, KT, hd).astype(bf16)
                v_c = v_c.reshape(B, KT, hd).astype(bf16)
                s = jnp.einsum('bld,bmd->blm', q_h, k_c, preferred_element_type=f32)
                m_new = jnp.maximum(m_i, jnp.max(s, axis=-1, keepdims=True))
                alpha = jnp.exp(m_i - m_new)
                e = jnp.exp(s - m_new)
                l_new = alpha * l_i + jnp.sum(e, axis=-1, keepdims=True)
                acc_new = alpha * acc + jnp.einsum('blm,bmd->bld', e.astype(bf16), v_c,
                                                   preferred_element_type=f32)
                return m_new, l_new, acc_new

            m0 = jnp.full((B, L, 1), -jnp.inf, f32)
            l0 = jnp.zeros((B, L, 1), f32)
            a0 = jnp.zeros((B, L, hd), f32)
            _, l_f, acc_f = jax.lax.fori_loop(0, n_kt, body, (m0, l0, a0))
            o_h = acc_f * pl.reciprocal(l_f, approx=True)                         # [B, L, hd]

        # Output projection folded per head (no head concat): attn @ wo == sum_h o_h @ wo_h.
        proj = jnp.dot(o_h.reshape(M, hd).astype(bf16), wo_ref[h],
                       preferred_element_type=f32)                                # [M, C]
        attn_proj = proj if attn_proj is None else attn_proj + proj

    # --- residual with kv (torch "x") + LN1 -------------------------------------------------
    out = attn_proj + bo + kv
    out = _layer_norm(out, ln1g, ln1b)

    # --- feedforward + residual + LN2 --------------------------------------------------------
    hid = jnp.dot(out.astype(bf16), w1_ref[...], preferred_element_type=f32) + b1
    hid = jnp.maximum(hid, 0.0)
    out2 = jnp.dot(hid.astype(bf16), w2_ref[...], preferred_element_type=f32) + b2
    out2 = out2 + out
    out2 = _layer_norm(out2, ln2g, ln2b)

    # --- mean over tokens as an MXU matmul against the host-precomputed 0/1 block-diag matrix
    pooled = jnp.dot(pool_ref[...], out2.astype(bf16), preferred_element_type=f32)
    out_ref[...] = pooled * (1.0 / float(L))


# ---------------------------------------------------------------------------
# Host-side parameter packing / tiling heuristics
# ---------------------------------------------------------------------------
_VEC_ORDER = ("bo", "ln1g", "ln1b", "b2", "ln2g", "ln2b")


def _pack_params(params1, params2, num_heads):
    """Stack both CrsAttTrans blocks along a direction axis, pre-split the attention weights
    per head, fold 1/sqrt(hd) into wq/bq, and cast matmul weights to bf16."""
    bf16 = jnp.bfloat16
    C = params1["wq"].shape[0]
    hd = C // num_heads
    scale = 1.0 / float(hd) ** 0.5

    def stk(name):
        return jnp.stack([params1[name], params2[name]], axis=0)

    def heads_w(w):                                   # [2, C, C] -> [2, H, C, hd]
        return w.reshape(2, C, num_heads, hd).transpose(0, 2, 1, 3)

    wq = stk("wq") * scale
    wqkv = jnp.stack([heads_w(wq), heads_w(stk("wk")), heads_w(stk("wv"))],
                     axis=1).astype(bf16)                                   # [2, 3, H, C, hd]
    bq = stk("bq") * scale
    bqkv = jnp.stack([b.reshape(2, num_heads, hd)
                      for b in (bq, stk("bk"), stk("bv"))], axis=1)         # [2, 3, H, hd] f32
    wo = stk("wo").reshape(2, num_heads, hd, C).astype(bf16)                # [2, H, hd, C]
    w1 = stk("w1").astype(bf16)                                             # [2, C, Hd]
    b1 = stk("b1")                                                          # [2, 1, Hd] f32
    w2 = stk("w2").astype(bf16)                                             # [2, Hd, C]
    vecs = jnp.stack([jnp.concatenate([p[n] for n in _VEC_ORDER], axis=0)
                      for p in (params1, params2)], axis=0)                 # [2, 6, C] f32
    return [wqkv, bqkv, wo, w1, b1, w2, vecs]


def _vmem_capacity_bytes():
    try:
        cap = getattr(pltpu.get_tpu_info(), "vmem_capacity_bytes", None)
        if cap:
            return int(cap)
    except Exception:
        pass
    return 64 * 1024 * 1024          # conservative default (v7x per-TC VMEM)


def _step_vmem_bytes(b_tile, L, C, Hd, H, hd, kt):
    """Per-grid-step VMEM estimate: double-buffered kv/q tiles + activations + worst-case
    (all heads live) softmax temporaries."""
    M = b_tile * L
    f32, bf = 4, 2
    io = 2 * 2 * M * C * f32 + 2 * b_tile * C * f32
    base = 3 * M * C * f32 + 3 * M * C * bf
    ffn = M * Hd * (f32 + bf)
    per_head = 4 * M * hd * (f32 + bf)
    scores = 3 * b_tile * H * L * kt * f32
    return io + base + ffn + per_head + scores


def _pick_kv_chunk(L, max_chunk=512):
    """KV chunk for the flash path: largest divisor of L <= max_chunk (prefer 128/8 multiples)."""
    if L <= max_chunk:
        return L
    best = 1
    for c in range(1, max_chunk + 1):
        if L % c:
            continue
        if (c % 128 == 0, c % 8 == 0, c) > (best % 128 == 0, best % 8 == 0, best):
            best = c
    return best


def _pick_b_tile(N, L, C, Hd, H, hd, kt, budget_bytes):
    """Largest divisor of N whose estimated per-step VMEM fits the budget (prefer multiples of 8
    for sublane-dense output stores)."""
    divisors = [d for d in range(1, N + 1) if N % d == 0]
    fits = [d for d in divisors if _step_vmem_bytes(d, L, C, Hd, H, hd, kt) <= budget_bytes]
    if not fits:
        return 1
    mult8 = [d for d in fits if d % 8 == 0]
    return max(mult8) if mult8 else max(fits)


# ---------------------------------------------------------------------------
# Wrapper
# ---------------------------------------------------------------------------
def crs_att_module(x, y, mask, params1, params2, num_heads):
    """x, y: [N, C, H, W]; mask: [N, 1, H, W] -> [N, 2*C]."""
    N, C, H_sp, W_sp = x.shape
    L = H_sp * W_sp
    assert C % num_heads == 0
    head_dim = C // num_heads
    Hd = params1["w1"].shape[1]
    del mask  # mask_flag=False (module default): mask is unused.
    # TODO(synk): mask_flag=True path (key-padding attention mask + masked pooling) not implemented.

    xf = x.reshape(N, C, L).transpose(0, 2, 1)       # [N, L, C]
    yf = y.reshape(N, C, L).transpose(0, 2, 1)       # [N, L, C]
    data = jnp.stack([xf, yf], axis=0)               # [2, N, L, C]; dir0: kv=x,q=y; dir1: kv=y,q=x

    cap = _vmem_capacity_bytes()
    vmem_limit = min(int(cap * 0.85), 100 * 1024 * 1024)   # ~100 MiB v5e/v6e, ~54 MiB v7x
    budget = min(int(cap * 0.70), vmem_limit - (8 << 20))
    kv_chunk = _pick_kv_chunk(L)
    b_tile = _pick_b_tile(N, L, C, Hd, num_heads, head_dim, kv_chunk, budget)
    n_bt = N // b_tile

    weights = _pack_params(params1, params2, num_heads)
    # 0/1 block-diagonal token-sum matrix (bf16-exact); 1/L applied in f32 inside the kernel.
    pool = jnp.repeat(jnp.eye(b_tile, dtype=jnp.float32), L, axis=1).astype(jnp.bfloat16)

    kv_spec = pl.BlockSpec((None, b_tile, L, C), lambda d, b: (d, b, 0, 0))
    q_spec = pl.BlockSpec((None, b_tile, L, C), lambda d, b: (1 - d, b, 0, 0))
    pool_spec = pl.BlockSpec(pool.shape, lambda d, b: (0, 0))

    def wspec(arr):
        nd = arr.ndim
        return pl.BlockSpec((None,) + arr.shape[1:],
                            lambda d, b: (d,) + (0,) * (nd - 1))

    kernel = functools.partial(fused_crs_att_kernel, num_heads=num_heads,
                               head_dim=head_dim, b_tile=b_tile, seq_len=L,
                               kv_chunk=kv_chunk)

    out = pl.pallas_call(
        kernel,
        out_shape=jax.ShapeDtypeStruct((2, n_bt, b_tile, C), jnp.float32),
        grid_spec=pltpu.PrefetchScalarGridSpec(
            num_scalar_prefetch=0,
            grid=(2, n_bt),
            in_specs=[kv_spec, q_spec, pool_spec] + [wspec(w) for w in weights],
            out_specs=pl.BlockSpec((None, None, b_tile, C), lambda d, b: (d, b, 0, 0)),
        ),
        compiler_params=pltpu.CompilerParams(
            dimension_semantics=("parallel", "parallel"),
            vmem_limit_bytes=int(vmem_limit)),
    )(data, data, pool, *weights)

    out = out.reshape(2, N, C)
    return jnp.concatenate([out[0], out[1]], axis=-1)    # [N, 2C]


# ---------------------------------------------------------------------------
# Deterministic synthetic parameters (shapes match nn.MultiheadAttention /
# LayerNorm / Linear of CrsAttTrans; weights stored pre-transposed: x @ W).
# ---------------------------------------------------------------------------
def init_crs_att_trans_params(key, embed_dim, hidden_dim):
    ks = jax.random.split(key, 10)
    s = 0.05
    C, Hd = embed_dim, hidden_dim
    return {
        "wq": s * jax.random.normal(ks[0], (C, C), jnp.float32),
        "wk": s * jax.random.normal(ks[1], (C, C), jnp.float32),
        "wv": s * jax.random.normal(ks[2], (C, C), jnp.float32),
        "bq": s * jax.random.normal(ks[3], (1, C), jnp.float32),
        "bk": s * jax.random.normal(ks[4], (1, C), jnp.float32),
        "bv": s * jax.random.normal(ks[5], (1, C), jnp.float32),
        "wo": s * jax.random.normal(ks[6], (C, C), jnp.float32),
        "bo": s * jax.random.normal(ks[7], (1, C), jnp.float32),
        "ln1g": jnp.ones((1, C), jnp.float32),
        "ln1b": jnp.zeros((1, C), jnp.float32),
        "w1": s * jax.random.normal(ks[8], (C, Hd), jnp.float32),
        "b1": jnp.zeros((1, Hd), jnp.float32),
        "w2": s * jax.random.normal(ks[9], (Hd, C), jnp.float32),
        "b2": jnp.zeros((1, C), jnp.float32),
        "ln2g": jnp.ones((1, C), jnp.float32),
        "ln2b": jnp.zeros((1, C), jnp.float32),
    }


# ---------------------------------------------------------------------------
# Pure-JAX f32 reference (mirrors the PyTorch forward, inference mode)
# ---------------------------------------------------------------------------
def _trans_ref_single(kv, qin, p, num_heads):
    L, C = kv.shape
    hd = C // num_heads
    q = qin @ p["wq"] + p["bq"][0]
    k = kv @ p["wk"] + p["bk"][0]
    v = kv @ p["wv"] + p["bv"][0]
    scale = 1.0 / (hd ** 0.5)
    outs = []
    for h in range(num_heads):
        sl = slice(h * hd, (h + 1) * hd)
        s = (q[:, sl] @ k[:, sl].T) * scale
        pth = jax.nn.softmax(s, axis=-1)
        outs.append(pth @ v[:, sl])
    attn = jnp.concatenate(outs, axis=-1)
    out = attn @ p["wo"] + p["bo"][0]
    out = out + kv
    out = _layer_norm(out, p["ln1g"][0], p["ln1b"][0])
    hid = jnp.maximum(out @ p["w1"] + p["b1"][0], 0.0)
    out2 = hid @ p["w2"] + p["b2"][0]
    out2 = out2 + out
    return _layer_norm(out2, p["ln2g"][0], p["ln2b"][0])


def crs_att_module_ref(x, y, p1, p2, num_heads):
    N, C, H, W = x.shape
    xf = x.reshape(N, C, H * W).transpose(0, 2, 1)
    yf = y.reshape(N, C, H * W).transpose(0, 2, 1)
    f1 = jax.vmap(lambda kv, q: _trans_ref_single(kv, q, p1, num_heads))
    f2 = jax.vmap(lambda kv, q: _trans_ref_single(kv, q, p2, num_heads))
    o1 = jnp.mean(f1(xf, yf), axis=1)   # [N, C]
    o2 = jnp.mean(f2(yf, xf), axis=1)   # [N, C]
    return jnp.concatenate([o1, o2], axis=-1)


# ---------------------------------------------------------------------------
# Demo
# ---------------------------------------------------------------------------
if __name__ == "__main__":
    key = jax.random.PRNGKey(0)
    N, C, H, W = 2, 32, 8, 8          # L = H*W = 64
    num_heads = 4
    hidden_dim = 128                   # CrsAttTrans default

    k1, k2, k3, k4 = jax.random.split(key, 4)
    x = jax.random.normal(k1, (N, C, H, W), jnp.float32)
    y = jax.random.normal(k2, (N, C, H, W), jnp.float32)
    mask = jnp.ones((N, 1, H, W), jnp.float32)   # unused (mask_flag=False)

    params1 = init_crs_att_trans_params(k3, C, hidden_dim)
    params2 = init_crs_att_trans_params(k4, C, hidden_dim)

    out = crs_att_module(x, y, mask, params1, params2, num_heads)
    out = jax.block_until_ready(out)
    assert out.shape == (N, 2 * C), out.shape

    ref = crs_att_module_ref(x, y, params1, params2, num_heads)
    err = float(jnp.max(jnp.abs(out - ref)))
    # Accuracy contract: bf16 MXU operands + approx reciprocal -> inference-grade tolerance.
    assert err < 5e-2, f"max abs err {err}"

    print("KERNEL_OK")
</pallas_src>

<mosaic_0001>
module attributes {stable_mosaic.version = 11 : i64} {
  func.func @fused_crs_att_kernel(%arg0: i32, %arg1: i32, %arg2: memref<1x2x64x32xf32, #tpu.memory_space<vmem>>, %arg3: memref<1x2x64x32xf32, #tpu.memory_space<vmem>>, %arg4: memref<2x128xbf16, #tpu.memory_space<vmem>>, %arg5: memref<1x3x4x32x8xbf16, #tpu.memory_space<vmem>>, %arg6: memref<1x3x4x8xf32, #tpu.memory_space<vmem>>, %arg7: memref<1x4x8x32xbf16, #tpu.memory_space<vmem>>, %arg8: memref<1x32x128xbf16, #tpu.memory_space<vmem>>, %arg9: memref<1x1x128xf32, #tpu.memory_space<vmem>>, %arg10: memref<1x128x32xbf16, #tpu.memory_space<vmem>>, %arg11: memref<1x6x32xf32, #tpu.memory_space<vmem>>, %arg12: memref<1x1x2x32xf32, #tpu.memory_space<vmem>>) attributes {dimension_semantics = [#tpu.dimension_semantics<parallel>, #tpu.dimension_semantics<parallel>], iteration_bounds = array<i64: 2, 1>, scalar_prefetch = 0 : i64, scratch_operands = 0 : i64, tpu.core_type = #tpu.core_type<tc>, window_params = [{transform_indices = @transform_0, window_bounds = array<i64: 1, 2, 64, 32>}, {transform_indices = @transform_1, window_bounds = array<i64: 1, 2, 64, 32>}, {pipeline_mode = #tpu.pipeline_mode<synchronous>, transform_indices = @transform_2, window_bounds = array<i64: 2, 128>}, {transform_indices = @transform_3, window_bounds = array<i64: 1, 3, 4, 32, 8>}, {transform_indices = @transform_4, window_bounds = array<i64: 1, 3, 4, 8>}, {transform_indices = @transform_5, window_bounds = array<i64: 1, 4, 8, 32>}, {transform_indices = @transform_6, window_bounds = array<i64: 1, 32, 128>}, {transform_indices = @transform_7, window_bounds = array<i64: 1, 1, 128>}, {transform_indices = @transform_8, window_bounds = array<i64: 1, 128, 32>}, {transform_indices = @transform_9, window_bounds = array<i64: 1, 6, 32>}, {transform_indices = @transform_10, window_bounds = array<i64: 1, 1, 2, 32>}]} {
    %c0 = arith.constant 0 : index
    %c0_0 = arith.constant 0 : index
    %c0_1 = arith.constant 0 : index
    %c0_2 = arith.constant 0 : index
    %0 = vector.load %arg2[%c0, %c0_0, %c0_1, %c0_2] : memref<1x2x64x32xf32, #tpu.memory_space<vmem>>, vector<1x2x64x32xf32>
    %1 = vector.shape_cast %0 : vector<1x2x64x32xf32> to vector<2x64x32xf32>
    %2 = vector.shape_cast %1 : vector<2x64x32xf32> to vector<128x32xf32>
    %3 = arith.truncf %2 : vector<128x32xf32> to vector<128x32xbf16>
    %c0_3 = arith.constant 0 : index
    %c0_4 = arith.constant 0 : index
    %c0_5 = arith.constant 0 : index
    %c0_6 = arith.constant 0 : index
    %4 = vector.load %arg3[%c0_3, %c0_4, %c0_5, %c0_6] : memref<1x2x64x32xf32, #tpu.memory_space<vmem>>, vector<1x2x64x32xf32>
    %5 = vector.shape_cast %4 : vector<1x2x64x32xf32> to vector<2x64x32xf32>
    %6 = vector.shape_cast %5 : vector<2x64x32xf32> to vector<128x32xf32>
    %7 = arith.truncf %6 : vector<128x32xf32> to vector<128x32xbf16>
    %c0_7 = arith.constant 0 : index
    %c0_8 = arith.constant 0 : index
    %c0_9 = arith.constant 0 : index
    %8 = vector.load %arg11[%c0_7, %c0_8, %c0_9] : memref<1x6x32xf32, #tpu.memory_space<vmem>>, vector<1x6x32xf32>
    %9 = vector.shape_cast %8 : vector<1x6x32xf32> to vector<6x32xf32>
    %10 = vector.extract_strided_slice %9 {offsets = [0, 0], sizes = [1, 32], strides = [1, 1]} : vector<6x32xf32> to vector<1x32xf32>
    %11 = vector.extract_strided_slice %9 {offsets = [1, 0], sizes = [1, 32], strides = [1, 1]} : vector<6x32xf32> to vector<1x32xf32>
    %12 = vector.extract_strided_slice %9 {offsets = [2, 0], sizes = [1, 32], strides = [1, 1]} : vector<6x32xf32> to vector<1x32xf32>
    %13 = vector.extract_strided_slice %9 {offsets = [3, 0], sizes = [1, 32], strides = [1, 1]} : vector<6x32xf32> to vector<1x32xf32>
    %14 = vector.extract_strided_slice %9 {offsets = [4, 0], sizes = [1, 32], strides = [1, 1]} : vector<6x32xf32> to vector<1x32xf32>
    %15 = vector.extract_strided_slice %9 {offsets = [5, 0], sizes = [1, 32], strides = [1, 1]} : vector<6x32xf32> to vector<1x32xf32>
    %c0_10 = arith.constant 0 : index
    %c0_11 = arith.constant 0 : index
    %c0_12 = arith.constant 0 : index
    %16 = vector.load %arg9[%c0_10, %c0_11, %c0_12] : memref<1x1x128xf32, #tpu.memory_space<vmem>>, vector<1x1x128xf32>
    %17 = vector.shape_cast %16 : vector<1x1x128xf32> to vector<1x128xf32>
    %c0_13 = arith.constant 0 : index
    %c0_14 = arith.constant 0 : index
    %c0_15 = arith.constant 0 : index
    %c0_16 = arith.constant 0 : index
    %18 = vector.load %arg6[%c0_13, %c0_14, %c0_15, %c0_16] : memref<1x3x4x8xf32, #tpu.memory_space<vmem>>, vector<1x3x4x8xf32>
    %19 = vector.shape_cast %18 : vector<1x3x4x8xf32> to vector<3x4x8xf32>
    %c0_17 = arith.constant 0 : index
    %c0_18 = arith.constant 0 : index
    %c0_19 = arith.constant 0 : index
    %c0_20 = arith.constant 0 : index
    %c0_21 = arith.constant 0 : index
    %20 = vector.load %arg5[%c0_17, %c0_18, %c0_19, %c0_20, %c0_21] : memref<1x3x4x32x8xbf16, #tpu.memory_space<vmem>>, vector<1x1x1x32x8xbf16>
    %21 = vector.shape_cast %20 : vector<1x1x1x32x8xbf16> to vector<32x8xbf16>
    %c0_22 = arith.constant 0 : index
    %c1 = arith.constant 1 : index
    %c0_23 = arith.constant 0 : index
    %c0_24 = arith.constant 0 : index
    %c0_25 = arith.constant 0 : index
    %22 = vector.load %arg5[%c0_22, %c1, %c0_23, %c0_24, %c0_25] : memref<1x3x4x32x8xbf16, #tpu.memory_space<vmem>>, vector<1x1x1x32x8xbf16>
    %23 = vector.shape_cast %22 : vector<1x1x1x32x8xbf16> to vector<32x8xbf16>
    %c0_26 = arith.constant 0 : index
    %c2 = arith.constant 2 : index
    %c0_27 = arith.constant 0 : index
    %c0_28 = arith.constant 0 : index
    %c0_29 = arith.constant 0 : index
    %24 = vector.load %arg5[%c0_26, %c2, %c0_27, %c0_28, %c0_29] : memref<1x3x4x32x8xbf16, #tpu.memory_space<vmem>>, vector<1x1x1x32x8xbf16>
    %25 = vector.shape_cast %24 : vector<1x1x1x32x8xbf16> to vector<32x8xbf16>
    %26 = vector.extract_strided_slice %19 {offsets = [0, 0, 0], sizes = [1, 1, 8], strides = [1, 1, 1]} : vector<3x4x8xf32> to vector<1x1x8xf32>
    %27 = vector.shape_cast %26 : vector<1x1x8xf32> to vector<1x8xf32>
    %28 = vector.extract_strided_slice %19 {offsets = [1, 0, 0], sizes = [1, 1, 8], strides = [1, 1, 1]} : vector<3x4x8xf32> to vector<1x1x8xf32>
    %29 = vector.shape_cast %28 : vector<1x1x8xf32> to vector<1x8xf32>
    %30 = vector.extract_strided_slice %19 {offsets = [2, 0, 0], sizes = [1, 1, 8], strides = [1, 1, 1]} : vector<3x4x8xf32> to vector<1x1x8xf32>
    %31 = vector.shape_cast %30 : vector<1x1x8xf32> to vector<1x8xf32>
    %cst = arith.constant dense<0.000000e+00> : vector<128x8xf32>
    %32 = tpu.matmul %7, %21, %cst {dimension_numbers = #tpu.dot_dimension_numbers<[1], [0], [0], [1], [0, 0, 1, 1], [], []>} : vector<128x32xbf16>, vector<32x8xbf16>, vector<128x8xf32> -> vector<128x8xf32>
    %33 = vector.broadcast %27 : vector<1x8xf32> to vector<128x8xf32>
    %34 = arith.addf %32, %33 : vector<128x8xf32>
    %35 = vector.shape_cast %34 : vector<128x8xf32> to vector<2x64x8xf32>
    %36 = arith.truncf %35 : vector<2x64x8xf32> to vector<2x64x8xbf16>
    %cst_30 = arith.constant dense<0.000000e+00> : vector<128x8xf32>
    %37 = tpu.matmul %3, %23, %cst_30 {dimension_numbers = #tpu.dot_dimension_numbers<[1], [0], [0], [1], [0, 0, 1, 1], [], []>} : vector<128x32xbf16>, vector<32x8xbf16>, vector<128x8xf32> -> vector<128x8xf32>
    %38 = vector.broadcast %29 : vector<1x8xf32> to vector<128x8xf32>
    %39 = arith.addf %37, %38 : vector<128x8xf32>
    %cst_31 = arith.constant dense<0.000000e+00> : vector<128x8xf32>
    %40 = tpu.matmul %3, %25, %cst_31 {dimension_numbers = #tpu.dot_dimension_numbers<[1], [0], [0], [1], [0, 0, 1, 1], [], []>} : vector<128x32xbf16>, vector<32x8xbf16>, vector<128x8xf32> -> vector<128x8xf32>
    %41 = vector.broadcast %31 : vector<1x8xf32> to vector<128x8xf32>
    %42 = arith.addf %40, %41 : vector<128x8xf32>
    %43 = vector.shape_cast %39 : vector<128x8xf32> to vector<2x64x8xf32>
    %44 = arith.truncf %43 : vector<2x64x8xf32> to vector<2x64x8xbf16>
    %45 = vector.shape_cast %42 : vector<128x8xf32> to vector<2x64x8xf32>
    %46 = arith.truncf %45 : vector<2x64x8xf32> to vector<2x64x8xbf16>
    "tpu.trace_start"() <{level = 10 : i32, message = "bld,bmd->blm"}> : () -> ()
    %cst_32 = arith.constant dense<0.000000e+00> : vector<2x64x64xf32>
    %47 = tpu.matmul %36, %44, %cst_32 {dimension_numbers = #tpu.dot_dimension_numbers<[2], [2], [1], [1], [0, 0, 0, 1, 1, 1], [0], [0]>} : vector<2x64x8xbf16>, vector<2x64x8xbf16>, vector<2x64x64xf32> -> vector<2x64x64xf32>
    "tpu.trace_stop"() : () -> ()
    %cst_33 = arith.constant dense<0xFF800000> : vector<2x64xf32>
    %48 = vector.multi_reduction <maximumf>, %47, %cst_33 [2] : vector<2x64x64xf32> to vector<2x64xf32>
    %49 = vector.shape_cast %48 : vector<2x64xf32> to vector<2x64x1xf32>
    %50 = vector.broadcast %49 : vector<2x64x1xf32> to vector<2x64x64xf32>
    %51 = arith.subf %47, %50 : vector<2x64x64xf32>
    %52 = math.exp %51 : vector<2x64x64xf32>
    %53 = arith.truncf %52 : vector<2x64x64xf32> to vector<2x64x64xbf16>
    "tpu.trace_start"() <{level = 10 : i32, message = "blm,bmd->bld"}> : () -> ()
    %cst_34 = arith.constant dense<0.000000e+00> : vector<2x64x8xf32>
    %54 = tpu.matmul %53, %46, %cst_34 {dimension_numbers = #tpu.dot_dimension_numbers<[2], [1], [1], [2], [0, 0, 0, 1, 1, 2], [0], [0]>} : vector<2x64x64xbf16>, vector<2x64x8xbf16>, vector<2x64x8xf32> -> vector<2x64x8xf32>
    "tpu.trace_stop"() : () -> ()
    %cst_35 = arith.constant dense<0.000000e+00> : vector<2x64xf32>
    %55 = vector.multi_reduction <add>, %52, %cst_35 [2] : vector<2x64x64xf32> to vector<2x64xf32>
    %56 = vector.shape_cast %55 : vector<2x64xf32> to vector<2x64x1xf32>
    %57 = tpu.reciprocal %56 {approx = true} : vector<2x64x1xf32> -> vector<2x64x1xf32>
    %58 = vector.broadcast %57 : vector<2x64x1xf32> to vector<2x64x8xf32>
    %59 = arith.mulf %54, %58 : vector<2x64x8xf32>
    %60 = vector.shape_cast %59 : vector<2x64x8xf32> to vector<128x8xf32>
    %61 = arith.truncf %60 : vector<128x8xf32> to vector<128x8xbf16>
    %c0_36 = arith.constant 0 : index
    %c0_37 = arith.constant 0 : index
    %c0_38 = arith.constant 0 : index
    %c0_39 = arith.constant 0 : index
    %62 = vector.load %arg7[%c0_36, %c0_37, %c0_38, %c0_39] : memref<1x4x8x32xbf16, #tpu.memory_space<vmem>>, vector<1x1x8x32xbf16>
    %63 = vector.shape_cast %62 : vector<1x1x8x32xbf16> to vector<8x32xbf16>
    %cst_40 = arith.constant dense<0.000000e+00> : vector<128x32xf32>
    %64 = tpu.matmul %61, %63, %cst_40 {dimension_numbers = #tpu.dot_dimension_numbers<[1], [0], [0], [1], [0, 0, 1, 1], [], []>} : vector<128x8xbf16>, vector<8x32xbf16>, vector<128x32xf32> -> vector<128x32xf32>
    %c0_41 = arith.constant 0 : index
    %c0_42 = arith.constant 0 : index
    %c1_43 = arith.constant 1 : index
    %c0_44 = arith.constant 0 : index
    %c0_45 = arith.constant 0 : index
    %65 = vector.load %arg5[%c0_41, %c0_42, %c1_43, %c0_44, %c0_45] : memref<1x3x4x32x8xbf16, #tpu.memory_space<vmem>>, vector<1x1x1x32x8xbf16>
    %66 = vector.shape_cast %65 : vector<1x1x1x32x8xbf16> to vector<32x8xbf16>
    %c0_46 = arith.constant 0 : index
    %c1_47 = arith.constant 1 : index
    %c1_48 = arith.constant 1 : index
    %c0_49 = arith.constant 0 : index
    %c0_50 = arith.constant 0 : index
    %67 = vector.load %arg5[%c0_46, %c1_47, %c1_48, %c0_49, %c0_50] : memref<1x3x4x32x8xbf16, #tpu.memory_space<vmem>>, vector<1x1x1x32x8xbf16>
    %68 = vector.shape_cast %67 : vector<1x1x1x32x8xbf16> to vector<32x8xbf16>
    %c0_51 = arith.constant 0 : index
    %c2_52 = arith.constant 2 : index
    %c1_53 = arith.constant 1 : index
    %c0_54 = arith.constant 0 : index
    %c0_55 = arith.constant 0 : index
    %69 = vector.load %arg5[%c0_51, %c2_52, %c1_53, %c0_54, %c0_55] : memref<1x3x4x32x8xbf16, #tpu.memory_space<vmem>>, vector<1x1x1x32x8xbf16>
    %70 = vector.shape_cast %69 : vector<1x1x1x32x8xbf16> to vector<32x8xbf16>
    %71 = vector.extract_strided_slice %19 {offsets = [0, 1, 0], sizes = [1, 1, 8], strides = [1, 1, 1]} : vector<3x4x8xf32> to vector<1x1x8xf32>
    %72 = vector.shape_cast %71 : vector<1x1x8xf32> to vector<1x8xf32>
    %73 = vector.extract_strided_slice %19 {offsets = [1, 1, 0], sizes = [1, 1, 8], strides = [1, 1, 1]} : vector<3x4x8xf32> to vector<1x1x8xf32>
    %74 = vector.shape_cast %73 : vector<1x1x8xf32> to vector<1x8xf32>
    %75 = vector.extract_strided_slice %19 {offsets = [2, 1, 0], sizes = [1, 1, 8], strides = [1, 1, 1]} : vector<3x4x8xf32> to vector<1x1x8xf32>
    %76 = vector.shape_cast %75 : vector<1x1x8xf32> to vector<1x8xf32>
    %cst_56 = arith.constant dense<0.000000e+00> : vector<128x8xf32>
    %77 = tpu.matmul %7, %66, %cst_56 {dimension_numbers = #tpu.dot_dimension_numbers<[1], [0], [0], [1], [0, 0, 1, 1], [], []>} : vector<128x32xbf16>, vector<32x8xbf16>, vector<128x8xf32> -> vector<128x8xf32>
    %78 = vector.broadcast %72 : vector<1x8xf32> to vector<128x8xf32>
    %79 = arith.addf %77, %78 : vector<128x8xf32>
    %80 = vector.shape_cast %79 : vector<128x8xf32> to vector<2x64x8xf32>
    %81 = arith.truncf %80 : vector<2x64x8xf32> to vector<2x64x8xbf16>
    %cst_57 = arith.constant dense<0.000000e+00> : vector<128x8xf32>
    %82 = tpu.matmul %3, %68, %cst_57 {dimension_numbers = #tpu.dot_dimension_numbers<[1], [0], [0], [1], [0, 0, 1, 1], [], []>} : vector<128x32xbf16>, vector<32x8xbf16>, vector<128x8xf32> -> vector<128x8xf32>
    %83 = vector.broadcast %74 : vector<1x8xf32> to vector<128x8xf32>
    %84 = arith.addf %82, %83 : vector<128x8xf32>
    %cst_58 = arith.constant dense<0.000000e+00> : vector<128x8xf32>
    %85 = tpu.matmul %3, %70, %cst_58 {dimension_numbers = #tpu.dot_dimension_numbers<[1], [0], [0], [1], [0, 0, 1, 1], [], []>} : vector<128x32xbf16>, vector<32x8xbf16>, vector<128x8xf32> -> vector<128x8xf32>
    %86 = vector.broadcast %76 : vector<1x8xf32> to vector<128x8xf32>
    %87 = arith.addf %85, %86 : vector<128x8xf32>
    %88 = vector.shape_cast %84 : vector<128x8xf32> to vector<2x64x8xf32>
    %89 = arith.truncf %88 : vector<2x64x8xf32> to vector<2x64x8xbf16>
    %90 = vector.shape_cast %87 : vector<128x8xf32> to vector<2x64x8xf32>
    %91 = arith.truncf %90 : vector<2x64x8xf32> to vector<2x64x8xbf16>
    "tpu.trace_start"() <{level = 10 : i32, message = "bld,bmd->blm"}> : () -> ()
    %cst_59 = arith.constant dense<0.000000e+00> : vector<2x64x64xf32>
    %92 = tpu.matmul %81, %89, %cst_59 {dimension_numbers = #tpu.dot_dimension_numbers<[2], [2], [1], [1], [0, 0, 0, 1, 1, 1], [0], [0]>} : vector<2x64x8xbf16>, vector<2x64x8xbf16>, vector<2x64x64xf32> -> vector<2x64x64xf32>
    "tpu.trace_stop"() : () -> ()
    %cst_60 = arith.constant dense<0xFF800000> : vector<2x64xf32>
    %93 = vector.multi_reduction <maximumf>, %92, %cst_60 [2] : vector<2x64x64xf32> to vector<2x64xf32>
    %94 = vector.shape_cast %93 : vector<2x64xf32> to vector<2x64x1xf32>
    %95 = vector.broadcast %94 : vector<2x64x1xf32> to vector<2x64x64xf32>
    %96 = arith.subf %92, %95 : vector<2x64x64xf32>
    %97 = math.exp %96 : vector<2x64x64xf32>
    %98 = arith.truncf %97 : vector<2x64x64xf32> to vector<2x64x64xbf16>
    "tpu.trace_start"() <{level = 10 : i32, message = "blm,bmd->bld"}> : () -> ()
    %cst_61 = arith.constant dense<0.000000e+00> : vector<2x64x8xf32>
    %99 = tpu.matmul %98, %91, %cst_61 {dimension_numbers = #tpu.dot_dimension_numbers<[2], [1], [1], [2], [0, 0, 0, 1, 1, 2], [0], [0]>} : vector<2x64x64xbf16>, vector<2x64x8xbf16>, vector<2x64x8xf32> -> vector<2x64x8xf32>
    "tpu.trace_stop"() : () -> ()
    %cst_62 = arith.constant dense<0.000000e+00> : vector<2x64xf32>
    %100 = vector.multi_reduction <add>, %97, %cst_62 [2] : vector<2x64x64xf32> to vector<2x64xf32>
    %101 = vector.shape_cast %100 : vector<2x64xf32> to vector<2x64x1xf32>
    %102 = tpu.reciprocal %101 {approx = true} : vector<2x64x1xf32> -> vector<2x64x1xf32>
    %103 = vector.broadcast %102 : vector<2x64x1xf32> to vector<2x64x8xf32>
    %104 = arith.mulf %99, %103 : vector<2x64x8xf32>
    %105 = vector.shape_cast %104 : vector<2x64x8xf32> to vector<128x8xf32>
    %106 = arith.truncf %105 : vector<128x8xf32> to vector<128x8xbf16>
    %c0_63 = arith.constant 0 : index
    %c1_64 = arith.constant 1 : index
    %c0_65 = arith.constant 0 : index
    %c0_66 = arith.constant 0 : index
    %107 = vector.load %arg7[%c0_63, %c1_64, %c0_65, %c0_66] : memref<1x4x8x32xbf16, #tpu.memory_space<vmem>>, vector<1x1x8x32xbf16>
    %108 = vector.shape_cast %107 : vector<1x1x8x32xbf16> to vector<8x32xbf16>
    %cst_67 = arith.constant dense<0.000000e+00> : vector<128x32xf32>
    %109 = tpu.matmul %106, %108, %cst_67 {dimension_numbers = #tpu.dot_dimension_numbers<[1], [0], [0], [1], [0, 0, 1, 1], [], []>} : vector<128x8xbf16>, vector<8x32xbf16>, vector<128x32xf32> -> vector<128x32xf32>
    %110 = arith.addf %64, %109 : vector<128x32xf32>
    %c0_68 = arith.constant 0 : index
    %c0_69 = arith.constant 0 : index
    %c2_70 = arith.constant 2 : index
    %c0_71 = arith.constant 0 : index
    %c0_72 = arith.constant 0 : index
    %111 = vector.load %arg5[%c0_68, %c0_69, %c2_70, %c0_71, %c0_72] : memref<1x3x4x32x8xbf16, #tpu.memory_space<vmem>>, vector<1x1x1x32x8xbf16>
    %112 = vector.shape_cast %111 : vector<1x1x1x32x8xbf16> to vector<32x8xbf16>
    %c0_73 = arith.constant 0 : index
    %c1_74 = arith.constant 1 : index
    %c2_75 = arith.constant 2 : index
    %c0_76 = arith.constant 0 : index
    %c0_77 = arith.constant 0 : index
    %113 = vector.load %arg5[%c0_73, %c1_74, %c2_75, %c0_76, %c0_77] : memref<1x3x4x32x8xbf16, #tpu.memory_space<vmem>>, vector<1x1x1x32x8xbf16>
    %114 = vector.shape_cast %113 : vector<1x1x1x32x8xbf16> to vector<32x8xbf16>
    %c0_78 = arith.constant 0 : index
    %c2_79 = arith.constant 2 : index
    %c2_80 = arith.constant 2 : index
    %c0_81 = arith.constant 0 : index
    %c0_82 = arith.constant 0 : index
    %115 = vector.load %arg5[%c0_78, %c2_79, %c2_80, %c0_81, %c0_82] : memref<1x3x4x32x8xbf16, #tpu.memory_space<vmem>>, vector<1x1x1x32x8xbf16>
    %116 = vector.shape_cast %115 : vector<1x1x1x32x8xbf16> to vector<32x8xbf16>
    %117 = vector.extract_strided_slice %19 {offsets = [0, 2, 0], sizes = [1, 1, 8], strides = [1, 1, 1]} : vector<3x4x8xf32> to vector<1x1x8xf32>
    %118 = vector.shape_cast %117 : vector<1x1x8xf32> to vector<1x8xf32>
    %119 = vector.extract_strided_slice %19 {offsets = [1, 2, 0], sizes = [1, 1, 8], strides = [1, 1, 1]} : vector<3x4x8xf32> to vector<1x1x8xf32>
    %120 = vector.shape_cast %119 : vector<1x1x8xf32> to vector<1x8xf32>
    %121 = vector.extract_strided_slice %19 {offsets = [2, 2, 0], sizes = [1, 1, 8], strides = [1, 1, 1]} : vector<3x4x8xf32> to vector<1x1x8xf32>
    %122 = vector.shape_cast %121 : vector<1x1x8xf32> to vector<1x8xf32>
    %cst_83 = arith.constant dense<0.000000e+00> : vector<128x8xf32>
    %123 = tpu.matmul %7, %112, %cst_83 {dimension_numbers = #tpu.dot_dimension_numbers<[1], [0], [0], [1], [0, 0, 1, 1], [], []>} : vector<128x32xbf16>, vector<32x8xbf16>, vector<128x8xf32> -> vector<128x8xf32>
    %124 = vector.broadcast %118 : vector<1x8xf32> to vector<128x8xf32>
    %125 = arith.addf %123, %124 : vector<128x8xf32>
    %126 = vector.shape_cast %125 : vector<128x8xf32> to vector<2x64x8xf32>
    %127 = arith.truncf %126 : vector<2x64x8xf32> to vector<2x64x8xbf16>
    %cst_84 = arith.constant dense<0.000000e+00> : vector<128x8xf32>
    %128 = tpu.matmul %3, %114, %cst_84 {dimension_numbers = #tpu.dot_dimension_numbers<[1], [0], [0], [1], [0, 0, 1, 1], [], []>} : vector<128x32xbf16>, vector<32x8xbf16>, vector<128x8xf32> -> vector<128x8xf32>
    %129 = vector.broadcast %120 : vector<1x8xf32> to vector<128x8xf32>
    %130 = arith.addf %128, %129 : vector<128x8xf32>
    %cst_85 = arith.constant dense<0.000000e+00> : vector<128x8xf32>
    %131 = tpu.matmul %3, %116, %cst_85 {dimension_numbers = #tpu.dot_dimension_numbers<[1], [0], [0], [1], [0, 0, 1, 1], [], []>} : vector<128x32xbf16>, vector<32x8xbf16>, vector<128x8xf32> -> vector<128x8xf32>
    %132 = vector.broadcast %122 : vector<1x8xf32> to vector<128x8xf32>
    %133 = arith.addf %131, %132 : vector<128x8xf32>
    %134 = vector.shape_cast %130 : vector<128x8xf32> to vector<2x64x8xf32>
    %135 = arith.truncf %134 : vector<2x64x8xf32> to vector<2x64x8xbf16>
    %136 = vector.shape_cast %133 : vector<128x8xf32> to vector<2x64x8xf32>
    %137 = arith.truncf %136 : vector<2x64x8xf32> to vector<2x64x8xbf16>
    "tpu.trace_start"() <{level = 10 : i32, message = "bld,bmd->blm"}> : () -> ()
    %cst_86 = arith.constant dense<0.000000e+00> : vector<2x64x64xf32>
    %138 = tpu.matmul %127, %135, %cst_86 {dimension_numbers = #tpu.dot_dimension_numbers<[2], [2], [1], [1], [0, 0, 0, 1, 1, 1], [0], [0]>} : vector<2x64x8xbf16>, vector<2x64x8xbf16>, vector<2x64x64xf32> -> vector<2x64x64xf32>
    "tpu.trace_stop"() : () -> ()
    %cst_87 = arith.constant dense<0xFF800000> : vector<2x64xf32>
    %139 = vector.multi_reduction <maximumf>, %138, %cst_87 [2] : vector<2x64x64xf32> to vector<2x64xf32>
    %140 = vector.shape_cast %139 : vector<2x64xf32> to vector<2x64x1xf32>
    %141 = vector.broadcast %140 : vector<2x64x1xf32> to vector<2x64x64xf32>
    %142 = arith.subf %138, %141 : vector<2x64x64xf32>
    %143 = math.exp %142 : vector<2x64x64xf32>
    %144 = arith.truncf %143 : vector<2x64x64xf32> to vector<2x64x64xbf16>
    "tpu.trace_start"() <{level = 10 : i32, message = "blm,bmd->bld"}> : () -> ()
    %cst_88 = arith.constant dense<0.000000e+00> : vector<2x64x8xf32>
    %145 = tpu.matmul %144, %137, %cst_88 {dimension_numbers = #tpu.dot_dimension_numbers<[2], [1], [1], [2], [0, 0, 0, 1, 1, 2], [0], [0]>} : vector<2x64x64xbf16>, vector<2x64x8xbf16>, vector<2x64x8xf32> -> vector<2x64x8xf32>
    "tpu.trace_stop"() : () -> ()
    %cst_89 = arith.constant dense<0.000000e+00> : vector<2x64xf32>
    %146 = vector.multi_reduction <add>, %143, %cst_89 [2] : vector<2x64x64xf32> to vector<2x64xf32>
    %147 = vector.shape_cast %146 : vector<2x64xf32> to vector<2x64x1xf32>
    %148 = tpu.reciprocal %147 {approx = true} : vector<2x64x1xf32> -> vector<2x64x1xf32>
    %149 = vector.broadcast %148 : vector<2x64x1xf32> to vector<2x64x8xf32>
    %150 = arith.mulf %145, %149 : vector<2x64x8xf32>
    %151 = vector.shape_cast %150 : vector<2x64x8xf32> to vector<128x8xf32>
    %152 = arith.truncf %151 : vector<128x8xf32> to vector<128x8xbf16>
    %c0_90 = arith.constant 0 : index
    %c2_91 = arith.constant 2 : index
    %c0_92 = arith.constant 0 : index
    %c0_93 = arith.constant 0 : index
    %153 = vector.load %arg7[%c0_90, %c2_91, %c0_92, %c0_93] : memref<1x4x8x32xbf16, #tpu.memory_space<vmem>>, vector<1x1x8x32xbf16>
    %154 = vector.shape_cast %153 : vector<1x1x8x32xbf16> to vector<8x32xbf16>
    %cst_94 = arith.constant dense<0.000000e+00> : vector<128x32xf32>
    %155 = tpu.matmul %152, %154, %cst_94 {dimension_numbers = #tpu.dot_dimension_numbers<[1], [0], [0], [1], [0, 0, 1, 1], [], []>} : vector<128x8xbf16>, vector<8x32xbf16>, vector<128x32xf32> -> vector<128x32xf32>
    %156 = arith.addf %110, %155 : vector<128x32xf32>
    %c0_95 = arith.constant 0 : index
    %c0_96 = arith.constant 0 : index
    %c3 = arith.constant 3 : index
    %c0_97 = arith.constant 0 : index
    %c0_98 = arith.constant 0 : index
    %157 = vector.load %arg5[%c0_95, %c0_96, %c3, %c0_97, %c0_98] : memref<1x3x4x32x8xbf16, #tpu.memory_space<vmem>>, vector<1x1x1x32x8xbf16>
    %158 = vector.shape_cast %157 : vector<1x1x1x32x8xbf16> to vector<32x8xbf16>
    %c0_99 = arith.constant 0 : index
    %c1_100 = arith.constant 1 : index
    %c3_101 = arith.constant 3 : index
    %c0_102 = arith.constant 0 : index
    %c0_103 = arith.constant 0 : index
    %159 = vector.load %arg5[%c0_99, %c1_100, %c3_101, %c0_102, %c0_103] : memref<1x3x4x32x8xbf16, #tpu.memory_space<vmem>>, vector<1x1x1x32x8xbf16>
    %160 = vector.shape_cast %159 : vector<1x1x1x32x8xbf16> to vector<32x8xbf16>
    %c0_104 = arith.constant 0 : index
    %c2_105 = arith.constant 2 : index
    %c3_106 = arith.constant 3 : index
    %c0_107 = arith.constant 0 : index
    %c0_108 = arith.constant 0 : index
    %161 = vector.load %arg5[%c0_104, %c2_105, %c3_106, %c0_107, %c0_108] : memref<1x3x4x32x8xbf16, #tpu.memory_space<vmem>>, vector<1x1x1x32x8xbf16>
    %162 = vector.shape_cast %161 : vector<1x1x1x32x8xbf16> to vector<32x8xbf16>
    %163 = vector.extract_strided_slice %19 {offsets = [0, 3, 0], sizes = [1, 1, 8], strides = [1, 1, 1]} : vector<3x4x8xf32> to vector<1x1x8xf32>
    %164 = vector.shape_cast %163 : vector<1x1x8xf32> to vector<1x8xf32>
    %165 = vector.extract_strided_slice %19 {offsets = [1, 3, 0], sizes = [1, 1, 8], strides = [1, 1, 1]} : vector<3x4x8xf32> to vector<1x1x8xf32>
    %166 = vector.shape_cast %165 : vector<1x1x8xf32> to vector<1x8xf32>
    %167 = vector.extract_strided_slice %19 {offsets = [2, 3, 0], sizes = [1, 1, 8], strides = [1, 1, 1]} : vector<3x4x8xf32> to vector<1x1x8xf32>
    %168 = vector.shape_cast %167 : vector<1x1x8xf32> to vector<1x8xf32>
    %cst_109 = arith.constant dense<0.000000e+00> : vector<128x8xf32>
    %169 = tpu.matmul %7, %158, %cst_109 {dimension_numbers = #tpu.dot_dimension_numbers<[1], [0], [0], [1], [0, 0, 1, 1], [], []>} : vector<128x32xbf16>, vector<32x8xbf16>, vector<128x8xf32> -> vector<128x8xf32>
    %170 = vector.broadcast %164 : vector<1x8xf32> to vector<128x8xf32>
    %171 = arith.addf %169, %170 : vector<128x8xf32>
    %172 = vector.shape_cast %171 : vector<128x8xf32> to vector<2x64x8xf32>
    %173 = arith.truncf %172 : vector<2x64x8xf32> to vector<2x64x8xbf16>
    %cst_110 = arith.constant dense<0.000000e+00> : vector<128x8xf32>
    %174 = tpu.matmul %3, %160, %cst_110 {dimension_numbers = #tpu.dot_dimension_numbers<[1], [0], [0], [1], [0, 0, 1, 1], [], []>} : vector<128x32xbf16>, vector<32x8xbf16>, vector<128x8xf32> -> vector<128x8xf32>
    %175 = vector.broadcast %166 : vector<1x8xf32> to vector<128x8xf32>
    %176 = arith.addf %174, %175 : vector<128x8xf32>
    %cst_111 = arith.constant dense<0.000000e+00> : vector<128x8xf32>
    %177 = tpu.matmul %3, %162, %cst_111 {dimension_numbers = #tpu.dot_dimension_numbers<[1], [0], [0], [1], [0, 0, 1, 1], [], []>} : vector<128x32xbf16>, vector<32x8xbf16>, vector<128x8xf32> -> vector<128x8xf32>
    %178 = vector.broadcast %168 : vector<1x8xf32> to vector<128x8xf32>
    %179 = arith.addf %177, %178 : vector<128x8xf32>
    %180 = vector.shape_cast %176 : vector<128x8xf32> to vector<2x64x8xf32>
    %181 = arith.truncf %180 : vector<2x64x8xf32> to vector<2x64x8xbf16>
    %182 = vector.shape_cast %179 : vector<128x8xf32> to vector<2x64x8xf32>
    %183 = arith.truncf %182 : vector<2x64x8xf32> to vector<2x64x8xbf16>
    "tpu.trace_start"() <{level = 10 : i32, message = "bld,bmd->blm"}> : () -> ()
    %cst_112 = arith.constant dense<0.000000e+00> : vector<2x64x64xf32>
    %184 = tpu.matmul %173, %181, %cst_112 {dimension_numbers = #tpu.dot_dimension_numbers<[2], [2], [1], [1], [0, 0, 0, 1, 1, 1], [0], [0]>} : vector<2x64x8xbf16>, vector<2x64x8xbf16>, vector<2x64x64xf32> -> vector<2x64x64xf32>
    "tpu.trace_stop"() : () -> ()
    %cst_113 = arith.constant dense<0xFF800000> : vector<2x64xf32>
    %185 = vector.multi_reduction <maximumf>, %184, %cst_113 [2] : vector<2x64x64xf32> to vector<2x64xf32>
    %186 = vector.shape_cast %185 : vector<2x64xf32> to vector<2x64x1xf32>
    %187 = vector.broadcast %186 : vector<2x64x1xf32> to vector<2x64x64xf32>
    %188 = arith.subf %184, %187 : vector<2x64x64xf32>
    %189 = math.exp %188 : vector<2x64x64xf32>
    %190 = arith.truncf %189 : vector<2x64x64xf32> to vector<2x64x64xbf16>
    "tpu.trace_start"() <{level = 10 : i32, message = "blm,bmd->bld"}> : () -> ()
    %cst_114 = arith.constant dense<0.000000e+00> : vector<2x64x8xf32>
    %191 = tpu.matmul %190, %183, %cst_114 {dimension_numbers = #tpu.dot_dimension_numbers<[2], [1], [1], [2], [0, 0, 0, 1, 1, 2], [0], [0]>} : vector<2x64x64xbf16>, vector<2x64x8xbf16>, vector<2x64x8xf32> -> vector<2x64x8xf32>
    "tpu.trace_stop"() : () -> ()
    %cst_115 = arith.constant dense<0.000000e+00> : vector<2x64xf32>
    %192 = vector.multi_reduction <add>, %189, %cst_115 [2] : vector<2x64x64xf32> to vector<2x64xf32>
    %193 = vector.shape_cast %192 : vector<2x64xf32> to vector<2x64x1xf32>
    %194 = tpu.reciprocal %193 {approx = true} : vector<2x64x1xf32> -> vector<2x64x1xf32>
    %195 = vector.broadcast %194 : vector<2x64x1xf32> to vector<2x64x8xf32>
    %196 = arith.mulf %191, %195 : vector<2x64x8xf32>
    %197 = vector.shape_cast %196 : vector<2x64x8xf32> to vector<128x8xf32>
    %198 = arith.truncf %197 : vector<128x8xf32> to vector<128x8xbf16>
    %c0_116 = arith.constant 0 : index
    %c3_117 = arith.constant 3 : index
    %c0_118 = arith.constant 0 : index
    %c0_119 = arith.constant 0 : index
    %199 = vector.load %arg7[%c0_116, %c3_117, %c0_118, %c0_119] : memref<1x4x8x32xbf16, #tpu.memory_space<vmem>>, vector<1x1x8x32xbf16>
    %200 = vector.shape_cast %199 : vector<1x1x8x32xbf16> to vector<8x32xbf16>
    %cst_120 = arith.constant dense<0.000000e+00> : vector<128x32xf32>
    %201 = tpu.matmul %198, %200, %cst_120 {dimension_numbers = #tpu.dot_dimension_numbers<[1], [0], [0], [1], [0, 0, 1, 1], [], []>} : vector<128x8xbf16>, vector<8x32xbf16>, vector<128x32xf32> -> vector<128x32xf32>
    %202 = arith.addf %156, %201 : vector<128x32xf32>
    %203 = vector.broadcast %10 : vector<1x32xf32> to vector<128x32xf32>
    %204 = arith.addf %202, %203 : vector<128x32xf32>
    %205 = arith.addf %204, %2 : vector<128x32xf32>
    %cst_121 = arith.constant dense<0.000000e+00> : vector<128xf32>
    %206 = vector.multi_reduction <add>, %205, %cst_121 [1] : vector<128x32xf32> to vector<128xf32>
    %207 = vector.shape_cast %206 : vector<128xf32> to vector<128x1xf32>
    %cst_122 = arith.constant 3.200000e+01 : f32
    %208 = vector.broadcast %cst_122 : f32 to vector<128x1xf32>
    %209 = arith.divf %207, %208 : vector<128x1xf32>
    %210 = vector.broadcast %209 : vector<128x1xf32> to vector<128x32xf32>
    %211 = arith.subf %205, %210 : vector<128x32xf32>
    %212 = arith.mulf %211, %211 : vector<128x32xf32>
    %cst_123 = arith.constant dense<0.000000e+00> : vector<128xf32>
    %213 = vector.multi_reduction <add>, %212, %cst_123 [1] : vector<128x32xf32> to vector<128xf32>
    %214 = vector.shape_cast %213 : vector<128xf32> to vector<128x1xf32>
    %cst_124 = arith.constant 3.200000e+01 : f32
    %215 = vector.broadcast %cst_124 : f32 to vector<128x1xf32>
    %216 = arith.divf %214, %215 : vector<128x1xf32>
    %217 = vector.broadcast %209 : vector<128x1xf32> to vector<128x32xf32>
    %218 = arith.subf %205, %217 : vector<128x32xf32>
    %cst_125 = arith.constant 9.99999974E-6 : f32
    %219 = vector.broadcast %cst_125 : f32 to vector<128x1xf32>
    %220 = arith.addf %216, %219 : vector<128x1xf32>
    %221 = math.rsqrt %220 : vector<128x1xf32>
    %222 = vector.broadcast %221 : vector<128x1xf32> to vector<128x32xf32>
    %223 = arith.mulf %218, %222 : vector<128x32xf32>
    %224 = vector.broadcast %11 : vector<1x32xf32> to vector<128x32xf32>
    %225 = arith.mulf %223, %224 : vector<128x32xf32>
    %226 = vector.broadcast %12 : vector<1x32xf32> to vector<128x32xf32>
    %227 = arith.addf %225, %226 : vector<128x32xf32>
    %228 = arith.truncf %227 : vector<128x32xf32> to vector<128x32xbf16>
    %c0_126 = arith.constant 0 : index
    %c0_127 = arith.constant 0 : index
    %c0_128 = arith.constant 0 : index
    %229 = vector.load %arg8[%c0_126, %c0_127, %c0_128] : memref<1x32x128xbf16, #tpu.memory_space<vmem>>, vector<1x32x128xbf16>
    %230 = vector.shape_cast %229 : vector<1x32x128xbf16> to vector<32x128xbf16>
    %cst_129 = arith.constant dense<0.000000e+00> : vector<128x128xf32>
    %231 = tpu.matmul %228, %230, %cst_129 {dimension_numbers = #tpu.dot_dimension_numbers<[1], [0], [0], [1], [0, 0, 1, 1], [], []>} : vector<128x32xbf16>, vector<32x128xbf16>, vector<128x128xf32> -> vector<128x128xf32>
    %232 = vector.broadcast %17 : vector<1x128xf32> to vector<128x128xf32>
    %233 = arith.addf %231, %232 : vector<128x128xf32>
    %cst_130 = arith.constant 0.000000e+00 : f32
    %234 = vector.broadcast %cst_130 : f32 to vector<128x128xf32>
    %235 = arith.maximumf %233, %234 : vector<128x128xf32>
    %236 = arith.truncf %235 : vector<128x128xf32> to vector<128x128xbf16>
    %c0_131 = arith.constant 0 : index
    %c0_132 = arith.constant 0 : index
    %c0_133 = arith.constant 0 : index
    %237 = vector.load %arg10[%c0_131, %c0_132, %c0_133] : memref<1x128x32xbf16, #tpu.memory_space<vmem>>, vector<1x128x32xbf16>
    %238 = vector.shape_cast %237 : vector<1x128x32xbf16> to vector<128x32xbf16>
    %cst_134 = arith.constant dense<0.000000e+00> : vector<128x32xf32>
    %239 = tpu.matmul %236, %238, %cst_134 {dimension_numbers = #tpu.dot_dimension_numbers<[1], [0], [0], [1], [0, 0, 1, 1], [], []>} : vector<128x128xbf16>, vector<128x32xbf16>, vector<128x32xf32> -> vector<128x32xf32>
    %240 = vector.broadcast %13 : vector<1x32xf32> to vector<128x32xf32>
    %241 = arith.addf %239, %240 : vector<128x32xf32>
    %242 = arith.addf %241, %227 : vector<128x32xf32>
    %cst_135 = arith.constant dense<0.000000e+00> : vector<128xf32>
    %243 = vector.multi_reduction <add>, %242, %cst_135 [1] : vector<128x32xf32> to vector<128xf32>
    %244 = vector.shape_cast %243 : vector<128xf32> to vector<128x1xf32>
    %cst_136 = arith.constant 3.200000e+01 : f32
    %245 = vector.broadcast %cst_136 : f32 to vector<128x1xf32>
    %246 = arith.divf %244, %245 : vector<128x1xf32>
    %247 = vector.broadcast %246 : vector<128x1xf32> to vector<128x32xf32>
    %248 = arith.subf %242, %247 : vector<128x32xf32>
    %249 = arith.mulf %248, %248 : vector<128x32xf32>
    %cst_137 = arith.constant dense<0.000000e+00> : vector<128xf32>
    %250 = vector.multi_reduction <add>, %249, %cst_137 [1] : vector<128x32xf32> to vector<128xf32>
    %251 = vector.shape_cast %250 : vector<128xf32> to vector<128x1xf32>
    %cst_138 = arith.constant 3.200000e+01 : f32
    %252 = vector.broadcast %cst_138 : f32 to vector<128x1xf32>
    %253 = arith.divf %251, %252 : vector<128x1xf32>
    %254 = vector.broadcast %246 : vector<128x1xf32> to vector<128x32xf32>
    %255 = arith.subf %242, %254 : vector<128x32xf32>
    %cst_139 = arith.constant 9.99999974E-6 : f32
    %256 = vector.broadcast %cst_139 : f32 to vector<128x1xf32>
    %257 = arith.addf %253, %256 : vector<128x1xf32>
    %258 = math.rsqrt %257 : vector<128x1xf32>
    %259 = vector.broadcast %258 : vector<128x1xf32> to vector<128x32xf32>
    %260 = arith.mulf %255, %259 : vector<128x32xf32>
    %261 = vector.broadcast %14 : vector<1x32xf32> to vector<128x32xf32>
    %262 = arith.mulf %260, %261 : vector<128x32xf32>
    %263 = vector.broadcast %15 : vector<1x32xf32> to vector<128x32xf32>
    %264 = arith.addf %262, %263 : vector<128x32xf32>
    %c0_140 = arith.constant 0 : index
    %c0_141 = arith.constant 0 : index
    %265 = vector.load %arg4[%c0_140, %c0_141] : memref<2x128xbf16, #tpu.memory_space<vmem>>, vector<2x128xbf16>
    %266 = arith.truncf %264 : vector<128x32xf32> to vector<128x32xbf16>
    %cst_142 = arith.constant dense<0.000000e+00> : vector<2x32xf32>
    %267 = tpu.matmul %265, %266, %cst_142 {dimension_numbers = #tpu.dot_dimension_numbers<[1], [0], [0], [1], [0, 0, 1, 1], [], []>} : vector<2x128xbf16>, vector<128x32xbf16>, vector<2x32xf32> -> vector<2x32xf32>
    %cst_143 = arith.constant 1.562500e-02 : f32
    %268 = vector.broadcast %cst_143 : f32 to vector<2x32xf32>
    %269 = arith.mulf %267, %268 : vector<2x32xf32>
    %c0_144 = arith.constant 0 : index
    %c0_145 = arith.constant 0 : index
    %c0_146 = arith.constant 0 : index
    %c0_147 = arith.constant 0 : index
    %270 = vector.load %arg12[%c0_144, %c0_145, %c0_146, %c0_147] : memref<1x1x2x32xf32, #tpu.memory_space<vmem>>, vector<1x1x2x32xf32>
    %271 = vector.shape_cast %270 : vector<1x1x2x32xf32> to vector<2x32xf32>
    %272 = vector.shape_cast %269 : vector<2x32xf32> to vector<1x1x2x32xf32>
    tpu.vector_store %arg12[%c0_144, %c0_145, %c0_146, %c0_147], %272 {strides = array<i32>} : memref<1x1x2x32xf32, #tpu.memory_space<vmem>>, vector<1x1x2x32xf32>,
    return
  }
  func.func @transform_0(%arg0: i32, %arg1: i32) -> (i32, i32, i32, i32) {
    %c0_i32 = arith.constant 0 : i32
    %c0_i32_0 = arith.constant 0 : i32
    %c0_i32_1 = arith.constant 0 : i32
    return %arg0, %arg1, %c0_i32, %c0_i32_0 : i32, i32, i32, i32
  }
  func.func @transform_1(%arg0: i32, %arg1: i32) -> (i32, i32, i32, i32) {
    %c1_i32 = arith.constant 1 : i32
    %0 = arith.subi %c1_i32, %arg0 : i32
    %c0_i32 = arith.constant 0 : i32
    %c0_i32_0 = arith.constant 0 : i32
    %c0_i32_1 = arith.constant 0 : i32
    return %0, %arg1, %c0_i32, %c0_i32_0 : i32, i32, i32, i32
  }
  func.func @transform_2(%arg0: i32, %arg1: i32) -> (i32, i32) {
    %c0_i32 = arith.constant 0 : i32
    %c0_i32_0 = arith.constant 0 : i32
    %c0_i32_1 = arith.constant 0 : i32
    return %c0_i32, %c0_i32_0 : i32, i32
  }
  func.func @transform_3(%arg0: i32, %arg1: i32) -> (i32, i32, i32, i32, i32) {
    %c0_i32 = arith.constant 0 : i32
    %c0_i32_0 = arith.constant 0 : i32
    %c0_i32_1 = arith.constant 0 : i32
    %c0_i32_2 = arith.constant 0 : i32
    %c0_i32_3 = arith.constant 0 : i32
    return %arg0, %c0_i32, %c0_i32_0, %c0_i32_1, %c0_i32_2 : i32, i32, i32, i32, i32
  }
  func.func @transform_4(%arg0: i32, %arg1: i32) -> (i32, i32, i32, i32) {
    %c0_i32 = arith.constant 0 : i32
    %c0_i32_0 = arith.constant 0 : i32
    %c0_i32_1 = arith.constant 0 : i32
    %c0_i32_2 = arith.constant 0 : i32
    return %arg0, %c0_i32, %c0_i32_0, %c0_i32_1 : i32, i32, i32, i32
  }
  func.func @transform_5(%arg0: i32, %arg1: i32) -> (i32, i32, i32, i32) {
    %c0_i32 = arith.constant 0 : i32
    %c0_i32_0 = arith.constant 0 : i32
    %c0_i32_1 = arith.constant 0 : i32
    %c0_i32_2 = arith.constant 0 : i32
    return %arg0, %c0_i32, %c0_i32_0, %c0_i32_1 : i32, i32, i32, i32
  }
  func.func @transform_6(%arg0: i32, %arg1: i32) -> (i32, i32, i32) {
    %c0_i32 = arith.constant 0 : i32
    %c0_i32_0 = arith.constant 0 : i32
    %c0_i32_1 = arith.constant 0 : i32
    return %arg0, %c0_i32, %c0_i32_0 : i32, i32, i32
  }
  func.func @transform_7(%arg0: i32, %arg1: i32) -> (i32, i32, i32) {
    %c0_i32 = arith.constant 0 : i32
    %c0_i32_0 = arith.constant 0 : i32
    %c0_i32_1 = arith.constant 0 : i32
    return %arg0, %c0_i32, %c0_i32_0 : i32, i32, i32
  }
  func.func @transform_8(%arg0: i32, %arg1: i32) -> (i32, i32, i32) {
    %c0_i32 = arith.constant 0 : i32
    %c0_i32_0 = arith.constant 0 : i32
    %c0_i32_1 = arith.constant 0 : i32
    return %arg0, %c0_i32, %c0_i32_0 : i32, i32, i32
  }
  func.func @transform_9(%arg0: i32, %arg1: i32) -> (i32, i32, i32) {
    %c0_i32 = arith.constant 0 : i32
    %c0_i32_0 = arith.constant 0 : i32
    %c0_i32_1 = arith.constant 0 : i32
    return %arg0, %c0_i32, %c0_i32_0 : i32, i32, i32
  }
  func.func @transform_10(%arg0: i32, %arg1: i32) -> (i32, i32, i32, i32) {
    %c0_i32 = arith.constant 0 : i32
    %c0_i32_0 = arith.constant 0 : i32
    %c0_i32_1 = arith.constant 0 : i32
    return %arg0, %arg1, %c0_i32, %c0_i32_0 : i32, i32, i32, i32
  }
}

</mosaic_0001>

<bundles_post_ra>
// kernel: tpu_custom_call.1
= control target key start
LH: loop header
LB: loop body
LE: loop exit
PB: predicated region body
PF: predicated region fallthrough
CT: control target
= control target key end

     0   :  { %15 = vsyncpa [#allocation3], 0  ;;  %s9871_s0 = inlined_call_operand.vmem [shape: f32[2,2,64,32], index: 0, kind: input, shape index: {}]   ;;  %s9872_s1 = inlined_call_operand.vmem [shape: f32[2,2,64,32], index: 1, kind: input, shape index: {}]   ;;  %s9873_s2 = inlined_call_operand.vmem [shape: bf16[2,128], index: 2, kind: input, shape index: {}]   ;;  %s9874_s3 = inlined_call_operand.vmem [shape: bf16[2,3,4,32,8], index: 3, kind: input, shape index: {}]   ;;  %s9875_s4 = inlined_call_operand.vmem [shape: f32[2,3,4,8], index: 4, kind: input, shape index: {}]   ;;  %s9876_s5 = inlined_call_operand.vmem [shape: bf16[2,4,8,32], index: 5, kind: input, shape index: {}]   ;;  %s9877_s6 = inlined_call_operand.vmem [shape: bf16[2,32,128], index: 6, kind: input, shape index: {}]   ;;  %s9878_s7 = inlined_call_operand.vmem [shape: f32[2,1,128], index: 7, kind: input, shape index: {}]   ;;  %s9879_s8 = inlined_call_operand.vmem [shape: bf16[2,128,32], index: 8, kind: input, shape index: {}]   ;;  %s9880_s9 = inlined_call_operand.vmem [shape: f32[2,6,32], index: 9, kind: input, shape index: {}]   ;;  %s9881_s10 = inlined_call_operand.hbm [shape: f32[2,1,2,32], index: 10, kind: output, shape index: {}]  }
   0x1   :  { %17 = vsyncpa [#allocation3 + $0x1], 0  ;;  %s7831_s13 = smov 0   ;;  %s7833_s14 = smov 0  }
   0x2   :  { %s7835_s15 = smov 0   ;;  %s7837_s16 = smov 0  }
   0x3   :  { %s7839_s17 = smov 0   ;;  %s7841_s18 = smov 0  }
   0x4 LB: > { %9922 = sst [smem:[#allocation5_spill]] %s7759_s15  ;;  %s5951_s19 = sadd.s32 4294967295, %s7771_s18   ;;  %s7771_s18 = sphi %s7841_s18, %s23_s18   ;;  %s7767_s17 = sphi %s7839_s17, %s10031_s17   ;;  %s7763_s16 = sphi %s7837_s16, %s10030_s16   ;;  %s7759_s15 = sphi %s7835_s15, %s10029_s15   ;;  %s7755_s14 = sphi %s7833_s14, %s10033_s14   ;;  %s7751_s13 = sphi %s7831_s13, %s10032_s13  }
   0x5   : > { %9923 = sst [smem:[#allocation6_spill]] %s7767_s17  ;;  %s5952_s20 = sadd.s32 4294967294, %s7771_s18  }
   0x6   : > { %s35_s21 = sadd.s32 1, %s7767_s17  ;;  %s305_s22 = sadd.s32 1, %s7759_s15 }
   0x7   : > { %p37_p0 = scmp.ge.s32.totalorder %s35_s21, 2  ;;  %p315_p1 = scmp.ne.s32.totalorder %s7759_s15, %s7755_s14 }
   0x8   : > { %p316_p2 = scmp.eq.s32.totalorder %s5951_s19, 1  ;;  %p321_p3 = scmp.ne.s32.totalorder %s7755_s14, %s7751_s13 }
   0x9   : > { %s10035_s21 = smov (%p37_p0, %s35_s21), 0  ;;  %p322_p5 = scmp.eq.s32.totalorder %s5952_s20, 1 }
   0xa   : > { %9924 = sst [smem:[#allocation7_spill]] %s10035_s21  ;;  %p7871_p4 = por %p316_p2, %p315_p1 }
   0xb   : > { %s300_s24 = ssub.s32 %s7767_s17, %s10035_s21  ;;  %p5955_p6 = scmp.ge.s32.totalorder %s7771_s18, 1 }
   0xc   : > { %p303_p7 = scmp.eq.s32.totalorder %s300_s24, 0  ;;  %p7878_p8 = por %p322_p5, %p321_p3 }
   0xd   : > { %p426_p9 = scmp.lt.s32.totalorder %s7771_s18, 3 }
   0xe   : > { %s7884_s26 = scalar_select %p303_p7, %s7759_s15, %s305_s22  }
   0xf   : > { %p427_p10 = pnand %p5955_p6, %p426_p9 }
  0x10   : > { %9927 = sst [smem:[#allocation8_spill]] %s7884_s26 }
  0x11   : > { %430 = sbr.rel (%p427_p10) target bundleno = 4634 (0x121a), region = 60 }
  0x16   : > { %p513_p11 = scmp.lt.s32.totalorder %s7763_s16, 1  ;;  %s523_s27 = ssub.s32 1, %s7763_s16  ;;  %vm652_vm0 = vcmask 261120   ;;  %v636_v54 = vlaneseq  ;;  %vm1048_vm1 = vcmask 64512   ;;  %vm1227_vm2 = vcmask 523264  }
  0x17   : > { %p525_p12 = scmp.lt.s32.totalorder %s523_s27, 1  ;;  %vm2503_vm3 = vcmask 1043456   ;;  %vm7774_vm4 = vmmov 0   ;;  %s509_s22 = sand.u32 1, %s7755_s14   ;;  %vm5755_vm5 = vcmask 254976  }
  0x18   : > { %s7889_s28 = scalar_select %p513_p11, %s7763_s16, 1  ;;  %v8027_v55 = vshrl.u32 %v636_v54, 7 }
  0x19   : > { %s10037_s27 = smov (!%p525_p12, %s523_s27), 1 }
  0x1a   : > { %s7260_s29 = smul.u32 192, %s7889_s28  ;;  %s6256_s30 = sshll.u32 %s7889_s28, 7  ;;  %9944 = vst [vmem:[#allocation25_spill] sm:$0xff] %v8027_v55  ;;  %v8035_v56 = vsub.s32 0, %v8027_v55 }
  0x1b   : > { %s6257_s11 = sshll.u32 %s10037_s27, 7  ;;  %s7896_s20 = scalar_lea.vmem %s9871_s0, %s6256_s30 }
  0x1c   : > { %s7901_s21 = scalar_lea.vmem %s9874_s3, %s7260_s29  ;;  %s7906_s15 = scalar_lea.vmem %s9872_s1, %s6257_s11  ;;  %v569_v5 = vld [vmem:[%s7896_s20] sm:$0xff]  ;;  %v570_v6 = vld [vmem:[%s7896_s20 + $0x8] sm:$0xff]  ;;  %v571_v13 = vld [vmem:[%s7896_s20 + $0x10] sm:$0xff]  ;;  %9945 = vst [vmem:[#allocation26_spill] sm:$0xff] %v8035_v56 }
  0x1d   : > { %v7319_v0 = vld [vmem:[%s7901_s21 + $0x8] sm:$0xff]   ;;  %v7320_v1 = vld [vmem:[%s7901_s21] sm:$0xff]   ;;  %v607_v4 = vld [vmem:[%s7906_s15 + $0x70] sm:$0xff]  ;;  %v7923_v11 = vpack.c.bf16 %v570_v6, %v569_v5  ;;  %s6258_s29 = sshll.u32 %s7889_s28, 4  ;;  %s6260_s26 = sshll.u32 %s7889_s28, 6 }
  0x1e   : > { %7220 = vmatprep.subr.bf16.mxu1 %v7319_v0  ;;  %v605_v2 = vld [vmem:[%s7906_s15 + $0x60] sm:$0xff]  ;;  %v606_v3 = vld [vmem:[%s7906_s15 + $0x68] sm:$0xff]  ;;  %6580 = vmatprep.subr.bf16.mxu0 %v7319_v0  ;;  %v608_v8 = vld [vmem:[%s7906_s15 + $0x78] sm:$0xff]  ;;  %s8617_s12 = scalar_lea.vmem %s9876_s5, %s6258_s29  ;;  %s555_s17 = scalar_lea.vmem %s9877_s6, %s6258_s29 }
  0x1f   : > { %7222 = vmatpush3.bf16.msra.mxu1 %v7319_v0  ;;  %v7915_v7 = vpack.c.bf16 %v606_v3, %v605_v2  ;;  %6581 = vmatpush3.bf16.msra.mxu0 %v7319_v0  ;;  %v7321_v9 = vld [vmem:[%s7901_s21 + $0x48] sm:$0xff]   ;;  %v7921_v10 = vpack.c.bf16 %v608_v8, %v607_v4  ;;  %9930 = vst [vmem:[#allocation11_spill] sm:$0xff] %v7923_v11  ;;  %v7322_v12 = vld [vmem:[%s7901_s21 + $0x40] sm:$0xff]   ;;  %v595_v16 = vld [vmem:[%s7906_s15 + $0x10] sm:$0xff]  ;;  %s9446_s11 = scalar_lea.vmem %s9879_s8, %s6260_s26  ;;  %s7775_s29 = smov [#allocation2]  }
  0x20   : > { %7221 = vmatprep.subr.bf16.mxu1 %v7320_v1  ;;  %6582 = vmatprep.subr.bf16.mxu0 %v7320_v1  ;;  %v593_v14 = vld [vmem:[%s7906_s15] sm:$0xff]  ;;  %v594_v15 = vld [vmem:[%s7906_s15 + $0x8] sm:$0xff]  ;;  %v596_v17 = vld [vmem:[%s7906_s15 + $0x18] sm:$0xff] }
  0x21   : > { %9928 = vst [vmem:[#allocation9_spill] sm:$0xff] %v7915_v7  ;;  %6596 = vmatprep.mubr.msk.bf16.mxu1 %vm652_vm0, %v7915_v7  ;;  %9929 = vst [vmem:[#allocation10_spill] sm:$0xff] %v7921_v10  ;;  %v572_v18 = vld [vmem:[%s7896_s20 + $0x18] sm:$0xff]  ;;  %v7936_v19 = vpack.c.bf16 %v594_v15, %v593_v14  ;;  %v7938_v20 = vpack.c.bf16 %v596_v17, %v595_v16  ;;  %v597_v21 = vld [vmem:[%s7906_s15 + $0x20] sm:$0xff] }
  0x22   : > { %v598_v22 = vld [vmem:[%s7906_s15 + $0x28] sm:$0xff]  ;;  %v573_v23 = vld [vmem:[%s7896_s20 + $0x20] sm:$0xff]  ;;  %v599_v26 = vld [vmem:[%s7906_s15 + $0x30] sm:$0xff]  ;;  %v7950_v28 = vpack.c.bf16 %v572_v18, %v571_v13 }
  0x23   : > { %7223 = vmatpush3.bf16.msra.mxu1 %v7320_v1  ;;  %6583 = vmatpush3.bf16.msra.mxu0 %v7320_v1  ;;  %9931 = vst [vmem:[#allocation12_spill] sm:$0xff] %v7936_v19  ;;  %9932 = vst [vmem:[#allocation13_spill] sm:$0xff] %v7938_v20  ;;  %v574_v24 = vld [vmem:[%s7896_s20 + $0x28] sm:$0xff]  ;;  %v7944_v25 = vpack.c.bf16 %v598_v22, %v597_v21  ;;  %v600_v27 = vld [vmem:[%s7906_s15 + $0x38] sm:$0xff] }
  0x24   : > { %6600 = vmatprep.subr.bf16.mxu1 %v7321_v9  ;;  %6584 = vmatprep.mubr.msk.bf16.mxu0 %vm652_vm0, %v7936_v19  ;;  %9934 = vst [vmem:[#allocation15_spill] sm:$0xff] %v7950_v28  ;;  %v601_v29 = vld [vmem:[%s7906_s15 + $0x40] sm:$0xff]  ;;  %v602_v30 = vld [vmem:[%s7906_s15 + $0x48] sm:$0xff]  ;;  %v7956_v31 = vpack.c.bf16 %v574_v24, %v573_v23  ;;  %v575_v32 = vld [vmem:[%s7896_s20 + $0x30] sm:$0xff]  ;;  %v7966_v36 = vpack.c.bf16 %v600_v27, %v599_v26 }
  0x25   : > { %9933 = vst [vmem:[#allocation14_spill] sm:$0xff] %v7944_v25  ;;  %v576_v33 = vld [vmem:[%s7896_s20 + $0x38] sm:$0xff]  ;;  %v577_v34 = vld [vmem:[%s7896_s20 + $0x40] sm:$0xff]  ;;  %v578_v35 = vld [vmem:[%s7896_s20 + $0x48] sm:$0xff]  ;;  %v7970_v37 = vpack.c.bf16 %v602_v30, %v601_v29 }
  0x26   : > { %6597 = vmatmul.mubr.msk.bf16.vlgmr.msra.gmra.mxu1 %vm652_vm0, %v7921_v10  ;;  %6585 = vmatmul.mubr.msk.bf16.vlgmr.msra.gmra.mxu0 %vm652_vm0, %v7938_v20  ;;  %9935 = vst [vmem:[#allocation16_spill] sm:$0xff] %v7956_v31  ;;  %9936 = vst [vmem:[#allocation17_spill] sm:$0xff] %v7966_v36  ;;  %v603_v38 = vld [vmem:[%s7906_s15 + $0x50] sm:$0xff]  ;;  %v604_v39 = vld [vmem:[%s7906_s15 + $0x58] sm:$0xff]  ;;  %v7974_v40 = vpack.c.bf16 %v576_v33, %v575_v32  ;;  %v7978_v41 = vpack.c.bf16 %v578_v35, %v577_v34  ;;  %s7261_s15 = smul.u32 12, %s7889_s28 }
  0x27   : > { %6601 = vmatpush3.bf16.msra.mxu1 %v7321_v9  ;;  %6604 = vmatprep.mubr.msk.bf16.mxu1 %vm652_vm0, %v7923_v11  ;;  %9937 = vst [vmem:[#allocation18_spill] sm:$0xff] %v7970_v37  ;;  %v7984_v42 = vpack.c.bf16 %v604_v39, %v603_v38  ;;  %v579_v43 = vld [vmem:[%s7896_s20 + $0x50] sm:$0xff]  ;;  %v580_v44 = vld [vmem:[%s7896_s20 + $0x58] sm:$0xff]  ;;  %v581_v45 = vld [vmem:[%s7896_s20 + $0x60] sm:$0xff] }
  0x28   : > { %6602 = vmatprep.subr.bf16.mxu1 %v7322_v12  ;;  %6588 = vmatprep.mubr.msk.bf16.mxu0 %vm652_vm0, %v7944_v25  ;;  %9938 = vst [vmem:[#allocation19_spill] sm:$0xff] %v7974_v40  ;;  %9939 = vst [vmem:[#allocation20_spill] sm:$0xff] %v7978_v41  ;;  %v582_v46 = vld [vmem:[%s7896_s20 + $0x68] sm:$0xff]  ;;  %v7992_v47 = vpack.c.bf16 %v580_v44, %v579_v43  ;;  %v583_v49 = vld [vmem:[%s7896_s20 + $0x70] sm:$0xff]  ;;  %s8032_s27 = scalar_lea.vmem %s9875_s4, %s7261_s15 }
  0x29   : > { %9940 = vst [vmem:[#allocation21_spill] sm:$0xff] %v7984_v42  ;;  %v7996_v48 = vpack.c.bf16 %v582_v46, %v581_v45  ;;  %v584_v50 = vld [vmem:[%s7896_s20 + $0x78] sm:$0xff]  ;;  %v7323_v52 = vld [vmem:[%s7901_s21 + $0x88] sm:$0xff]   ;;  %v7324_v53 = vld [vmem:[%s7901_s21 + $0x80] sm:$0xff]  }
  0x2a   : > { %9941 = vst [vmem:[#allocation22_spill] sm:$0xff] %v7992_v47  ;;  %v8006_v51 = vpack.c.bf16 %v584_v50, %v583_v49  ;;  %6620 = vmatprep.subr.bf16.mxu0 %v7323_v52  ;;  %v8038_v57 = vld [vmem:[%s8032_s27] sm:$0xf]  ;;  %v8068_v18 = vld [vmem:[%s8032_s27 + $0x4] sm:$0xf] }
  0x2b   : > { %6603 = vmatpush3.bf16.msra.mxu1 %v7322_v12  ;;  %9942 = vst [vmem:[#allocation23_spill] sm:$0xff] %v7996_v48  ;;  %6621 = vmatpush3.bf16.msra.mxu0 %v7323_v52  ;;  %v8042_v58 = vrot.slane %v8038_v57, %v8035_v56  ;;  %v8074_v26 = vrot.slane %v8068_v18, %v8035_v56 }
  0x2c   : > { %9943 = vst [vmem:[#allocation24_spill] sm:$0xff] %v8006_v51  ;;  %6622 = vmatprep.subr.bf16.mxu0 %v7324_v53 }
  0x2e   : > { %6605 = vmatmul.mubr.msk.bf16.vlgmr.msra.gmra.mxu1 %vm652_vm0, %v7950_v28  ;;  %6589 = vmatmul.mubr.msk.bf16.gmra.mxu0 %vm652_vm0, %v7966_v36 }
  0x2f   : > { %6608 = vmatprep.mubr.msk.bf16.mxu1 %vm652_vm0, %v7956_v31  ;;  %6592 = vmatprep.mubr.msk.bf16.mxu0 %vm652_vm0, %v7970_v37 }
  0x30   : > { %6623 = vmatpush3.bf16.msra.mxu0 %v7324_v53 }
  0x36   : > { %6609 = vmatmul.mubr.msk.bf16.gmra.mxu1 %vm652_vm0, %v7974_v40  ;;  %6593 = vmatmul.mubr.msk.bf16.gmra.mxu0 %vm652_vm0, %v7984_v42 }
  0x37   : > { %6612 = vmatprep.mubr.msk.bf16.mxu1 %vm652_vm0, %v7978_v41  ;;  %6624 = vmatprep.mubr.msk.bf16.mxu0 %vm652_vm0, %v7923_v11 }
  0x3e   : > { %6613 = vmatmul.mubr.msk.bf16.gmra.mxu1 %vm652_vm0, %v7992_v47  ;;  %6625 = vmatmul.mubr.msk.bf16.vlgmr.msra.gmra.mxu0 %vm652_vm0, %v7950_v28 }
  0x3f   : > { %6616 = vmatprep.mubr.msk.bf16.mxu1 %vm652_vm0, %v7996_v48  ;;  %6628 = vmatprep.mubr.msk.bf16.mxu0 %vm652_vm0, %v7956_v31 }
  0x46   : > { %6617 = vmatmul.mubr.msk.bf16.gmra.mxu1 %vm652_vm0, %v8006_v51  ;;  %6629 = vmatmul.mubr.msk.bf16.gmra.mxu0 %vm652_vm0, %v7974_v40 }
  0x47   : > { %6632 = vmatprep.mubr.msk.bf16.mxu0 %vm652_vm0, %v7978_v41 }
  0x4e   : > { %6633 = vmatmul.mubr.msk.bf16.gmra.mxu0 %vm652_vm0, %v7992_v47 }
  0x4f   : > { %6636 = vmatprep.mubr.msk.bf16.mxu0 %vm652_vm0, %v7996_v48 }
  0x56   : > { %6637 = vmatmul.mubr.msk.bf16.gmra.mxu0 %vm652_vm0, %v8006_v51 }
  0xe6   : > { %v6598_v59 = vpop.f32.mrf.mxu1  ;;  %v8049_v63 = vpop.f32.mrf.mxu0 }
  0xe7   : > { %v8045_v60 = vadd.f32 %v6598_v59, %v8042_v58 }
  0xe8   : > { %v8047_v61 = vpop.f32.mrf.mxu1  ;;  %v711_v2 = vpop.f32.mrf.mxu0 }
  0xe9   : > { %v712_v6 = vadd.f32 %v711_v2, %v8042_v58 }
  0xea   : > { %v6599_v62 = vpop.f32.mrf.mxu1  ;;  %v8058_v5 = vpop.f32.mrf.mxu0 }
  0xeb   : > { %v8052_v0 = vadd.f32 %v6599_v62, %v8042_v58 }
  0xec   : > { %v8054_v1 = vpop.f32.mrf.mxu1  ;;  %v714_v9 = vpop.f32.mrf.mxu0 }
  0xed   : > { %v781_v3 = vpack.c.bf16 %v8052_v0, %v8045_v60  ;;  %v715_v12 = vadd.f32 %v714_v9, %v8042_v58 }
  0xee   : > { %v6606_v4 = vpop.f32.mrf.mxu1  ;;  %v8062_v14 = vpop.f32.mrf.mxu0 }
  0xef   : > { %v774_v15 = vpack.c.bf16 %v715_v12, %v712_v6  ;;  %v865_v6 = vadd.f32 %v6606_v4, %v8074_v26 }
  0xf0   : > { %v856_v8 = vpop.f32.mrf.mxu1  ;;  %v8064_v17 = vpop.f32.mrf.mxu0 }
  0xf1   : > { %6648 = vmatprep.mubr.msk.bf16.mxu1 %vm1048_vm1, %v774_v15  ;;  %v857_v4 = vadd.f32 %v856_v8, %v8074_v26 }
  0xf2   : > { %v6607_v13 = vpop.f32.mrf.mxu1  ;;  %v8070_v22 = vpop.f32.mrf.mxu0 }
  0xf3   : > { %v868_v59 = vadd.f32 %v6607_v13, %v8074_v26 }
  0xf4   : > { %v859_v16 = vpop.f32.mrf.mxu1  ;;  %v730_v24 = vpop.f32.mrf.mxu0 }
  0xf5   : > { %v1033_v12 = vpack.c.bf16 %v868_v59, %v865_v6  ;;  %v728_v59 = vadd.f32 %v8064_v17, %v8042_v58  ;;  %v720_v6 = vadd.f32 %v8049_v63, %v8042_v58  ;;  %v736_v63 = vadd.f32 %v8062_v14, %v8042_v58 }
  0xf6   : > { %v6610_v21 = vpop.f32.mrf.mxu1  ;;  %v8076_v29 = vpop.f32.mrf.mxu0  ;;  %v763_v14 = vadd.f32 %v8054_v1, %v8042_v58  ;;  %v8146_v1 = vld [vmem:[%s8032_s27 + $0x8] sm:$0xf] }
  0xf7   : > { %v881_v30 = vadd.f32 %v6610_v21, %v8074_v26 }
  0xf8   : > { %v872_v23 = vpop.f32.mrf.mxu1  ;;  %v743_v34 = vpop.f32.mrf.mxu0 }
  0xf9   : > { %v873_v35 = vadd.f32 %v872_v23, %v8074_v26  ;;  %v744_v49 = vadd.f32 %v743_v34, %v8042_v58 }
  0xfa   : > { %v6611_v27 = vpop.f32.mrf.mxu1  ;;  %v8082_v44 = vpop.f32.mrf.mxu0 }
  0xfb   : > { %v884_v32 = vadd.f32 %v6611_v27, %v8074_v26  ;;  %v860_v27 = vadd.f32 %v859_v16, %v8074_v26 }
  0xfc   : > { %v875_v33 = vpop.f32.mrf.mxu1  ;;  %v746_v52 = vpop.f32.mrf.mxu0 }
  0xfd   : > { %v1035_v38 = vpack.c.bf16 %v884_v32, %v881_v30  ;;  %v876_v39 = vadd.f32 %v875_v33, %v8074_v26  ;;  %v747_v53 = vadd.f32 %v746_v52, %v8042_v58 }
  0xfe   : > { %v6614_v43 = vpop.f32.mrf.mxu1 }
  0xff   : > { %v1034_v45 = vpack.c.bf16 %v876_v39, %v873_v35  ;;  %7224 = vmatprep.subr.msk.bf16.mxu1 %vm1048_vm1, %v1035_v38  ;;  %v1071_v46 = vsel %vm1048_vm1, %v1035_v38, 0  ;;  %v778_v62 = vpack.c.bf16 %v747_v53, %v744_v49  ;;  %v1032_v38 = vpack.c.bf16 %v860_v27, %v857_v4 }
 0x100   : > { %v888_v50 = vpop.f32.mrf.mxu1  ;;  %6641 = vmatpush3.bf16.xpose.msra.mxu1 %v1071_v46  ;;  %v897_v46 = vadd.f32 %v6614_v43, %v8074_v26 }
 0x101   : > { %7225 = vmatprep.subr.msk.bf16.mxu1 %vm1048_vm1, %v1034_v45  ;;  %6664 = vmatprep.mubr.msk.bf16.mxu0 %vm1048_vm1, %v778_v62  ;;  %v1068_v15 = vsel %vm1048_vm1, %v1034_v45, 0  ;;  %v1065_v45 = vsel %vm1048_vm1, %v1033_v12, 0  ;;  %v1062_v52 = vsel %vm1048_vm1, %v1032_v38, 0  ;;  %v731_v62 = vadd.f32 %v730_v24, %v8042_v58 }
 0x102   : > { %v6615_v54 = vpop.f32.mrf.mxu1 }
 0x103   : > { %v900_v8 = vadd.f32 %v6615_v54, %v8074_v26  ;;  %v723_v54 = vadd.f32 %v8058_v5, %v8042_v58  ;;  %v739_v5 = vadd.f32 %v8070_v22, %v8042_v58  ;;  %v760_v22 = vadd.f32 %v8047_v61, %v8042_v58 }
 0x104   : > { %v891_v2 = vpop.f32.mrf.mxu1  ;;  %v922_v61 = vrot.slane %v8146_v1, %v8035_v56 }
 0x105   : > { %v1037_v49 = vpack.c.bf16 %v900_v8, %v897_v46  ;;  %v892_v43 = vadd.f32 %v891_v2, %v8074_v26  ;;  %v777_v24 = vpack.c.bf16 %v739_v5, %v736_v63  ;;  %v755_v2 = vadd.f32 %v8082_v44, %v8042_v58 }
 0x106   : > { %v6618_v9 = vpop.f32.mrf.mxu1  ;;  %v780_v27 = vpack.c.bf16 %v763_v14, %v760_v22 }
 0x107   : > { %v913_v30 = vadd.f32 %v6618_v9, %v8074_v26  ;;  %v776_v9 = vpack.c.bf16 %v731_v62, %v728_v59  ;;  %v1154_v17 = vsel %vm1048_vm1, %v1037_v49, 0 }
 0x108   : > { %v904_v21 = vpop.f32.mrf.mxu1  ;;  %6643 = vmatpush3.bf16.xpose.msra.mxu1 %v1068_v15  ;;  %v775_v15 = vpack.c.bf16 %v723_v54, %v720_v6 }
 0x109   : > { %7226 = vmatprep.subr.msk.bf16.mxu1 %vm1048_vm1, %v1033_v12  ;;  %v905_v33 = vadd.f32 %v904_v21, %v8074_v26  ;;  %v889_v12 = vadd.f32 %v888_v50, %v8074_v26  ;;  %v752_v50 = vadd.f32 %v8076_v29, %v8042_v58 }
 0x10a   : > { %v6619_v23 = vpop.f32.mrf.mxu1 }
 0x10b   : > { %v916_v13 = vadd.f32 %v6619_v23, %v8074_v26  ;;  %v1036_v21 = vpack.c.bf16 %v892_v43, %v889_v12  ;;  %v779_v23 = vpack.c.bf16 %v755_v2, %v752_v50 }
 0x10c   : > { %v907_v32 = vpop.f32.mrf.mxu1 }
 0x10d   : > { %v1039_v34 = vpack.c.bf16 %v916_v13, %v913_v30  ;;  %v908_v35 = vadd.f32 %v907_v32, %v8074_v26  ;;  %v1151_v26 = vsel %vm1048_vm1, %v1036_v21, 0  ;;  %v6626_v30 = vpop.f32.mrf.mxu0 }
 0x10e   : > { %v978_v0 = vadd.f32 %v6626_v30, %v922_v61 }
 0x10f   : > { %v1038_v39 = vpack.c.bf16 %v908_v35, %v905_v33  ;;  %7228 = vmatprep.subr.msk.bf16.mxu0 %vm1048_vm1, %v1039_v34  ;;  %v1160_v16 = vsel %vm1048_vm1, %v1039_v34, 0  ;;  %v969_v29 = vpop.f32.mrf.mxu0 }
 0x110   : > { %6645 = vmatpush3.bf16.xpose.msra.mxu1 %v1065_v45  ;;  %6657 = vmatpush3.bf16.xpose.msra.mxu0 %v1160_v16 }
 0x111   : > { %7227 = vmatprep.subr.msk.bf16.mxu1 %vm1048_vm1, %v1032_v38  ;;  %7229 = vmatprep.subr.msk.bf16.mxu0 %vm1048_vm1, %v1038_v39  ;;  %v1157_v53 = vsel %vm1048_vm1, %v1038_v39, 0  ;;  %v6627_v44 = vpop.f32.mrf.mxu0 }
 0x113   : > { %v972_v58 = vpop.f32.mrf.mxu0 }
 0x115   : > { %v6630_v13 = vpop.f32.mrf.mxu0 }
 0x116   : > { %v994_v4 = vadd.f32 %v6630_v13, %v922_v61 }
 0x117   : > { %v985_v32 = vpop.f32.mrf.mxu0 }
 0x118   : > { %6647 = vmatpush3.bf16.xpose.msra.mxu1 %v1062_v52  ;;  %6659 = vmatpush3.bf16.xpose.msra.mxu0 %v1157_v53  ;;  %v986_v34 = vadd.f32 %v985_v32, %v922_v61  ;;  %v973_v53 = vadd.f32 %v972_v58, %v922_v61 }
 0x119   : > { %7230 = vmatprep.subr.msk.bf16.mxu0 %vm1048_vm1, %v1037_v49  ;;  %v6631_v33 = vpop.f32.mrf.mxu0  ;;  %v970_v49 = vadd.f32 %v969_v29, %v922_v61 }
 0x11a   : > { %v997_v35 = vadd.f32 %v6631_v33, %v922_v61 }
 0x11b   : > { %v988_v60 = vpop.f32.mrf.mxu0  ;;  %v1040_v43 = vpack.c.bf16 %v973_v53, %v970_v49 }
 0x11c   : > { %v1043_v38 = vpack.c.bf16 %v997_v35, %v994_v4  ;;  %v989_v39 = vadd.f32 %v988_v60, %v922_v61 }
 0x11d   : > { %v6634_v45 = vpop.f32.mrf.mxu0 }
 0x11e   : > { %v1042_v16 = vpack.c.bf16 %v989_v39, %v986_v34  ;;  %6672 = vmatprep.subr.bf16.mxu1 %v1043_v38  ;;  %v1010_v8 = vadd.f32 %v6634_v45, %v922_v61 }
 0x11f   : > { %6649 = vmatmul.mubr.msk.bf16.vlgmr.msra.gmra.mxu1 %vm1048_vm1, %v775_v15  ;;  %v1001_v46 = vpop.f32.mrf.mxu0 }
 0x120   : > { %6652 = vmatprep.mubr.msk.bf16.mxu1 %vm1048_vm1, %v776_v9  ;;  %6661 = vmatpush3.bf16.xpose.msra.mxu0 %v1154_v17  ;;  %v1002_v59 = vadd.f32 %v1001_v46, %v922_v61 }
 0x121   : > { %7231 = vmatprep.subr.msk.bf16.mxu0 %vm1048_vm1, %v1036_v21  ;;  %6673 = vmatpush3.bf16.msra.mxu1 %v1043_v38  ;;  %v6635_v62 = vpop.f32.mrf.mxu0 }
 0x122   : > { %6674 = vmatprep.subr.bf16.mxu1 %v1042_v16  ;;  %v1013_v6 = vadd.f32 %v6635_v62, %v922_v61 }
 0x123   : > { %v1004_v54 = vpop.f32.mrf.mxu0 }
 0x124   : > { %v8150_v9 = vpack.c.bf16 %v1013_v6, %v1010_v8  ;;  %v1005_v12 = vadd.f32 %v1004_v54, %v922_v61 }
 0x125   : > { %6675 = vmatpush3.bf16.msra.mxu1 %v1042_v16  ;;  %v6638_v21 = vpop.f32.mrf.mxu0 }
 0x126   : > { %v8152_v15 = vpack.c.bf16 %v1005_v12, %v1002_v59  ;;  %v1026_v63 = vadd.f32 %v6638_v21, %v922_v61 }
 0x127   : > { %6653 = vmatmul.mubr.msk.bf16.gmra.mxu1 %vm1048_vm1, %v777_v24  ;;  %v1017_v17 = vpop.f32.mrf.mxu0 }
 0x128   : > { %6663 = vmatpush3.bf16.xpose.msra.mxu0 %v1151_v26  ;;  %v1018_v5 = vadd.f32 %v1017_v17, %v922_v61  ;;  %v7327_v17 = vld [vmem:[%s7901_s21 + $0x18] sm:$0xff]  }
 0x129   : > { %v6639_v24 = vpop.f32.mrf.mxu0  ;;  %6704 = vmatprep.subr.bf16.mxu0 %v7327_v17 }
 0x12a   : > { %v1029_v26 = vadd.f32 %v6639_v24, %v922_v61 }
 0x12b   : > { %v1020_v50 = vpop.f32.mrf.mxu0 }
 0x12c   : > { %v8154_v2 = vpack.c.bf16 %v1029_v26, %v1026_v63  ;;  %v1021_v14 = vadd.f32 %v1020_v50, %v922_v61  ;;  %v7328_v63 = vld [vmem:[%s7901_s21 + $0x10] sm:$0xff]  }
 0x12e   : > { %v8156_v22 = vpack.c.bf16 %v1021_v14, %v1018_v5 }
 0x12f   : > { %6665 = vmatmul.mubr.msk.bf16.vlgmr.msra.gmra.mxu0 %vm1048_vm1, %v779_v23 }
 0x130   : > { %6668 = vmatprep.mubr.msk.bf16.mxu0 %vm1048_vm1, %v780_v27  ;;  %6705 = vmatpush3.bf16.msra.mxu0 %v7327_v17 }
 0x131   : > { %6706 = vmatprep.subr.bf16.mxu0 %v7328_v63 }
 0x134   : > { %6707 = vmatpush3.bf16.msra.mxu0 %v7328_v63 }
 0x137   : > { %6669 = vmatmul.mubr.msk.bf16.gmra.mxu0 %vm1048_vm1, %v781_v3  ;;  %v981_v3 = vadd.f32 %v6627_v44, %v922_v61 }
 0x138   : > { %6708 = vmatprep.mubr.msk.bf16.mxu0 %vm652_vm0, %v7936_v19 }
 0x139   : > { %v1041_v52 = vpack.c.bf16 %v981_v3, %v978_v0 }
 0x13b   : > { %6676 = vmatprep.subr.bf16.mxu1 %v1041_v52 }
 0x13c   : > { %6677 = vmatpush3.bf16.msra.mxu1 %v1041_v52 }
 0x13d   : > { %6678 = vmatprep.subr.bf16.mxu1 %v1040_v43 }
 0x13f   : > { %6709 = vmatmul.mubr.msk.bf16.vlgmr.msra.gmra.mxu0 %vm652_vm0, %v7938_v20 }
 0x140   : > { %6679 = vmatpush3.bf16.msra.mxu1 %v1040_v43  ;;  %6712 = vmatprep.mubr.msk.bf16.mxu0 %vm652_vm0, %v7944_v25 }
 0x141   : > { %6688 = vmatprep.subr.bf16.mxu1 %v8154_v2 }
 0x147   : > { %6713 = vmatmul.mubr.msk.bf16.gmra.mxu0 %vm652_vm0, %v7966_v36 }
 0x148   : > { %6716 = vmatprep.mubr.msk.bf16.mxu0 %vm652_vm0, %v7970_v37 }
 0x14f   : > { %6717 = vmatmul.mubr.msk.bf16.gmra.mxu0 %vm652_vm0, %v7984_v42 }
 0x150   : > { %6720 = vmatprep.mubr.msk.bf16.mxu0 %vm652_vm0, %v7915_v7 }
 0x157   : > { %6721 = vmatmul.mubr.msk.bf16.gmra.mxu0 %vm652_vm0, %v7921_v10 }
 0x158   : > { %6748 = vmatprep.mubr.msk.bf16.mxu0 %vm652_vm0, %v7923_v11 }
 0x1df   : > { %v8159_v23 = vpop.f32.mrf.mxu1 }
 0x1e0   : > { %v1234_v27 = vsel %vm1227_vm2, %v8159_v23, -inf }
 0x1e1   : > { %1235 = vmax.xlane.f32.xlu1 %v1234_v27  ;;  %v8163_v30 = vpop.f32.mrf.mxu1 }
 0x1e2   : > { %v1228_v29 = vsel %vm1227_vm2, %v8163_v30, -inf }
 0x1e3   : > { %1229 = vmax.xlane.f32.xlu0 %v1228_v29  ;;  %v8167_v44 = vpop.f32.mrf.mxu1 }
 0x1e4   : > { %v1237_v58 = vsel %vm1227_vm2, %v8167_v44, -inf }
 0x1e5   : > { %1238 = vmax.xlane.f32.xlu1 %v1237_v58  ;;  %v8171_v61 = vpop.f32.mrf.mxu1 }
 0x1e6   : > { %v1231_v13 = vsel %vm1227_vm2, %v8171_v61, -inf }
 0x1e7   : > { %1232 = vmax.xlane.f32.xlu0 %v1231_v13  ;;  %v8175_v32 = vpop.f32.mrf.mxu1 }
 0x1e8   : > { %v1246_v60 = vsel %vm1227_vm2, %v8175_v32, -inf }
 0x1e9   : > { %v8177_v4 = vpop.f32.mrf.mxu1 }
 0x1ea   : > { %v1240_v33 = vsel %vm1227_vm2, %v8177_v4, -inf }
 0x1eb   : > { %1241 = vmax.xlane.f32.xlu0 %v1240_v33  ;;  %v8181_v34 = vpop.f32.mrf.mxu1 }
 0x1ec   : > { %v1249_v45 = vsel %vm1227_vm2, %v8181_v34, -inf }
 0x1ed   : > { %v8183_v35 = vpop.f32.mrf.mxu1 }
 0x1ee   : > { %v1243_v0 = vsel %vm1227_vm2, %v8183_v35, -inf }
 0x1ef   : > { %v8189_v3 = vpop.f32.mrf.mxu0  ;;  %1247 = vmax.xlane.f32.xlu0 %v1246_v60  ;;  %1244 = vmax.xlane.f32.xlu1 %v1243_v0 }
 0x1f0   : > { %v1258_v46 = vsel %vm1227_vm2, %v8189_v3, -inf }
 0x1f1   : > { %v8191_v38 = vpop.f32.mrf.mxu0 }
 0x1f2   : > { %v1252_v39 = vsel %vm1227_vm2, %v8191_v38, -inf }
 0x1f3   : > { %v8197_v16 = vpop.f32.mrf.mxu0  ;;  %1253 = vmax.xlane.f32.xlu0 %v1252_v39  ;;  %1250 = vmax.xlane.f32.xlu1 %v1249_v45 }
 0x1f4   : > { %v1261_v62 = vsel %vm1227_vm2, %v8197_v16, -inf }
 0x1f5   : > { %v8199_v8 = vpop.f32.mrf.mxu0 }
 0x1f6   : > { %v1255_v49 = vsel %vm1227_vm2, %v8199_v8, -inf }
 0x1f7   : > { %v8205_v52 = vpop.f32.mrf.mxu0  ;;  %1259 = vmax.xlane.f32.xlu0 %v1258_v46  ;;  %1256 = vmax.xlane.f32.xlu1 %v1255_v49 }
 0x1f8   : > { %v1270_v43 = vsel %vm1227_vm2, %v8205_v52, -inf }
 0x1f9   : > { %v8207_v53 = vpop.f32.mrf.mxu0 }
 0x1fa   : > { %v1264_v59 = vsel %vm1227_vm2, %v8207_v53, -inf }
 0x1fb   : > { %v8213_v6 = vpop.f32.mrf.mxu0  ;;  %1265 = vmax.xlane.f32.xlu0 %v1264_v59  ;;  %1262 = vmax.xlane.f32.xlu1 %v1261_v62 }
 0x1fc   : > { %v1273_v21 = vsel %vm1227_vm2, %v8213_v6, -inf }
 0x1fd   : > { %v8215_v54 = vpop.f32.mrf.mxu0 }
 0x1fe   : > { %v1267_v12 = vsel %vm1227_vm2, %v8215_v54, -inf }
 0x1ff   : > { %1271 = vmax.xlane.f32.xlu0 %v1270_v43  ;;  %1268 = vmax.xlane.f32.xlu1 %v1267_v12 }
 0x203   : > { %1274 = vmax.xlane.f32.xlu1 %v1273_v21 }
 0x26a   : > { %v1236_v5 = vpop.xlane.xlu1 %1235 }
 0x26b   : > { %v1278_v50 = vsub.f32 %v8159_v23, %v1236_v5 }
 0x26c   : > { %v1230_v24 = vpop.xlane.xlu0 %1229 }
 0x26d   : > { %v1276_v26 = vsub.f32 %v8163_v30, %v1230_v24  ;;  %v1296_v60 = vmul.f32 1.442695, %v1278_v50 }
 0x26e   : > { %v1239_v14 = vpop.xlane.xlu1 %1238 }
 0x26f   : > { %v1292_v27 = vmul.f32 1.442695, %v1276_v26  ;;  %v1279_v29 = vsub.f32 %v8167_v44, %v1239_v14 }
 0x270   : > { %v1233_v58 = vpop.xlane.xlu0 %1232 }
 0x271   : > { %v1298_v13 = vmul.f32 1.442695, %v1279_v29  ;;  %v1277_v33 = vsub.f32 %v8171_v61, %v1233_v58  ;;  %7353 = vpow2.f32 %v1292_v27 }
 0x273   : > { %v1294_v0 = vmul.f32 1.442695, %v1277_v33  ;;  %7355 = vpow2.f32 %v1298_v13 }
 0x274   : > { %v1242_v39 = vpop.xlane.xlu0 %1241 }
 0x275   : > { %7357 = vpow2.f32 %v1294_v0  ;;  %v1280_v45 = vsub.f32 %v8177_v4, %v1242_v39 }
 0x276   : > { %7359 = vpow2.f32 %v1296_v60 }
 0x277   : > { %v1300_v23 = vmul.f32 1.442695, %v1280_v45 }
 0x278   : > { %v1248_v30 = vpop.xlane.xlu0 %1247  ;;  %v1245_v46 = vpop.xlane.xlu1 %1244 }
 0x279   : > { %v1282_v49 = vsub.f32 %v8175_v32, %v1248_v30  ;;  %v1281_v44 = vsub.f32 %v8183_v35, %v1245_v46  ;;  %7361 = vpow2.f32 %v1300_v23 }
 0x27b   : > { %v1302_v59 = vmul.f32 1.442695, %v1281_v44  ;;  %v1304_v61 = vmul.f32 1.442695, %v1282_v49 }
 0x27c   : > { %v1254_v62 = vpop.xlane.xlu0 %1253  ;;  %v1251_v43 = vpop.xlane.xlu1 %1250 }
 0x27d   : > { %v1284_v12 = vsub.f32 %v8191_v38, %v1254_v62  ;;  %v1283_v21 = vsub.f32 %v8181_v34, %v1251_v43  ;;  %7363 = vpow2.f32 %v1302_v59  ;;  %v7325_v62 = vld [vmem:[%s7901_s21 + $0x58] sm:$0xff]  }
 0x27e   : > { %v8250_v4 = vpop.eup %7353  ;;  %7365 = vpow2.f32 %v1304_v61 }
 0x27f   : > { %v1306_v17 = vmul.f32 1.442695, %v1283_v21  ;;  %v1308_v32 = vmul.f32 1.442695, %v1284_v12 }
 0x280   : > { %v1260_v63 = vpop.xlane.xlu0 %1259  ;;  %v1257_v5 = vpop.xlane.xlu1 %1256 }
 0x281   : > { %v8252_v24 = vpop.eup %7355  ;;  %v1286_v35 = vsub.f32 %v8189_v3, %v1260_v63  ;;  %v1285_v26 = vsub.f32 %v8199_v8, %v1257_v5  ;;  %7367 = vpow2.f32 %v1306_v17  ;;  %v7326_v17 = vld [vmem:[%s7901_s21 + $0x50] sm:$0xff]  }
 0x282   : > { %v8256_v50 = vpop.eup %7357  ;;  %7369 = vpow2.f32 %v1308_v32 }
 0x283   : > { %v8258_v38 = vpop.eup %7359  ;;  %v1310_v34 = vmul.f32 1.442695, %v1285_v26  ;;  %v1324_v14 = vpack.c.bf16 %v8256_v50, %v8250_v4  ;;  %v1312_v13 = vmul.f32 1.442695, %v1286_v35 }
 0x284   : > { %v1325_v27 = vpack.c.bf16 %v8252_v24, %v8258_v38  ;;  %v1266_v29 = vpop.xlane.xlu0 %1265  ;;  %v1263_v58 = vpop.xlane.xlu1 %1262 }
 0x285   : > { %v1288_v3 = vsub.f32 %v8207_v53, %v1266_v29  ;;  %v1287_v8 = vsub.f32 %v8197_v16, %v1263_v58  ;;  %6680 = vmatprep.mubr.msk.bf16.mxu1 %vm1227_vm2, %v1324_v14  ;;  %7371 = vpow2.f32 %v1310_v34  ;;  %v7329_v34 = vld [vmem:[%s7901_s21 + $0x98] sm:$0xff]   ;;  %v7330_v14 = vld [vmem:[%s7901_s21 + $0x90] sm:$0xff]   ;;  %v6710_v29 = vpop.f32.mrf.mxu0 }
 0x286   : > { %6681 = vmatmul.mubr.msk.bf16.vlgmr.msra.gmra.mxu1 %vm1227_vm2, %v1325_v27  ;;  %7373 = vpow2.f32 %v1312_v13  ;;  %v8272_v30 = vpop.eup %7361  ;;  %6744 = vmatprep.subr.bf16.mxu0 %v7329_v34  ;;  %v8353_v27 = vsub.s32 1, %v8027_v55 }
 0x287   : > { %v1314_v33 = vmul.f32 1.442695, %v1287_v8  ;;  %6689 = vmatpush3.bf16.msra.mxu1 %v8154_v2  ;;  %v1316_v39 = vmul.f32 1.442695, %v1288_v3  ;;  %6745 = vmatpush3.bf16.msra.mxu0 %v7329_v34  ;;  %v1640_v13 = vpop.f32.mrf.mxu0 }
 0x288   : > { %6690 = vmatprep.subr.bf16.mxu1 %v8156_v22  ;;  %v1272_v60 = vpop.xlane.xlu0 %1271  ;;  %v1269_v0 = vpop.xlane.xlu1 %1268  ;;  %6746 = vmatprep.subr.bf16.mxu0 %v7330_v14  ;;  %9946 = vst [vmem:[#allocation27_spill] sm:$0xff] %v8353_v27  ;;  %v8359_v58 = vrot.slane %v8038_v57, %v8353_v27  ;;  %v1714_v42 = vrot.slane %v8068_v18, %v8353_v27 }
 0x289   : > { %v1290_v45 = vsub.f32 %v8205_v52, %v1272_v60  ;;  %v1289_v53 = vsub.f32 %v8215_v54, %v1269_v0  ;;  %7375 = vpow2.f32 %v1314_v33  ;;  %v6711_v8 = vpop.f32.mrf.mxu0 }
 0x28a   : > { %v8274_v16 = vpop.eup %7363  ;;  %7377 = vpow2.f32 %v1316_v39  ;;  %v8362_v3 = vadd.f32 %v6710_v29, %v8359_v58  ;;  %v1641_v33 = vadd.f32 %v1640_v13, %v8359_v58  ;;  %v8366_v60 = vadd.f32 %v6711_v8, %v8359_v58 }
 0x28b   : > { %v1318_v46 = vmul.f32 1.442695, %v1289_v53  ;;  %6691 = vmatpush3.bf16.msra.mxu1 %v8156_v22  ;;  %v1320_v2 = vmul.f32 1.442695, %v1290_v45  ;;  %v1326_v49 = vpack.c.bf16 %v8274_v16, %v8272_v30  ;;  %v8281_v54 = vpop.eup %7365  ;;  %6747 = vmatpush3.bf16.msra.mxu0 %v7330_v14  ;;  %v1643_v0 = vpop.f32.mrf.mxu0 }
 0x28c   : > { %6692 = vmatprep.subr.bf16.mxu1 %v8150_v9  ;;  %v1275_v23 = vpop.xlane.xlu1 %1274  ;;  %v1644_v45 = vadd.f32 %v1643_v0, %v8359_v58 }
 0x28d   : > { %v1291_v52 = vsub.f32 %v8213_v6, %v1275_v23  ;;  %7379 = vpow2.f32 %v1318_v46  ;;  %6684 = vmatprep.mubr.msk.bf16.mxu1 %vm1227_vm2, %v1326_v49  ;;  %v6714_v53 = vpop.f32.mrf.mxu0 }
 0x28e   : > { %v8284_v44 = vpop.eup %7367  ;;  %7381 = vpow2.f32 %v1320_v2  ;;  %6749 = vmatmul.mubr.msk.bf16.vlgmr.msra.gmra.mxu0 %vm652_vm0, %v7950_v28  ;;  %v1703_v46 = vpack.c.bf16 %v1644_v45, %v1641_v33  ;;  %v8372_v57 = vadd.f32 %v6714_v53, %v8359_v58 }
 0x28f   : > { %v1322_v59 = vmul.f32 1.442695, %v1291_v52  ;;  %6693 = vmatpush3.bf16.msra.mxu1 %v8150_v9  ;;  %v1327_v22 = vpack.c.bf16 %v8284_v44, %v8281_v54  ;;  %v8291_v6 = vpop.eup %7369  ;;  %6752 = vmatprep.mubr.msk.bf16.mxu0 %vm652_vm0, %v7956_v31  ;;  %v1656_v2 = vpop.f32.mrf.mxu0 }
 0x290   : > { %6694 = vmatprep.subr.bf16.mxu1 %v8152_v15  ;;  %v8375_v23 = vadd.f32 %v1656_v2, %v8359_v58 }
 0x291   : > { %7383 = vpow2.f32 %v1322_v59  ;;  %6685 = vmatmul.mubr.msk.bf16.gmra.mxu1 %vm1227_vm2, %v1327_v22  ;;  %v6715_v49 = vpop.f32.mrf.mxu0 }
 0x292   : > { %v8294_v43 = vpop.eup %7371  ;;  %v8379_v52 = vadd.f32 %v6715_v49, %v8359_v58 }
 0x293   : > { %6695 = vmatpush3.bf16.msra.mxu1 %v8152_v15  ;;  %v1328_v9 = vpack.c.bf16 %v8294_v43, %v8291_v6  ;;  %v8299_v61 = vpop.eup %7373  ;;  %v1659_v59 = vpop.f32.mrf.mxu0 }
 0x294   : > { %6724 = vmatprep.subr.bf16.mxu1 %v7325_v62 }
 0x295   : > { %6696 = vmatprep.mubr.msk.bf16.mxu1 %vm1227_vm2, %v1328_v9  ;;  %v6718_v9 = vpop.f32.mrf.mxu0 }
 0x296   : > { %v8302_v12 = vpop.eup %7375  ;;  %6753 = vmatmul.mubr.msk.bf16.gmra.mxu0 %vm652_vm0, %v7974_v40 }
 0x297   : > { %v1329_v21 = vpack.c.bf16 %v8302_v12, %v8299_v61  ;;  %v8307_v63 = vpop.eup %7377  ;;  %6756 = vmatprep.mubr.msk.bf16.mxu0 %vm652_vm0, %v7978_v41 }
 0x299   : > { %6697 = vmatmul.mubr.msk.bf16.vlgmr.msra.gmra.mxu1 %vm1227_vm2, %v1329_v21 }
 0x29a   : > { %v8310_v5 = vpop.eup %7379  ;;  %6725 = vmatpush3.bf16.msra.mxu1 %v7325_v62  ;;  %v8384_v62 = vadd.f32 %v1659_v59, %v8359_v58 }
 0x29b   : > { %v1330_v15 = vpack.c.bf16 %v8310_v5, %v8307_v63  ;;  %6726 = vmatprep.subr.bf16.mxu1 %v7326_v17  ;;  %v8314_v32 = vpop.eup %7381 }
 0x29d   : > { %6700 = vmatprep.mubr.msk.bf16.mxu1 %vm1227_vm2, %v1330_v15  ;;  %v1672_v15 = vpop.f32.mrf.mxu0 }
 0x29e   : > { %v8316_v35 = vpop.eup %7383  ;;  %6727 = vmatpush3.bf16.msra.mxu1 %v7326_v17  ;;  %6757 = vmatmul.mubr.msk.bf16.gmra.mxu0 %vm652_vm0, %v7992_v47  ;;  %v8389_v17 = vadd.f32 %v6718_v9, %v8359_v58  ;;  %v1673_v34 = vadd.f32 %v1672_v15, %v8359_v58 }
 0x29f   : > { %v1331_v26 = vpack.c.bf16 %v8316_v35, %v8314_v32  ;;  %6760 = vmatprep.mubr.msk.bf16.mxu0 %vm652_vm0, %v7996_v48 }
 0x2a1   : > { %6701 = vmatmul.mubr.msk.bf16.gmra.mxu1 %vm1227_vm2, %v1331_v26  ;;  %v6719_v26 = vpop.f32.mrf.mxu0 }
 0x2a2   : > { %6728 = vmatprep.mubr.msk.bf16.mxu1 %vm652_vm0, %v7923_v11  ;;  %v8393_v14 = vadd.f32 %v6719_v26, %v8359_v58 }
 0x2a3   : > { %v1675_v29 = vpop.f32.mrf.mxu0 }
 0x2a4   : > { %v1676_v8 = vadd.f32 %v1675_v29, %v8359_v58 }
 0x2a6   : > { %6761 = vmatmul.mubr.msk.bf16.gmra.mxu0 %vm652_vm0, %v8006_v51  ;;  %v1707_v33 = vpack.c.bf16 %v1676_v8, %v1673_v34 }
 0x2a8   : > { %6788 = vmatprep.mubr.msk.bf16.mxu0 %vm1048_vm1, %v1707_v33 }
 0x2a9   : > { %6729 = vmatmul.mubr.msk.bf16.vlgmr.msra.gmra.mxu1 %vm652_vm0, %v7950_v28 }
 0x2aa   : > { %6732 = vmatprep.mubr.msk.bf16.mxu1 %vm652_vm0, %v7956_v31 }
 0x2b1   : > { %6733 = vmatmul.mubr.msk.bf16.gmra.mxu1 %vm652_vm0, %v7974_v40 }
 0x2b2   : > { %6736 = vmatprep.mubr.msk.bf16.mxu1 %vm652_vm0, %v7978_v41 }
 0x2b9   : > { %6737 = vmatmul.mubr.msk.bf16.gmra.mxu1 %vm652_vm0, %v7992_v47 }
 0x2ba   : > { %6740 = vmatprep.mubr.msk.bf16.mxu1 %vm652_vm0, %v7996_v48 }
 0x2c1   : > { %6741 = vmatmul.mubr.msk.bf16.gmra.mxu1 %vm652_vm0, %v8006_v51 }
 0x2c2   : > { %6772 = vmatprep.mubr.msk.bf16.mxu1 %vm1048_vm1, %v1703_v46 }
 0x346   : > { %v8399_v0 = vpop.f32.mrf.mxu1 }
 0x348   : > { %v8401_v45 = vpop.f32.mrf.mxu1 }
 0x34a   : > { %v8403_v53 = vpop.f32.mrf.mxu1 }
 0x34c   : > { %v8405_v46 = vpop.f32.mrf.mxu1 }
 0x351   : > { %v8407_v2 = vpop.f32.mrf.mxu1 }
 0x353   : > { %v8409_v49 = vpop.f32.mrf.mxu1 }
 0x355   : > { %v8411_v59 = vpop.f32.mrf.mxu1 }
 0x357   : > { %v8413_v9 = vpop.f32.mrf.mxu1 }
 0x359   : > { %v8415_v15 = vpop.f32.mrf.mxu1 }
 0x35a   : > { %9947 = vst [vmem:[#allocation28_spill] sm:$0xff] %v8415_v15 }
 0x35b   : > { %v8417_v26 = vpop.f32.mrf.mxu1 }
 0x35d   : > { %v8419_v34 = vpop.f32.mrf.mxu1 }
 0x35f   : > { %v8421_v29 = vpop.f32.mrf.mxu1 }
 0x361   : > { %v8423_v8 = vpop.f32.mrf.mxu1 }
 0x362   : > { %9948 = vst [vmem:[#allocation29_spill] sm:$0xff] %v8423_v8 }
 0x363   : > { %v8425_v33 = vpop.f32.mrf.mxu1 }
 0x364   : > { %9949 = vst [vmem:[#allocation30_spill] sm:$0xff] %v8425_v33 }
 0x365   : > { %v8427_v13 = vpop.f32.mrf.mxu1 }
 0x366   : > { %9950 = vst [vmem:[#allocation31_spill] sm:$0xff] %v8427_v13 }
 0x367   : > { %v8429_v22 = vpop.f32.mrf.mxu1 }
 0x368   : > { %9951 = vst [vmem:[#allocation32_spill] sm:$0xff] %v8429_v22 }
 0x369   : > { %v6730_v21 = vpop.f32.mrf.mxu1 }
 0x36a   : > { %v1770_v8 = vadd.f32 %v6730_v21, %v1714_v42 }
 0x36b   : > { %v1761_v39 = vpop.f32.mrf.mxu1 }
 0x36d   : > { %v6731_v56 = vpop.f32.mrf.mxu1 }
 0x36e   : > { %v1773_v11 = vadd.f32 %v6731_v56, %v1714_v42 }
 0x36f   : > { %v1764_v10 = vpop.f32.mrf.mxu1 }
 0x371   : > { %v6734_v55 = vpop.f32.mrf.mxu1 }
 0x372   : > { %v1786_v36 = vadd.f32 %v6734_v55, %v1714_v42 }
 0x373   : > { %v1777_v7 = vpop.f32.mrf.mxu1 }
 0x374   : > { %v1778_v19 = vadd.f32 %v1777_v7, %v1714_v42 }
 0x375   : > { %v6735_v37 = vpop.f32.mrf.mxu1 }
 0x376   : > { %v1789_v25 = vadd.f32 %v6735_v37, %v1714_v42  ;;  %v1938_v37 = vpack.c.bf16 %v1773_v11, %v1770_v8 }
 0x377   : > { %v1780_v20 = vpop.f32.mrf.mxu1 }
 0x378   : > { %v1940_v51 = vpack.c.bf16 %v1789_v25, %v1786_v36  ;;  %v1781_v48 = vadd.f32 %v1780_v20, %v1714_v42  ;;  %v1765_v20 = vadd.f32 %v1764_v10, %v1714_v42  ;;  %v1969_v11 = vsel %vm1048_vm1, %v1938_v37, 0 }
 0x379   : > { %v6738_v47 = vpop.f32.mrf.mxu1 }
 0x37a   : > { %v1939_v41 = vpack.c.bf16 %v1781_v48, %v1778_v19  ;;  %7232 = vmatprep.subr.msk.bf16.mxu1 %vm1048_vm1, %v1940_v51  ;;  %v1975_v40 = vsel %vm1048_vm1, %v1940_v51, 0  ;;  %v1802_v21 = vadd.f32 %v6738_v47, %v1714_v42  ;;  %v9953_v47 = vpack.c.bf16 %v8384_v62, %v8375_v23 }
 0x37b   : > { %v1793_v31 = vpop.f32.mrf.mxu1  ;;  %6765 = vmatpush3.bf16.xpose.msra.mxu1 %v1975_v40  ;;  %v1762_v40 = vadd.f32 %v1761_v39, %v1714_v42  ;;  %v9955_v62 = vpack.c.bf16 %v8393_v14, %v8389_v17 }
 0x37c   : > { %7233 = vmatprep.subr.msk.bf16.mxu1 %vm1048_vm1, %v1939_v41  ;;  %v1972_v7 = vsel %vm1048_vm1, %v1939_v41, 0 }
 0x37d   : > { %v6739_v28 = vpop.f32.mrf.mxu1  ;;  %v1937_v56 = vpack.c.bf16 %v1765_v20, %v1762_v40  ;;  %v1827_v40 = vrot.slane %v8146_v1, %v8353_v27 }
 0x37e   : > { %v1805_v10 = vadd.f32 %v6739_v28, %v1714_v42 }
 0x37f   : > { %v1796_v18 = vpop.f32.mrf.mxu1  ;;  %v1966_v8 = vsel %vm1048_vm1, %v1937_v56, 0 }
 0x380   : > { %v1942_v39 = vpack.c.bf16 %v1805_v10, %v1802_v21 }
 0x381   : > { %v6742_v55 = vpop.f32.mrf.mxu1 }
 0x382   : > { %v1818_v36 = vadd.f32 %v6742_v55, %v1714_v42  ;;  %v2058_v28 = vsel %vm1048_vm1, %v1942_v39, 0 }
 0x383   : > { %v1809_v25 = vpop.f32.mrf.mxu1  ;;  %6767 = vmatpush3.bf16.xpose.msra.mxu1 %v1972_v7 }
 0x384   : > { %7234 = vmatprep.subr.msk.bf16.mxu1 %vm1048_vm1, %v1938_v37  ;;  %v1810_v13 = vadd.f32 %v1809_v25, %v1714_v42  ;;  %v9952_v25 = vpack.c.bf16 %v8366_v60, %v8362_v3 }
 0x385   : > { %v6743_v19 = vpop.f32.mrf.mxu1 }
 0x386   : > { %v1821_v48 = vadd.f32 %v6743_v19, %v1714_v42 }
 0x387   : > { %v1812_v51 = vpop.f32.mrf.mxu1 }
 0x388   : > { %v1944_v22 = vpack.c.bf16 %v1821_v48, %v1818_v36  ;;  %v1813_v33 = vadd.f32 %v1812_v51, %v1714_v42 }
 0x38a   : > { %v1943_v15 = vpack.c.bf16 %v1813_v33, %v1810_v13  ;;  %7236 = vmatprep.subr.msk.bf16.mxu0 %vm1048_vm1, %v1944_v22  ;;  %v2064_v41 = vsel %vm1048_vm1, %v1944_v22, 0  ;;  %v6722_v13 = vpop.f32.mrf.mxu0  ;;  %v1797_v33 = vadd.f32 %v1796_v18, %v1714_v42  ;;  %v1794_v22 = vadd.f32 %v1793_v31, %v1714_v42 }
 0x38b   : > { %6769 = vmatpush3.bf16.xpose.msra.mxu1 %v1969_v11  ;;  %6781 = vmatpush3.bf16.xpose.msra.mxu0 %v2064_v41  ;;  %v9954_v31 = vpack.c.bf16 %v8379_v52, %v8372_v57  ;;  %v1697_v19 = vadd.f32 %v6722_v13, %v8359_v58 }
 0x38c   : > { %7235 = vmatprep.subr.msk.bf16.mxu1 %vm1048_vm1, %v1937_v56  ;;  %7237 = vmatprep.subr.msk.bf16.mxu0 %vm1048_vm1, %v1943_v15  ;;  %v2061_v55 = vsel %vm1048_vm1, %v1943_v15, 0  ;;  %v1688_v37 = vpop.f32.mrf.mxu0  ;;  %v1941_v7 = vpack.c.bf16 %v1797_v33, %v1794_v22 }
 0x38d   : > { %v1689_v3 = vadd.f32 %v1688_v37, %v8359_v58 }
 0x38e   : > { %v6723_v15 = vpop.f32.mrf.mxu0  ;;  %v2055_v42 = vsel %vm1048_vm1, %v1941_v7, 0 }
 0x38f   : > { %v1700_v57 = vadd.f32 %v6723_v15, %v8359_v58 }
 0x390   : > { %v1691_v18 = vpop.f32.mrf.mxu0 }
 0x391   : > { %v1692_v60 = vadd.f32 %v1691_v18, %v8359_v58  ;;  %v1710_v52 = vpack.c.bf16 %v1700_v57, %v1697_v19 }
 0x392   : > { %v6750_v20 = vpop.f32.mrf.mxu0 }
 0x393   : > { %6771 = vmatpush3.bf16.xpose.msra.mxu1 %v1966_v8  ;;  %6783 = vmatpush3.bf16.xpose.msra.mxu0 %v2061_v55  ;;  %v1709_v23 = vpack.c.bf16 %v1692_v60, %v1689_v3 }
 0x394   : > { %7238 = vmatprep.subr.msk.bf16.mxu0 %vm1048_vm1, %v1942_v39  ;;  %v1874_v36 = vpop.f32.mrf.mxu0  ;;  %v1883_v39 = vadd.f32 %v6750_v20, %v1827_v40 }
 0x396   : > { %v6751_v48 = vpop.f32.mrf.mxu0 }
 0x397   : > { %v1886_v8 = vadd.f32 %v6751_v48, %v1827_v40 }
 0x398   : > { %v1877_v51 = vpop.f32.mrf.mxu0 }
 0x399   : > { %v1878_v1 = vadd.f32 %v1877_v51, %v1827_v40 }
 0x39a   : > { %6773 = vmatmul.mubr.msk.bf16.vlgmr.msra.gmra.mxu1 %vm1048_vm1, %v9952_v25  ;;  %v6754_v56 = vpop.f32.mrf.mxu0  ;;  %v1946_v25 = vpack.c.bf16 %v1886_v8, %v1883_v39 }
 0x39b   : > { %6776 = vmatprep.mubr.msk.bf16.mxu1 %vm1048_vm1, %v9953_v47  ;;  %6785 = vmatpush3.bf16.xpose.msra.mxu0 %v2058_v28  ;;  %v1899_v14 = vadd.f32 %v6754_v56, %v1827_v40 }
 0x39c   : > { %7239 = vmatprep.subr.msk.bf16.mxu0 %vm1048_vm1, %v1941_v7  ;;  %v1890_v17 = vpop.f32.mrf.mxu0  ;;  %v1875_v7 = vadd.f32 %v1874_v36, %v1827_v40 }
 0x39d   : > { %v1891_v41 = vadd.f32 %v1890_v17, %v1827_v40 }
 0x39e   : > { %v6755_v11 = vpop.f32.mrf.mxu0 }
 0x39f   : > { %v1902_v10 = vadd.f32 %v6755_v11, %v1827_v40 }
 0x3a0   : > { %v1893_v21 = vpop.f32.mrf.mxu0 }
 0x3a1   : > { %v1948_v58 = vpack.c.bf16 %v1902_v10, %v1899_v14  ;;  %v1894_v55 = vadd.f32 %v1893_v21, %v1827_v40 }
 0x3a2   : > { %6777 = vmatmul.mubr.msk.bf16.gmra.mxu1 %vm1048_vm1, %v9954_v31  ;;  %v6758_v13 = vpop.f32.mrf.mxu0  ;;  %v1945_v31 = vpack.c.bf16 %v1878_v1, %v1875_v7 }
 0x3a3   : > { %6787 = vmatpush3.bf16.xpose.msra.mxu0 %v2055_v42  ;;  %v1947_v33 = vpack.c.bf16 %v1894_v55, %v1891_v41  ;;  %6796 = vmatprep.subr.bf16.mxu1 %v1948_v58  ;;  %v1915_v22 = vadd.f32 %v6758_v13, %v1827_v40 }
 0x3a4   : > { %6797 = vmatpush3.bf16.msra.mxu1 %v1948_v58  ;;  %v1906_v37 = vpop.f32.mrf.mxu0 }
 0x3a5   : > { %6798 = vmatprep.subr.bf16.mxu1 %v1947_v33  ;;  %v1907_v28 = vadd.f32 %v1906_v37, %v1827_v40 }
 0x3a6   : > { %v6759_v47 = vpop.f32.mrf.mxu0 }
 0x3a7   : > { %v1918_v15 = vadd.f32 %v6759_v47, %v1827_v40 }
 0x3a8   : > { %6799 = vmatpush3.bf16.msra.mxu1 %v1947_v33  ;;  %v1909_v18 = vpop.f32.mrf.mxu0 }
 0x3a9   : > { %6800 = vmatprep.subr.bf16.mxu1 %v1946_v25  ;;  %v8473_v42 = vpack.c.bf16 %v1918_v15, %v1915_v22  ;;  %v1910_v3 = vadd.f32 %v1909_v18, %v1827_v40 }
 0x3aa   : > { %6789 = vmatmul.mubr.msk.bf16.vlgmr.msra.gmra.mxu0 %vm1048_vm1, %v9955_v62 }
 0x3ab   : > { %6792 = vmatprep.mubr.msk.bf16.mxu0 %vm1048_vm1, %v1709_v23  ;;  %v8475_v60 = vpack.c.bf16 %v1910_v3, %v1907_v28  ;;  %v6762_v23 = vpop.f32.mrf.mxu0 }
 0x3ac   : > { %6801 = vmatpush3.bf16.msra.mxu1 %v1946_v25  ;;  %v1931_v19 = vadd.f32 %v6762_v23, %v1827_v40 }
 0x3ad   : > { %6802 = vmatprep.subr.bf16.mxu1 %v1945_v31  ;;  %v1922_v62 = vpop.f32.mrf.mxu0 }
 0x3ae   : > { %v1923_v57 = vadd.f32 %v1922_v62, %v1827_v40 }
 0x3b0   : > { %6803 = vmatpush3.bf16.msra.mxu1 %v1945_v31 }
 0x3b2   : > { %6793 = vmatmul.mubr.msk.bf16.gmra.mxu0 %vm1048_vm1, %v1710_v52  ;;  %v6763_v52 = vpop.f32.mrf.mxu0 }
 0x3b3   : > { %v1934_v20 = vadd.f32 %v6763_v52, %v1827_v40 }
 0x3b4   : > { %v1925_v36 = vpop.f32.mrf.mxu0 }
 0x3b5   : > { %v8477_v48 = vpack.c.bf16 %v1934_v20, %v1931_v19  ;;  %v1926_v51 = vadd.f32 %v1925_v36, %v1827_v40 }
 0x3b7   : > { %v8479_v56 = vpack.c.bf16 %v1926_v51, %v1923_v57  ;;  %6812 = vmatprep.subr.bf16.mxu1 %v8477_v48  ;;  %v1486_v51 = vsel %vm1227_vm2, %v8250_v4, 0.0  ;;  %v1504_v4 = vsel %vm1227_vm2, %v8281_v54, 0.0  ;;  %v1519_v54 = vsel %vm1227_vm2, %v8302_v12, 0.0 }
 0x45a   : > { %v8482_v17 = vpop.f32.mrf.mxu1 }
 0x45b   : > { %v2137_v21 = vsel %vm1227_vm2, %v8482_v17, -inf }
 0x45c   : > { %v8484_v14 = vpop.f32.mrf.mxu1 }
 0x45d   : > { %v2131_v11 = vsel %vm1227_vm2, %v8484_v14, -inf }
 0x45e   : > { %2132 = vmax.xlane.f32.xlu0 %v2131_v11  ;;  %v8488_v41 = vpop.f32.mrf.mxu1 }
 0x45f   : > { %v2140_v58 = vsel %vm1227_vm2, %v8488_v41, -inf }
 0x460   : > { %v8490_v10 = vpop.f32.mrf.mxu1 }
 0x461   : > { %v2134_v40 = vsel %vm1227_vm2, %v8490_v10, -inf }
 0x462   : > { %2138 = vmax.xlane.f32.xlu0 %v2137_v21  ;;  %2135 = vmax.xlane.f32.xlu1 %v2134_v40  ;;  %v8496_v39 = vpop.f32.mrf.mxu1  ;;  %v1492_v21 = vsel %vm1227_vm2, %v8258_v38, 0.0  ;;  %v1489_v40 = vsel %vm1227_vm2, %v8256_v50, 0.0  ;;  %v1510_v50 = vsel %vm1227_vm2, %v8291_v6, 0.0  ;;  %v1507_v38 = vsel %vm1227_vm2, %v8284_v44, 0.0 }
 0x463   : > { %v2149_v22 = vsel %vm1227_vm2, %v8496_v39, -inf  ;;  %v1528_v44 = vsel %vm1227_vm2, %v8314_v32, 0.0  ;;  %v1525_v6 = vsel %vm1227_vm2, %v8310_v5, 0.0 }
 0x464   : > { %v8498_v8 = vpop.f32.mrf.mxu1 }
 0x465   : > { %v2143_v55 = vsel %vm1227_vm2, %v8498_v8, -inf }
 0x466   : > { %2141 = vmax.xlane.f32.xlu1 %v2140_v58  ;;  %2144 = vmax.xlane.f32.xlu0 %v2143_v55  ;;  %v8504_v13 = vpop.f32.mrf.mxu1  ;;  %v1498_v58 = vsel %vm1227_vm2, %v8272_v30, 0.0  ;;  %v1495_v55 = vsel %vm1227_vm2, %v8252_v24, 0.0  ;;  %v1516_v24 = vsel %vm1227_vm2, %v8299_v61, 0.0  ;;  %v1513_v30 = vsel %vm1227_vm2, %v8294_v43, 0.0 }
 0x467   : > { %v2152_v28 = vsel %vm1227_vm2, %v8504_v13, -inf  ;;  %v1531_v43 = vsel %vm1227_vm2, %v8316_v35, 0.0 }
 0x468   : > { %v8506_v33 = vpop.f32.mrf.mxu1 }
 0x469   : > { %v2146_v37 = vsel %vm1227_vm2, %v8506_v33, -inf }
 0x46a   : > { %v8512_v7 = vpop.f32.mrf.mxu0  ;;  %2150 = vmax.xlane.f32.xlu0 %v2149_v22  ;;  %2147 = vmax.xlane.f32.xlu1 %v2146_v37  ;;  %v1501_v22 = vsel %vm1227_vm2, %v8274_v16, 0.0  ;;  %v1522_v16 = vsel %vm1227_vm2, %v8307_v63, 0.0 }
 0x46b   : > { %v2161_v18 = vsel %vm1227_vm2, %v8512_v7, -inf }
 0x46c   : > { %v8514_v25 = vpop.f32.mrf.mxu0 }
 0x46d   : > { %v2155_v1 = vsel %vm1227_vm2, %v8514_v25, -inf }
 0x46e   : > { %v8520_v47 = vpop.f32.mrf.mxu0  ;;  %2156 = vmax.xlane.f32.xlu0 %v2155_v1  ;;  %2153 = vmax.xlane.f32.xlu1 %v2152_v28 }
 0x46f   : > { %v2164_v19 = vsel %vm1227_vm2, %v8520_v47, -inf }
 0x470   : > { %v8522_v15 = vpop.f32.mrf.mxu0 }
 0x471   : > { %v2158_v31 = vsel %vm1227_vm2, %v8522_v15, -inf }
 0x472   : > { %v8528_v3 = vpop.f32.mrf.mxu0  ;;  %2162 = vmax.xlane.f32.xlu0 %v2161_v18  ;;  %2159 = vmax.xlane.f32.xlu1 %v2158_v31 }
 0x473   : > { %v2173_v20 = vsel %vm1227_vm2, %v8528_v3, -inf }
 0x474   : > { %v8530_v23 = vpop.f32.mrf.mxu0 }
 0x475   : > { %v2167_v62 = vsel %vm1227_vm2, %v8530_v23, -inf }
 0x476   : > { %v8536_v57 = vpop.f32.mrf.mxu0  ;;  %2168 = vmax.xlane.f32.xlu0 %v2167_v62  ;;  %2165 = vmax.xlane.f32.xlu1 %v2164_v19 }
 0x477   : > { %v2176_v11 = vsel %vm1227_vm2, %v8536_v57, -inf }
 0x478   : > { %v8538_v52 = vpop.f32.mrf.mxu0 }
 0x479   : > { %v2170_v36 = vsel %vm1227_vm2, %v8538_v52, -inf }
 0x47a   : > { %2174 = vmax.xlane.f32.xlu0 %v2173_v20  ;;  %2171 = vmax.xlane.f32.xlu1 %v2170_v36 }
 0x47e   : > { %1487 = vadd.xlane.f32.xlu0 %v1486_v51  ;;  %2177 = vmax.xlane.f32.xlu1 %v2176_v11 }
 0x482   : > { %1493 = vadd.xlane.f32.xlu0 %v1492_v21  ;;  %1490 = vadd.xlane.f32.xlu1 %v1489_v40 }
 0x486   : > { %1499 = vadd.xlane.f32.xlu0 %v1498_v58  ;;  %1496 = vadd.xlane.f32.xlu1 %v1495_v55 }
 0x48a   : > { %1505 = vadd.xlane.f32.xlu0 %v1504_v4  ;;  %1502 = vadd.xlane.f32.xlu1 %v1501_v22 }
 0x48e   : > { %1511 = vadd.xlane.f32.xlu0 %v1510_v50  ;;  %1508 = vadd.xlane.f32.xlu1 %v1507_v38 }
 0x492   : > { %1517 = vadd.xlane.f32.xlu0 %v1516_v24  ;;  %1514 = vadd.xlane.f32.xlu1 %v1513_v30 }
 0x496   : > { %1523 = vadd.xlane.f32.xlu0 %v1522_v16  ;;  %1520 = vadd.xlane.f32.xlu1 %v1519_v54 }
 0x49a   : > { %1529 = vadd.xlane.f32.xlu0 %v1528_v44  ;;  %1526 = vadd.xlane.f32.xlu1 %v1525_v6 }
 0x49e   : > { %1532 = vadd.xlane.f32.xlu1 %v1531_v43 }
 0x4e7   : > { %v2133_v61 = vpop.xlane.xlu0 %2132 }
 0x4e8   : > { %v2179_v63 = vsub.f32 %v8484_v14, %v2133_v61 }
 0x4ea   : > { %v2195_v37 = vmul.f32 1.442695, %v2179_v63 }
 0x4eb   : > { %v2139_v1 = vpop.xlane.xlu0 %2138  ;;  %v2136_v12 = vpop.xlane.xlu1 %2135 }
 0x4ec   : > { %7385 = vpow2.f32 %v2195_v37  ;;  %v2181_v28 = vsub.f32 %v8482_v17, %v2139_v1  ;;  %v2180_v32 = vsub.f32 %v8490_v10, %v2136_v12 }
 0x4ee   : > { %v2199_v18 = vmul.f32 1.442695, %v2181_v28  ;;  %v2197_v31 = vmul.f32 1.442695, %v2180_v32 }
 0x4ef   : > { %v2142_v5 = vpop.xlane.xlu1 %2141  ;;  %v2145_v62 = vpop.xlane.xlu0 %2144 }
 0x4f0   : > { %7387 = vpow2.f32 %v2199_v18  ;;  %v2182_v19 = vsub.f32 %v8488_v41, %v2142_v5  ;;  %v2183_v35 = vsub.f32 %v8498_v8, %v2145_v62 }
 0x4f1   : > { %7389 = vpow2.f32 %v2197_v31 }
 0x4f2   : > { %v2201_v20 = vmul.f32 1.442695, %v2182_v19  ;;  %v2203_v14 = vmul.f32 1.442695, %v2183_v35 }
 0x4f3   : > { %v2151_v36 = vpop.xlane.xlu0 %2150  ;;  %v2148_v51 = vpop.xlane.xlu1 %2147 }
 0x4f4   : > { %7391 = vpow2.f32 %v2201_v20  ;;  %v2185_v11 = vsub.f32 %v8496_v39, %v2151_v36  ;;  %v2184_v17 = vsub.f32 %v8506_v33, %v2148_v51 }
 0x4f5   : > { %7393 = vpow2.f32 %v2203_v14 }
 0x4f6   : > { %v2207_v10 = vmul.f32 1.442695, %v2185_v11  ;;  %v2205_v21 = vmul.f32 1.442695, %v2184_v17 }
 0x4f7   : > { %v2157_v40 = vpop.xlane.xlu0 %2156  ;;  %v2154_v58 = vpop.xlane.xlu1 %2153 }
 0x4f8   : > { %7395 = vpow2.f32 %v2207_v10  ;;  %v2187_v41 = vsub.f32 %v8514_v25, %v2157_v40  ;;  %v2186_v8 = vsub.f32 %v8504_v13, %v2154_v58 }
 0x4f9   : > { %v7386_v55 = vpop.eup %7385  ;;  %7397 = vpow2.f32 %v2205_v21 }
 0x4fa   : > { %v2211_v4 = vmul.f32 1.442695, %v2187_v41  ;;  %v2209_v22 = vmul.f32 1.442695, %v2186_v8  ;;  %v2389_v50 = vsel %vm1227_vm2, %v7386_v55, 0.0 }
 0x4fb   : > { %2390 = vadd.xlane.f32.xlu0 %v2389_v50  ;;  %v2163_v39 = vpop.xlane.xlu0 %2162  ;;  %v2160_v38 = vpop.xlane.xlu1 %2159 }
 0x4fc   : > { %7399 = vpow2.f32 %v2211_v4  ;;  %v2189_v33 = vsub.f32 %v8512_v7, %v2163_v39  ;;  %v2188_v24 = vsub.f32 %v8522_v15, %v2160_v38  ;;  %v1574_v38 = vld [vmem:[%s8617_s12] sm:$0xf] }
 0x4fd   : > { %v7388_v30 = vpop.eup %7387  ;;  %7401 = vpow2.f32 %v2209_v22 }
 0x4fe   : > { %v7390_v16 = vpop.eup %7389  ;;  %v2215_v25 = vmul.f32 1.442695, %v2189_v33  ;;  %v2213_v54 = vmul.f32 1.442695, %v2188_v24  ;;  %v2395_v13 = vsel %vm1227_vm2, %v7388_v30, 0.0 }
 0x4ff   : > { %2396 = vadd.xlane.f32.xlu0 %v2395_v13  ;;  %v2169_v44 = vpop.xlane.xlu0 %2168  ;;  %v2392_v6 = vsel %vm1227_vm2, %v7390_v16, 0.0  ;;  %v2166_v43 = vpop.xlane.xlu1 %2165  ;;  %v2227_v61 = vpack.c.bf16 %v7390_v16, %v7386_v55  ;;  %v2629_v13 = vsel %vm2503_vm3, %v1574_v38, 0 }
 0x500   : > { %7403 = vpow2.f32 %v2215_v25  ;;  %v2191_v63 = vsub.f32 %v8530_v23, %v2169_v44  ;;  %2393 = vadd.xlane.f32.xlu1 %v2392_v6  ;;  %v2190_v7 = vsub.f32 %v8520_v47, %v2166_v43 }
 0x501   : > { %v7392_v15 = vpop.eup %7391  ;;  %7405 = vpow2.f32 %v2213_v54  ;;  %6804 = vmatprep.mubr.msk.bf16.mxu1 %vm1227_vm2, %v2227_v61 }
 0x502   : > { %v7394_v37 = vpop.eup %7393  ;;  %v2228_v1 = vpack.c.bf16 %v7392_v15, %v7388_v30  ;;  %v2219_v12 = vmul.f32 1.442695, %v2191_v63  ;;  %v2217_v28 = vmul.f32 1.442695, %v2190_v7  ;;  %v2398_v32 = vsel %vm1227_vm2, %v7392_v15, 0.0 }
 0x503   : > { %v2401_v18 = vsel %vm1227_vm2, %v7394_v37, 0.0  ;;  %v2175_v31 = vpop.xlane.xlu0 %2174  ;;  %v2172_v5 = vpop.xlane.xlu1 %2171 }
 0x504   : > { %7407 = vpow2.f32 %v2219_v12  ;;  %2402 = vadd.xlane.f32.xlu0 %v2401_v18  ;;  %v2193_v23 = vsub.f32 %v8528_v3, %v2175_v31  ;;  %2399 = vadd.xlane.f32.xlu1 %v2398_v32  ;;  %v2192_v47 = vsub.f32 %v8538_v52, %v2172_v5 }
 0x505   : > { %v7396_v62 = vpop.eup %7395  ;;  %7409 = vpow2.f32 %v2217_v28  ;;  %6805 = vmatmul.mubr.msk.bf16.vlgmr.msra.gmra.mxu1 %vm1227_vm2, %v2228_v1 }
 0x506   : > { %v7398_v19 = vpop.eup %7397  ;;  %v2223_v35 = vmul.f32 1.442695, %v2193_v23  ;;  %v2221_v20 = vmul.f32 1.442695, %v2192_v47  ;;  %6813 = vmatpush3.bf16.msra.mxu1 %v8477_v48  ;;  %v2407_v14 = vsel %vm1227_vm2, %v7396_v62, 0.0 }
 0x507   : > { %6814 = vmatprep.subr.bf16.mxu1 %v8479_v56  ;;  %v1488_v36 = vpop.xlane.xlu0 %1487  ;;  %v2404_v3 = vsel %vm1227_vm2, %v7398_v19, 0.0  ;;  %v2178_v51 = vpop.xlane.xlu1 %2177  ;;  %v2229_v11 = vpack.c.bf16 %v7398_v19, %v7394_v37 }
 0x508   : > { %7411 = vpow2.f32 %v2223_v35  ;;  %2408 = vadd.xlane.f32.xlu0 %v2407_v14  ;;  %2405 = vadd.xlane.f32.xlu1 %v2404_v3  ;;  %v2194_v52 = vsub.f32 %v8536_v57, %v2178_v51 }
 0x509   : > { %v7400_v17 = vpop.eup %7399  ;;  %7413 = vpow2.f32 %v2221_v20  ;;  %6808 = vmatprep.mubr.msk.bf16.mxu1 %vm1227_vm2, %v2229_v11  ;;  %v7331_v20 = vld [vmem:[%s7901_s21 + $0x68] sm:$0xff]  }
 0x50a   : > { %v7402_v48 = vpop.eup %7401  ;;  %v2225_v10 = vmul.f32 1.442695, %v2194_v52  ;;  %6815 = vmatpush3.bf16.msra.mxu1 %v8479_v56  ;;  %v2413_v21 = vsel %vm1227_vm2, %v7400_v17, 0.0  ;;  %7415 = vrcp.f32 %v1488_v36  ;;  %v7332_v52 = vld [vmem:[%s7901_s21 + $0x60] sm:$0xff]  }
 0x50b   : > { %6816 = vmatprep.subr.bf16.mxu1 %v8473_v42  ;;  %v1494_v40 = vpop.xlane.xlu0 %1493  ;;  %v2410_v58 = vsel %vm1227_vm2, %v7402_v48, 0.0  ;;  %v1491_v41 = vpop.xlane.xlu1 %1490  ;;  %v2230_v57 = vpack.c.bf16 %v7402_v48, %v7396_v62 }
 0x50c   : > { %7417 = vpow2.f32 %v2225_v10  ;;  %2414 = vadd.xlane.f32.xlu0 %v2413_v21  ;;  %2411 = vadd.xlane.f32.xlu1 %v2410_v58 }
 0x50d   : > { %v7404_v8 = vpop.eup %7403  ;;  %6809 = vmatmul.mubr.msk.bf16.gmra.mxu1 %vm1227_vm2, %v2230_v57  ;;  %7419 = vrcp.f32 %v1491_v41 }
 0x50e   : > { %v7406_v56 = vpop.eup %7405  ;;  %6817 = vmatpush3.bf16.msra.mxu1 %v8473_v42  ;;  %v2419_v55 = vsel %vm1227_vm2, %v7404_v8, 0.0  ;;  %7421 = vrcp.f32 %v1494_v40 }
 0x50f   : > { %6818 = vmatprep.subr.bf16.mxu1 %v8475_v60  ;;  %v1500_v4 = vpop.xlane.xlu0 %1499  ;;  %v2416_v22 = vsel %vm1227_vm2, %v7406_v56, 0.0  ;;  %v1497_v50 = vpop.xlane.xlu1 %1496  ;;  %v2231_v39 = vpack.c.bf16 %v7406_v56, %v7400_v17 }
 0x510   : > { %2420 = vadd.xlane.f32.xlu0 %v2419_v55  ;;  %2417 = vadd.xlane.f32.xlu1 %v2416_v22  ;;  %7423 = vrcp.f32 %v1497_v50 }
 0x511   : > { %v7408_v33 = vpop.eup %7407  ;;  %6820 = vmatprep.mubr.msk.bf16.mxu1 %vm1227_vm2, %v2231_v39  ;;  %7425 = vrcp.f32 %v1500_v4 }
 0x512   : > { %v7410_v24 = vpop.eup %7409  ;;  %6819 = vmatpush3.bf16.msra.mxu1 %v8475_v60  ;;  %v2425_v42 = vsel %vm1227_vm2, %v7408_v33, 0.0 }
 0x513   : > { %v2232_v30 = vpack.c.bf16 %v7410_v24, %v7404_v8  ;;  %v1506_v16 = vpop.xlane.xlu0 %1505  ;;  %v2422_v25 = vsel %vm1227_vm2, %v7410_v24, 0.0  ;;  %v1503_v54 = vpop.xlane.xlu1 %1502  ;;  %7241 = vmatprep.subr.msk.bf16.mxu1 %vm2503_vm3, %v1574_v38  ;;  %v9956_v38 = vld [vmem:[#allocation28_spill] sm:$0xff] }
 0x514   : > { %2426 = vadd.xlane.f32.xlu0 %v2425_v42  ;;  %2423 = vadd.xlane.f32.xlu1 %v2422_v25  ;;  %7427 = vrcp.f32 %v1503_v54  ;;  %v9957_v42 = vld [vmem:[#allocation30_spill] sm:$0xff] }
 0x515   : > { %v7412_v44 = vpop.eup %7411  ;;  %6821 = vmatmul.mubr.msk.bf16.vlgmr.msra.gmra.mxu1 %vm1227_vm2, %v2232_v30  ;;  %7429 = vrcp.f32 %v1506_v16  ;;  %v9958_v16 = vld [vmem:[#allocation32_spill] sm:$0xff] }
 0x516   : > { %v7414_v6 = vpop.eup %7413  ;;  %v2431_v60 = vsel %vm1227_vm2, %v7412_v44, 0.0  ;;  %6847 = vmatpush3.bf16.msra.mxu1 %v2629_v13  ;;  %v9959_v13 = vld [vmem:[#allocation31_spill] sm:$0xff] }
 0x517   : > { %v1512_v43 = vpop.xlane.xlu0 %1511  ;;  %v2428_v61 = vsel %vm1227_vm2, %v7414_v6, 0.0  ;;  %v1509_v63 = vpop.xlane.xlu1 %1508  ;;  %v2233_v7 = vpack.c.bf16 %v7414_v6, %v7408_v33  ;;  %6884 = vmatprep.subr.bf16.mxu1 %v7331_v20 }
 0x518   : > { %v7416_v15 = vpop.eup %7415  ;;  %2432 = vadd.xlane.f32.xlu0 %v2431_v60  ;;  %2429 = vadd.xlane.f32.xlu1 %v2428_v61  ;;  %7431 = vrcp.f32 %v1509_v63  ;;  %v9962_v61 = vld [vmem:[#allocation15_spill] sm:$0xff]  ;;  %v9963_v63 = vld [vmem:[#allocation16_spill] sm:$0xff] }
 0x519   : > { %v7418_v37 = vpop.eup %7417  ;;  %6824 = vmatprep.mubr.msk.bf16.mxu1 %vm1227_vm2, %v2233_v7  ;;  %7433 = vrcp.f32 %v1512_v43  ;;  %v1550_v31 = vmul.f32 %v7416_v15, %v8401_v45  ;;  %v9961_v43 = vld [vmem:[#allocation11_spill] sm:$0xff]  ;;  %v9965_v15 = vld [vmem:[#allocation20_spill] sm:$0xff] }
 0x51a   : > { %v2434_v1 = vsel %vm1227_vm2, %v7418_v37, 0.0  ;;  %v2234_v12 = vpack.c.bf16 %v7418_v37, %v7412_v44  ;;  %v7420_v28 = vpop.eup %7419  ;;  %v9964_v7 = vld [vmem:[#allocation19_spill] sm:$0xff]  ;;  %v7333_v37 = vld [vmem:[%s7901_s21 + $0x28] sm:$0xff]  }
 0x51b   : > { %v1518_v32 = vpop.xlane.xlu0 %1517  ;;  %v1515_v18 = vpop.xlane.xlu1 %1514  ;;  %v1551_v5 = vmul.f32 %v7420_v28, %v8405_v46  ;;  %v9968_v28 = vld [vmem:[#allocation24_spill] sm:$0xff] }
 0x51c   : > { %2435 = vadd.xlane.f32.xlu1 %v2434_v1  ;;  %v7422_v23 = vpop.eup %7421  ;;  %7435 = vrcp.f32 %v1515_v18  ;;  %v9966_v1 = vld [vmem:[#allocation22_spill] sm:$0xff] }
 0x51d   : > { %6825 = vmatmul.mubr.msk.bf16.gmra.mxu1 %vm1227_vm2, %v2234_v12  ;;  %v7424_v47 = vpop.eup %7423  ;;  %v1566_v62 = vpack.c.bf16 %v1551_v5, %v1550_v31  ;;  %7437 = vrcp.f32 %v1518_v32  ;;  %v1552_v45 = vmul.f32 %v7422_v23, %v8399_v0  ;;  %v6082_v0 = vld [vmem:[%s8617_s12 + $0x4] sm:$0xf]  ;;  %v9967_v12 = vld [vmem:[#allocation23_spill] sm:$0xff] }
 0x51e   : > { %v1553_v19 = vmul.f32 %v7424_v47, %v8403_v53  ;;  %v7426_v14 = vpop.eup %7425  ;;  %7240 = vmatprep.subr.msk.bf16.mxu0 %vm2503_vm3, %v6082_v0 }
 0x51f   : > { %v1521_v35 = vpop.xlane.xlu1 %1520  ;;  %6848 = vmatprep.mubr.msk.bf16.mxu1 %vm1048_vm1, %v1566_v62  ;;  %v1524_v36 = vpop.xlane.xlu0 %1523  ;;  %v1554_v11 = vmul.f32 %v7426_v14, %v8409_v49  ;;  %v2505_v49 = vsel %vm2503_vm3, %v6082_v0, 0 }
 0x520   : > { %7439 = vrcp.f32 %v1521_v35  ;;  %v1567_v51 = vpack.c.bf16 %v1553_v19, %v1552_v45  ;;  %6829 = vmatpush3.bf16.msra.mxu0 %v2505_v49 }
 0x521   : > { %v7428_v46 = vpop.eup %7427  ;;  %7441 = vrcp.f32 %v1524_v36  ;;  %6864 = vmatprep.subr.bf16.mxu0 %v7333_v37 }
 0x522   : > { %v1555_v53 = vmul.f32 %v7428_v46, %v8413_v9  ;;  %v7430_v17 = vpop.eup %7429 }
 0x523   : > { %v1527_v3 = vpop.xlane.xlu1 %1526  ;;  %v1530_v21 = vpop.xlane.xlu0 %1529  ;;  %v1556_v9 = vmul.f32 %v7430_v17, %v8407_v2 }
 0x524   : > { %7443 = vrcp.f32 %v1527_v3  ;;  %v1568_v48 = vpack.c.bf16 %v1555_v53, %v1554_v11 }
 0x525   : > { %6849 = vmatmul.mubr.msk.bf16.vlgmr.msra.gmra.mxu1 %vm1048_vm1, %v1567_v51  ;;  %v7432_v10 = vpop.eup %7431 }
 0x526   : > { %6885 = vmatpush3.bf16.msra.mxu1 %v7331_v20  ;;  %6852 = vmatprep.mubr.msk.bf16.mxu1 %vm1048_vm1, %v1568_v48  ;;  %v1557_v58 = vmul.f32 %v7432_v10, %v8411_v59  ;;  %v7434_v41 = vpop.eup %7433 }
 0x527   : > { %v1533_v40 = vpop.xlane.xlu1 %1532  ;;  %6886 = vmatprep.subr.bf16.mxu1 %v7332_v52  ;;  %v1558_v56 = vmul.f32 %v7434_v41, %v8417_v26 }
 0x528   : > { %7445 = vrcp.f32 %v1533_v40  ;;  %v1569_v8 = vpack.c.bf16 %v1557_v58, %v1556_v9 }
 0x529   : > { %7447 = vrcp.f32 %v1530_v21  ;;  %v7436_v57 = vpop.eup %7435 }
 0x52a   : > { %6887 = vmatpush3.bf16.msra.mxu1 %v7332_v52  ;;  %v1559_v55 = vmul.f32 %v7436_v57, %v8421_v29  ;;  %v7438_v4 = vpop.eup %7437 }
 0x52b   : > { %v1560_v2 = vmul.f32 %v7438_v4, %v9956_v38  ;;  %v7335_v38 = vld [vmem:[%s7901_s21 + $0xa8] sm:$0xff]  }
 0x52c   : > { %v1570_v59 = vpack.c.bf16 %v1559_v55, %v1558_v56 }
 0x52d   : > { %6853 = vmatmul.mubr.msk.bf16.gmra.mxu1 %vm1048_vm1, %v1569_v8  ;;  %v7440_v22 = vpop.eup %7439  ;;  %v7334_v8 = vld [vmem:[%s7901_s21 + $0x20] sm:$0xff]  }
 0x52e   : > { %6856 = vmatprep.mubr.msk.bf16.mxu1 %vm1048_vm1, %v1570_v59  ;;  %v1561_v50 = vmul.f32 %v7440_v22, %v8419_v34  ;;  %v7442_v39 = vpop.eup %7441  ;;  %v9960_v34 = vld [vmem:[#allocation29_spill] sm:$0xff] }
 0x52f   : > { %v1562_v30 = vmul.f32 %v7442_v39, %v9957_v42 }
 0x530   : > { %v1571_v24 = vpack.c.bf16 %v1561_v50, %v1560_v2 }
 0x531   : > { %v7444_v33 = vpop.eup %7443 }
 0x532   : > { %v1563_v26 = vmul.f32 %v7444_v33, %v9958_v16 }
 0x534   : > { %v1572_v25 = vpack.c.bf16 %v1563_v26, %v1562_v30 }
 0x535   : > { %v7446_v29 = vpop.eup %7445  ;;  %6857 = vmatmul.mubr.msk.bf16.gmra.mxu1 %vm1048_vm1, %v1571_v24 }
 0x536   : > { %v7448_v54 = vpop.eup %7447  ;;  %6860 = vmatprep.mubr.msk.bf16.mxu1 %vm1048_vm1, %v1572_v25  ;;  %v1565_v44 = vmul.f32 %v7446_v29, %v9959_v13 }
 0x537   : > { %v1564_v6 = vmul.f32 %v7448_v54, %v9960_v34 }
 0x539   : > { %v1573_v60 = vpack.c.bf16 %v1565_v44, %v1564_v6 }
 0x53d   : > { %6861 = vmatmul.mubr.msk.bf16.gmra.mxu1 %vm1048_vm1, %v1573_v60 }
 0x53e   : > { %6888 = vmatprep.mubr.msk.bf16.mxu1 %vm652_vm0, %v9961_v43 }
 0x545   : > { %6889 = vmatmul.mubr.msk.bf16.vlgmr.msra.gmra.mxu1 %vm652_vm0, %v9962_v61 }
 0x546   : > { %6892 = vmatprep.mubr.msk.bf16.mxu1 %vm652_vm0, %v9963_v63 }
 0x54d   : > { %6893 = vmatmul.mubr.msk.bf16.gmra.mxu1 %vm652_vm0, %v9964_v7 }
 0x54e   : > { %6896 = vmatprep.mubr.msk.bf16.mxu1 %vm652_vm0, %v9965_v15 }
 0x555   : > { %6897 = vmatmul.mubr.msk.bf16.gmra.mxu1 %vm652_vm0, %v9966_v1 }
 0x556   : > { %6900 = vmatprep.mubr.msk.bf16.mxu1 %vm652_vm0, %v9967_v12 }
 0x55d   : > { %6901 = vmatmul.mubr.msk.bf16.gmra.mxu1 %vm652_vm0, %v9968_v28 }
 0x584   : > { %v2391_v18 = vpop.xlane.xlu0 %2390 }
 0x585   : > { %7449 = vrcp.f32 %v2391_v18 }
 0x588   : > { %v2397_v5 = vpop.xlane.xlu0 %2396 }
 0x589   : > { %v2394_v32 = vpop.xlane.xlu1 %2393 }
 0x58d   : > { %v2400_v31 = vpop.xlane.xlu1 %2399  ;;  %v2403_v47 = vpop.xlane.xlu0 %2402 }
 0x58e   : > { %7451 = vrcp.f32 %v2400_v31 }
 0x58f   : > { %7453 = vrcp.f32 %v2394_v32 }
 0x590   : > { %7455 = vrcp.f32 %v2397_v5 }
 0x591   : > { %v2406_v23 = vpop.xlane.xlu1 %2405  ;;  %v2409_v19 = vpop.xlane.xlu0 %2408  ;;  %7457 = vrcp.f32 %v2403_v47 }
 0x592   : > { %v7450_v3 = vpop.eup %7449 }
 0x595   : > { %v2412_v62 = vpop.xlane.xlu1 %2411  ;;  %v2415_v20 = vpop.xlane.xlu0 %2414 }
 0x596   : > { %7459 = vrcp.f32 %v2412_v62 }
 0x597   : > { %7461 = vrcp.f32 %v2406_v23 }
 0x598   : > { %7463 = vrcp.f32 %v2409_v19 }
 0x599   : > { %v2418_v35 = vpop.xlane.xlu1 %2417  ;;  %v2421_v46 = vpop.xlane.xlu0 %2420  ;;  %7465 = vrcp.f32 %v2415_v20 }
 0x59b   : > { %v7452_v11 = vpop.eup %7451 }
 0x59c   : > { %v7454_v53 = vpop.eup %7453 }
 0x59d   : > { %v2424_v36 = vpop.xlane.xlu1 %2423  ;;  %v7456_v48 = vpop.eup %7455 }
 0x59e   : > { %7467 = vrcp.f32 %v2424_v36  ;;  %v2427_v49 = vpop.xlane.xlu0 %2426  ;;  %v7458_v56 = vpop.eup %7457 }
 0x59f   : > { %7469 = vrcp.f32 %v2418_v35 }
 0x5a0   : > { %7471 = vrcp.f32 %v2421_v46 }
 0x5a1   : > { %v2430_v10 = vpop.xlane.xlu1 %2429  ;;  %7473 = vrcp.f32 %v2427_v49  ;;  %v7336_v49 = vld [vmem:[%s7901_s21 + $0xa0] sm:$0xff]  }
 0x5a2   : > { %v2433_v33 = vpop.xlane.xlu0 %2432 }
 0x5a3   : > { %v7460_v4 = vpop.eup %7459 }
 0x5a4   : > { %v7462_v22 = vpop.eup %7461 }
 0x5a5   : > { %v2436_v59 = vpop.xlane.xlu1 %2435  ;;  %v7464_v2 = vpop.eup %7463 }
 0x5a6   : > { %7475 = vrcp.f32 %v2436_v59  ;;  %v7466_v54 = vpop.eup %7465  ;;  %v9979_v59 = vld [vmem:[#allocation17_spill] sm:$0xff] }
 0x5a7   : > { %7477 = vrcp.f32 %v2430_v10 }
 0x5a8   : > { %7479 = vrcp.f32 %v2433_v33  ;;  %v9985_v33 = vld [vmem:[#allocation21_spill] sm:$0xff] }
 0x5ab   : > { %v7468_v44 = vpop.eup %7467 }
 0x5ac   : > { %v7470_v34 = vpop.eup %7469 }
 0x5c5   : > { %v6806_v14 = vpop.f32.mrf.mxu1 }
 0x5c6   : > { %v2455_v40 = vmul.f32 %v7456_v48, %v6806_v14 }
 0x5c7   : > { %v2281_v45 = vpop.f32.mrf.mxu1 }
 0x5c8   : > { %v2453_v21 = vmul.f32 %v7450_v3, %v2281_v45 }
 0x5c9   : > { %v6807_v51 = vpop.f32.mrf.mxu1 }
 0x5ca   : > { %v2456_v52 = vmul.f32 %v7452_v11, %v6807_v51 }
 0x5cb   : > { %v2284_v17 = vpop.f32.mrf.mxu1 }
 0x5cc   : > { %v2454_v0 = vmul.f32 %v7454_v53, %v2284_v17  ;;  %v2470_v9 = vpack.c.bf16 %v2456_v52, %v2455_v40 }
 0x5cd   : > { %v6810_v58 = vpop.f32.mrf.mxu1 }
 0x5ce   : > { %v2469_v41 = vpack.c.bf16 %v2454_v0, %v2453_v21  ;;  %v2459_v30 = vmul.f32 %v7464_v2, %v6810_v58  ;;  %v9969_v21 = vld [vmem:[#allocation12_spill] sm:$0xff] }
 0x5cf   : > { %v2297_v57 = vpop.f32.mrf.mxu1 }
 0x5d0   : > { %6830 = vmatprep.mubr.msk.bf16.mxu0 %vm1048_vm1, %v2469_v41  ;;  %v2457_v24 = vmul.f32 %v7458_v56, %v2297_v57  ;;  %v9974_v57 = vld [vmem:[#allocation14_spill] sm:$0xff] }
 0x5d1   : > { %v6811_v55 = vpop.f32.mrf.mxu1  ;;  %6831 = vmatmul.mubr.msk.bf16.vlgmr.msra.gmra.mxu0 %vm1048_vm1, %v2470_v9  ;;  %v9973_v9 = vld [vmem:[#allocation13_spill] sm:$0xff] }
 0x5d2   : > { %6865 = vmatpush3.bf16.msra.mxu0 %v7333_v37  ;;  %v2460_v50 = vmul.f32 %v7460_v4, %v6811_v55  ;;  %v7472_v37 = vpop.eup %7471 }
 0x5d3   : > { %v2300_v39 = vpop.f32.mrf.mxu1  ;;  %6866 = vmatprep.subr.bf16.mxu0 %v7334_v8  ;;  %v7474_v19 = vpop.eup %7473 }
 0x5d4   : > { %v2458_v42 = vmul.f32 %v7462_v22, %v2300_v39  ;;  %v2472_v29 = vpack.c.bf16 %v2460_v50, %v2459_v30  ;;  %v7476_v20 = vpop.eup %7475  ;;  %v9980_v22 = vld [vmem:[#allocation18_spill] sm:$0xff] }
 0x5d5   : > { %v6822_v16 = vpop.f32.mrf.mxu1  ;;  %v7478_v14 = vpop.eup %7477 }
 0x5d6   : > { %v2471_v26 = vpack.c.bf16 %v2458_v42, %v2457_v24  ;;  %6867 = vmatpush3.bf16.msra.mxu0 %v7334_v8  ;;  %v2463_v31 = vmul.f32 %v7472_v37, %v6822_v16  ;;  %v7480_v46 = vpop.eup %7479  ;;  %v9986_v24 = vld [vmem:[#allocation9_spill] sm:$0xff] }
 0x5d7   : > { %v2358_v25 = vpop.f32.mrf.mxu1  ;;  %6904 = vmatprep.subr.bf16.mxu0 %v7335_v38 }
 0x5d8   : > { %6834 = vmatprep.mubr.msk.bf16.mxu0 %vm1048_vm1, %v2471_v26  ;;  %v2461_v32 = vmul.f32 %v7466_v54, %v2358_v25  ;;  %v9988_v26 = vld [vmem:[#allocation25_spill] sm:$0xff]  ;;  %v9990_v25 = vld [vmem:[#allocation10_spill] sm:$0xff] }
 0x5d9   : > { %v6823_v13 = vpop.f32.mrf.mxu1  ;;  %6835 = vmatmul.mubr.msk.bf16.gmra.mxu0 %vm1048_vm1, %v2472_v29  ;;  %v8740_v29 = vsub.s32 2, %v9988_v26 }
 0x5da   : > { %v2464_v6 = vmul.f32 %v7468_v44, %v6823_v13  ;;  %v7673_v44 = vld [vmem:[%s8032_s27 + $0x4] sm:$0xf] }
 0x5db   : > { %v2361_v60 = vpop.f32.mrf.mxu1  ;;  %9989 = vst [vmem:[#allocation24_spill] sm:$0xff] %v8740_v29 }
 0x5dc   : > { %v2462_v18 = vmul.f32 %v7470_v34, %v2361_v60  ;;  %v2474_v47 = vpack.c.bf16 %v2464_v6, %v2463_v31  ;;  %v2867_v34 = vrot.slane %v7673_v44, %v8740_v29 }
 0x5dd   : > { %v6826_v5 = vpop.f32.mrf.mxu1 }
 0x5de   : > { %v2473_v23 = vpack.c.bf16 %v2462_v18, %v2461_v32  ;;  %v2467_v11 = vmul.f32 %v7480_v46, %v6826_v5 }
 0x5df   : > { %v2374_v62 = vpop.f32.mrf.mxu1 }
 0x5e0   : > { %6838 = vmatprep.mubr.msk.bf16.mxu0 %vm1048_vm1, %v2473_v23  ;;  %v2465_v3 = vmul.f32 %v7474_v19, %v2374_v62 }
 0x5e1   : > { %v6827_v35 = vpop.f32.mrf.mxu1  ;;  %6839 = vmatmul.mubr.msk.bf16.gmra.mxu0 %vm1048_vm1, %v2474_v47 }
 0x5e2   : > { %v2468_v36 = vmul.f32 %v7476_v20, %v6827_v35 }
 0x5e3   : > { %v2377_v45 = vpop.f32.mrf.mxu1 }
 0x5e4   : > { %v2466_v51 = vmul.f32 %v7478_v14, %v2377_v45  ;;  %v2476_v17 = vpack.c.bf16 %v2468_v36, %v2467_v11 }
 0x5e5   : > { %v8690_v53 = vpop.f32.mrf.mxu1 }
 0x5e6   : > { %v2475_v52 = vpack.c.bf16 %v2466_v51, %v2465_v3 }
 0x5e7   : > { %v8692_v48 = vpop.f32.mrf.mxu1 }
 0x5e8   : > { %6842 = vmatprep.mubr.msk.bf16.mxu0 %vm1048_vm1, %v2475_v52 }
 0x5e9   : > { %6843 = vmatmul.mubr.msk.bf16.gmra.mxu0 %vm1048_vm1, %v2476_v17  ;;  %v8696_v10 = vpop.f32.mrf.mxu1 }
 0x5ea   : > { %6868 = vmatprep.mubr.msk.bf16.mxu0 %vm652_vm0, %v9969_v21 }
 0x5eb   : > { %v8700_v0 = vpop.f32.mrf.mxu1 }
 0x5ec   : > { %9970 = vst [vmem:[#allocation28_spill] sm:$0xff] %v8700_v0 }
 0x5ed   : > { %v8702_v40 = vpop.f32.mrf.mxu1 }
 0x5ef   : > { %v8704_v58 = vpop.f32.mrf.mxu1 }
 0x5f0   : > { %9971 = vst [vmem:[#allocation30_spill] sm:$0xff] %v8704_v58 }
 0x5f1   : > { %v8707_v41 = vpop.f32.mrf.mxu1  ;;  %6869 = vmatmul.mubr.msk.bf16.vlgmr.msra.gmra.mxu0 %vm652_vm0, %v9973_v9 }
 0x5f2   : > { %9972 = vst [vmem:[#allocation32_spill] sm:$0xff] %v8707_v41  ;;  %6872 = vmatprep.mubr.msk.bf16.mxu0 %vm652_vm0, %v9974_v57  ;;  %6905 = vmatpush3.bf16.msra.mxu0 %v7335_v38 }
 0x5f3   : > { %v8713_v8 = vpop.f32.mrf.mxu1  ;;  %6906 = vmatprep.subr.bf16.mxu0 %v7336_v49 }
 0x5f4   : > { %9975 = vst [vmem:[#allocation31_spill] sm:$0xff] %v8713_v8 }
 0x5f5   : > { %v8715_v56 = vpop.f32.mrf.mxu1 }
 0x5f6   : > { %9976 = vst [vmem:[#allocation29_spill] sm:$0xff] %v8715_v56  ;;  %6907 = vmatpush3.bf16.msra.mxu0 %v7336_v49 }
 0x5f7   : > { %v8717_v55 = vpop.f32.mrf.mxu1 }
 0x5f8   : > { %9977 = vst [vmem:[#allocation11_spill] sm:$0xff] %v8717_v55 }
 0x5f9   : > { %v8719_v4 = vpop.f32.mrf.mxu1  ;;  %6873 = vmatmul.mubr.msk.bf16.gmra.mxu0 %vm652_vm0, %v9979_v59 }
 0x5fa   : > { %9978 = vst [vmem:[#allocation15_spill] sm:$0xff] %v8719_v4  ;;  %6876 = vmatprep.mubr.msk.bf16.mxu0 %vm652_vm0, %v9980_v22 }
 0x5fb   : > { %v8725_v50 = vpop.f32.mrf.mxu1 }
 0x5fc   : > { %9981 = vst [vmem:[#allocation16_spill] sm:$0xff] %v8725_v50 }
 0x5fd   : > { %v8727_v39 = vpop.f32.mrf.mxu1 }
 0x5fe   : > { %9982 = vst [vmem:[#allocation19_spill] sm:$0xff] %v8727_v39 }
 0x5ff   : > { %v8729_v38 = vpop.f32.mrf.mxu1 }
 0x600   : > { %9983 = vst [vmem:[#allocation20_spill] sm:$0xff] %v8729_v38 }
 0x601   : > { %v8731_v2 = vpop.f32.mrf.mxu1  ;;  %6877 = vmatmul.mubr.msk.bf16.gmra.mxu0 %vm652_vm0, %v9985_v33 }
 0x602   : > { %9984 = vst [vmem:[#allocation22_spill] sm:$0xff] %v8731_v2  ;;  %6880 = vmatprep.mubr.msk.bf16.mxu0 %vm652_vm0, %v9986_v24 }
 0x603   : > { %v8737_v42 = vpop.f32.mrf.mxu1 }
 0x604   : > { %9987 = vst [vmem:[#allocation23_spill] sm:$0xff] %v8737_v42 }
 0x605   : > { %v6890_v30 = vpop.f32.mrf.mxu1 }
 0x606   : > { %v2923_v14 = vadd.f32 %v6890_v30, %v2867_v34 }
 0x607   : > { %v2914_v16 = vpop.f32.mrf.mxu1 }
 0x608   : > { %v2915_v17 = vadd.f32 %v2914_v16, %v2867_v34 }
 0x609   : > { %6881 = vmatmul.mubr.msk.bf16.gmra.mxu0 %vm652_vm0, %v9990_v25  ;;  %v6891_v54 = vpop.f32.mrf.mxu1 }
 0x60a   : > { %6908 = vmatprep.mubr.msk.bf16.mxu0 %vm652_vm0, %v9961_v43  ;;  %v2926_v36 = vadd.f32 %v6891_v54, %v2867_v34 }
 0x60b   : > { %v2917_v13 = vpop.f32.mrf.mxu1 }
 0x60c   : > { %v3091_v3 = vpack.c.bf16 %v2926_v36, %v2923_v14  ;;  %v2918_v49 = vadd.f32 %v2917_v13, %v2867_v34 }
 0x60d   : > { %v6894_v6 = vpop.f32.mrf.mxu1 }
 0x60e   : > { %v2939_v37 = vadd.f32 %v6894_v6, %v2867_v34 }
 0x60f   : > { %v2930_v60 = vpop.f32.mrf.mxu1 }
 0x610   : > { %v2931_v18 = vadd.f32 %v2930_v60, %v2867_v34 }
 0x611   : > { %v6895_v32 = vpop.f32.mrf.mxu1  ;;  %6909 = vmatmul.mubr.msk.bf16.vlgmr.msra.gmra.mxu0 %vm652_vm0, %v9962_v61 }
 0x612   : > { %v2942_v31 = vadd.f32 %v6895_v32, %v2867_v34  ;;  %6912 = vmatprep.mubr.msk.bf16.mxu0 %vm652_vm0, %v9963_v63 }
 0x613   : > { %v2933_v5 = vpop.f32.mrf.mxu1 }
 0x614   : > { %v3093_v23 = vpack.c.bf16 %v2942_v31, %v2939_v37  ;;  %v2934_v47 = vadd.f32 %v2933_v5, %v2867_v34  ;;  %v3090_v37 = vpack.c.bf16 %v2918_v49, %v2915_v17 }
 0x615   : > { %v6898_v62 = vpop.f32.mrf.mxu1 }
 0x616   : > { %v3092_v19 = vpack.c.bf16 %v2934_v47, %v2931_v18  ;;  %7242 = vmatprep.subr.msk.bf16.mxu1 %vm1048_vm1, %v3093_v23  ;;  %v3128_v35 = vsel %vm1048_vm1, %v3093_v23, 0  ;;  %v3122_v18 = vsel %vm1048_vm1, %v3091_v3, 0  ;;  %v2955_v5 = vadd.f32 %v6898_v62, %v2867_v34 }
 0x617   : > { %v2946_v20 = vpop.f32.mrf.mxu1  ;;  %6925 = vmatpush3.bf16.xpose.msra.mxu1 %v3128_v35 }
 0x618   : > { %7243 = vmatprep.subr.msk.bf16.mxu1 %vm1048_vm1, %v3092_v19  ;;  %v3125_v51 = vsel %vm1048_vm1, %v3092_v19, 0  ;;  %v3119_v19 = vsel %vm1048_vm1, %v3090_v37, 0  ;;  %v2947_v14 = vadd.f32 %v2946_v20, %v2867_v34 }
 0x619   : > { %v6899_v45 = vpop.f32.mrf.mxu1  ;;  %6913 = vmatmul.mubr.msk.bf16.gmra.mxu0 %vm652_vm0, %v9964_v7 }
 0x61a   : > { %6916 = vmatprep.mubr.msk.bf16.mxu0 %vm652_vm0, %v9965_v15  ;;  %v2958_v23 = vadd.f32 %v6899_v45, %v2867_v34 }
 0x61b   : > { %v2949_v46 = vpop.f32.mrf.mxu1 }
 0x61c   : > { %v3095_v47 = vpack.c.bf16 %v2958_v23, %v2955_v5  ;;  %v2950_v36 = vadd.f32 %v2949_v46, %v2867_v34 }
 0x61d   : > { %v6902_v11 = vpop.f32.mrf.mxu1 }
 0x61e   : > { %v2971_v30 = vadd.f32 %v6902_v11, %v2867_v34  ;;  %v3094_v62 = vpack.c.bf16 %v2950_v36, %v2947_v14  ;;  %v3211_v45 = vsel %vm1048_vm1, %v3095_v47, 0 }
 0x61f   : > { %v2962_v52 = vpop.f32.mrf.mxu1  ;;  %6927 = vmatpush3.bf16.xpose.msra.mxu1 %v3125_v51 }
 0x620   : > { %7244 = vmatprep.subr.msk.bf16.mxu1 %vm1048_vm1, %v3091_v3  ;;  %v2963_v44 = vadd.f32 %v2962_v52, %v2867_v34  ;;  %v3208_v3 = vsel %vm1048_vm1, %v3094_v62, 0 }
 0x621   : > { %v6903_v54 = vpop.f32.mrf.mxu1  ;;  %6917 = vmatmul.mubr.msk.bf16.gmra.mxu0 %vm652_vm0, %v9966_v1 }
 0x622   : > { %v2974_v6 = vadd.f32 %v6903_v54, %v2867_v34  ;;  %6920 = vmatprep.mubr.msk.bf16.mxu0 %vm652_vm0, %v9967_v12 }
 0x623   : > { %v2965_v60 = vpop.f32.mrf.mxu1 }
 0x624   : > { %v3097_v32 = vpack.c.bf16 %v2974_v6, %v2971_v30  ;;  %v2966_v31 = vadd.f32 %v2965_v60, %v2867_v34 }
 0x626   : > { %7246 = vmatprep.subr.msk.bf16.mxu0 %vm1048_vm1, %v3097_v32  ;;  %v3217_v16 = vsel %vm1048_vm1, %v3097_v32, 0  ;;  %v3096_v13 = vpack.c.bf16 %v2966_v31, %v2963_v44 }
 0x627   : > { %6929 = vmatpush3.bf16.xpose.msra.mxu1 %v3122_v18  ;;  %6941 = vmatpush3.bf16.xpose.msra.mxu0 %v3217_v16 }
 0x628   : > { %7245 = vmatprep.subr.msk.bf16.mxu1 %vm1048_vm1, %v3090_v37  ;;  %7247 = vmatprep.subr.msk.bf16.mxu0 %vm1048_vm1, %v3096_v13  ;;  %v3214_v35 = vsel %vm1048_vm1, %v3096_v13, 0  ;;  %v8811_v13 = vld [vmem:[%s8032_s27] sm:$0xf] }
 0x629   : > { %6921 = vmatmul.mubr.msk.bf16.gmra.mxu0 %vm652_vm0, %v9968_v28  ;;  %v2746_v5 = vrot.slane %v8811_v13, %v8740_v29 }
 0x62f   : > { %6931 = vmatpush3.bf16.xpose.msra.mxu1 %v3119_v19  ;;  %6943 = vmatpush3.bf16.xpose.msra.mxu0 %v3214_v35 }
 0x630   : > { %7248 = vmatprep.subr.msk.bf16.mxu0 %vm1048_vm1, %v3095_v47 }
 0x637   : > { %6945 = vmatpush3.bf16.xpose.msra.mxu0 %v3211_v45 }
 0x638   : > { %7249 = vmatprep.subr.msk.bf16.mxu0 %vm1048_vm1, %v3094_v62 }
 0x63f   : > { %6947 = vmatpush3.bf16.xpose.msra.mxu0 %v3208_v3 }
 0x691   : > { %v8778_v51 = vpop.f32.mrf.mxu0 }
 0x693   : > { %v8780_v11 = vpop.f32.mrf.mxu0 }
 0x695   : > { %v8782_v52 = vpop.f32.mrf.mxu0 }
 0x697   : > { %v8784_v20 = vpop.f32.mrf.mxu0 }
 0x698   : > { %9991 = vst [vmem:[#allocation12_spill] sm:$0xff] %v8784_v20 }
 0x699   : > { %v8786_v34 = vpop.f32.mrf.mxu0 }
 0x69b   : > { %v8788_v46 = vpop.f32.mrf.mxu0 }
 0x69d   : > { %v8790_v17 = vpop.f32.mrf.mxu0 }
 0x69e   : > { %9992 = vst [vmem:[#allocation13_spill] sm:$0xff] %v8790_v17 }
 0x69f   : > { %v8792_v49 = vpop.f32.mrf.mxu0 }
 0x6a0   : > { %9993 = vst [vmem:[#allocation14_spill] sm:$0xff] %v8792_v49 }
 0x6a1   : > { %v8794_v30 = vpop.f32.mrf.mxu0 }
 0x6a2   : > { %9994 = vst [vmem:[#allocation17_spill] sm:$0xff] %v8794_v30 }
 0x6a3   : > { %v8796_v54 = vpop.f32.mrf.mxu0 }
 0x6a4   : > { %9995 = vst [vmem:[#allocation18_spill] sm:$0xff] %v8796_v54 }
 0x6a5   : > { %v8798_v44 = vpop.f32.mrf.mxu0 }
 0x6a6   : > { %9996 = vst [vmem:[#allocation21_spill] sm:$0xff] %v8798_v44 }
 0x6a7   : > { %v8800_v6 = vpop.f32.mrf.mxu0 }
 0x6a8   : > { %9997 = vst [vmem:[#allocation9_spill] sm:$0xff] %v8800_v6 }
 0x6a9   : > { %v8802_v60 = vpop.f32.mrf.mxu0 }
 0x6aa   : > { %9998 = vst [vmem:[#allocation25_spill] sm:$0xff] %v8802_v60 }
 0x6ab   : > { %v8804_v37 = vpop.f32.mrf.mxu0 }
 0x6ac   : > { %9999 = vst [vmem:[#allocation10_spill] sm:$0xff] %v8804_v37 }
 0x6ad   : > { %v8806_v32 = vpop.f32.mrf.mxu0 }
 0x6ae   : > { %10000 = vst [vmem:[#allocation33_spill] sm:$0xff] %v8806_v32 }
 0x6af   : > { %v8808_v18 = vpop.f32.mrf.mxu0 }
 0x6b0   : > { %10001 = vst [vmem:[#allocation34_spill] sm:$0xff] %v8808_v18 }
 0x6b1   : > { %v6870_v31 = vpop.f32.mrf.mxu0 }
 0x6b2   : > { %v2802_v36 = vadd.f32 %v6870_v31, %v2746_v5 }
 0x6b3   : > { %v2793_v16 = vpop.f32.mrf.mxu0 }
 0x6b4   : > { %v2794_v35 = vadd.f32 %v2793_v16, %v2746_v5 }
 0x6b5   : > { %v6871_v23 = vpop.f32.mrf.mxu0 }
 0x6b6   : > { %v2805_v47 = vadd.f32 %v6871_v23, %v2746_v5 }
 0x6b7   : > { %v2796_v19 = vpop.f32.mrf.mxu0 }
 0x6b8   : > { %v2797_v14 = vadd.f32 %v2796_v19, %v2746_v5  ;;  %v2857_v3 = vpack.c.bf16 %v2805_v47, %v2802_v36 }
 0x6b9   : > { %v6874_v62 = vpop.f32.mrf.mxu0 }
 0x6ba   : > { %v2856_v45 = vpack.c.bf16 %v2797_v14, %v2794_v35  ;;  %v2818_v49 = vadd.f32 %v6874_v62, %v2746_v5 }
 0x6bb   : > { %v2809_v27 = vpop.f32.mrf.mxu0 }
 0x6bc   : > { %6932 = vmatprep.mubr.msk.bf16.mxu1 %vm1048_vm1, %v2856_v45  ;;  %v2810_v6 = vadd.f32 %v2809_v27, %v2746_v5 }
 0x6bd   : > { %v6875_v42 = vpop.f32.mrf.mxu0  ;;  %6933 = vmatmul.mubr.msk.bf16.vlgmr.msra.gmra.mxu1 %vm1048_vm1, %v2857_v3 }
 0x6be   : > { %v2821_v18 = vadd.f32 %v6875_v42, %v2746_v5 }
 0x6bf   : > { %v2812_v50 = vpop.f32.mrf.mxu0 }
 0x6c0   : > { %v2813_v8 = vadd.f32 %v2812_v50, %v2746_v5  ;;  %v2859_v20 = vpack.c.bf16 %v2821_v18, %v2818_v49 }
 0x6c1   : > { %v6878_v0 = vpop.f32.mrf.mxu0 }
 0x6c2   : > { %v2858_v23 = vpack.c.bf16 %v2813_v8, %v2810_v6  ;;  %v2834_v36 = vadd.f32 %v6878_v0, %v2746_v5 }
 0x6c3   : > { %v2825_v16 = vpop.f32.mrf.mxu0 }
 0x6c4   : > { %6936 = vmatprep.mubr.msk.bf16.mxu1 %vm1048_vm1, %v2858_v23  ;;  %v2826_v35 = vadd.f32 %v2825_v16, %v2746_v5 }
 0x6c5   : > { %v6879_v31 = vpop.f32.mrf.mxu0  ;;  %6937 = vmatmul.mubr.msk.bf16.gmra.mxu1 %vm1048_vm1, %v2859_v20 }
 0x6c6   : > { %v2837_v47 = vadd.f32 %v6879_v31, %v2746_v5 }
 0x6c7   : > { %v2828_v19 = vpop.f32.mrf.mxu0 }
 0x6c8   : > { %v2829_v14 = vadd.f32 %v2828_v19, %v2746_v5  ;;  %v2861_v3 = vpack.c.bf16 %v2837_v47, %v2834_v36  ;;  %v7675_v19 = vld [vmem:[%s8032_s27 + $0x8] sm:$0xf] }
 0x6c9   : > { %v6882_v45 = vpop.f32.mrf.mxu0 }
 0x6ca   : > { %v2860_v42 = vpack.c.bf16 %v2829_v14, %v2826_v35  ;;  %v2850_v20 = vadd.f32 %v6882_v45, %v2746_v5  ;;  %v2980_v35 = vrot.slane %v7675_v19, %v8740_v29 }
 0x6cb   : > { %v2841_v27 = vpop.f32.mrf.mxu0 }
 0x6cc   : > { %6948 = vmatprep.mubr.msk.bf16.mxu0 %vm1048_vm1, %v2860_v42  ;;  %v2842_v6 = vadd.f32 %v2841_v27, %v2746_v5 }
 0x6cd   : > { %v6883_v8 = vpop.f32.mrf.mxu0  ;;  %6949 = vmatmul.mubr.msk.bf16.vlgmr.msra.gmra.mxu0 %vm1048_vm1, %v2861_v3 }
 0x6ce   : > { %v2853_v50 = vadd.f32 %v6883_v8, %v2746_v5 }
 0x6cf   : > { %v2844_v49 = vpop.f32.mrf.mxu0 }
 0x6d0   : > { %v2845_v18 = vadd.f32 %v2844_v49, %v2746_v5  ;;  %v2863_v16 = vpack.c.bf16 %v2853_v50, %v2850_v20 }
 0x6d1   : > { %v6910_v62 = vpop.f32.mrf.mxu0 }
 0x6d2   : > { %v2862_v23 = vpack.c.bf16 %v2845_v18, %v2842_v6  ;;  %v3036_v45 = vadd.f32 %v6910_v62, %v2980_v35 }
 0x6d3   : > { %v3027_v31 = vpop.f32.mrf.mxu0 }
 0x6d4   : > { %6952 = vmatprep.mubr.msk.bf16.mxu0 %vm1048_vm1, %v2862_v23  ;;  %v3028_v2 = vadd.f32 %v3027_v31, %v2980_v35 }
 0x6d5   : > { %6953 = vmatmul.mubr.msk.bf16.gmra.mxu0 %vm1048_vm1, %v2863_v16  ;;  %v6911_v0 = vpop.f32.mrf.mxu0 }
 0x6d6   : > { %v3039_v49 = vadd.f32 %v6911_v0, %v2980_v35 }
 0x6d7   : > { %v3030_v47 = vpop.f32.mrf.mxu0 }
 0x6d8   : > { %v3099_v32 = vpack.c.bf16 %v3039_v49, %v3036_v45  ;;  %v3031_v19 = vadd.f32 %v3030_v47, %v2980_v35 }
 0x6d9   : > { %v6914_v14 = vpop.f32.mrf.mxu0 }
 0x6da   : > { %v3052_v42 = vadd.f32 %v6914_v14, %v2980_v35 }
 0x6db   : > { %v3043_v36 = vpop.f32.mrf.mxu0 }
 0x6dc   : > { %v3044_v27 = vadd.f32 %v3043_v36, %v2980_v35 }
 0x6dd   : > { %v6915_v3 = vpop.f32.mrf.mxu0 }
 0x6de   : > { %v3055_v8 = vadd.f32 %v6915_v3, %v2980_v35  ;;  %v3098_v3 = vpack.c.bf16 %v3031_v19, %v3028_v2 }
 0x6df   : > { %v3046_v5 = vpop.f32.mrf.mxu0 }
 0x6e0   : > { %v3101_v50 = vpack.c.bf16 %v3055_v8, %v3052_v42  ;;  %v3047_v6 = vadd.f32 %v3046_v5, %v2980_v35 }
 0x6e1   : > { %v6918_v18 = vpop.f32.mrf.mxu0 }
 0x6e2   : > { %v3100_v20 = vpack.c.bf16 %v3047_v6, %v3044_v27  ;;  %6956 = vmatprep.subr.bf16.mxu1 %v3101_v50  ;;  %v3068_v23 = vadd.f32 %v6918_v18, %v2980_v35 }
 0x6e3   : > { %6957 = vmatpush3.bf16.msra.mxu1 %v3101_v50  ;;  %v3059_v16 = vpop.f32.mrf.mxu0 }
 0x6e4   : > { %6958 = vmatprep.subr.bf16.mxu1 %v3100_v20  ;;  %v3060_v29 = vadd.f32 %v3059_v16, %v2980_v35 }
 0x6e5   : > { %v6919_v14 = vpop.f32.mrf.mxu0 }
 0x6e6   : > { %v3071_v38 = vadd.f32 %v6919_v14, %v2980_v35 }
 0x6e7   : > { %6959 = vmatpush3.bf16.msra.mxu1 %v3100_v20  ;;  %v3062_v36 = vpop.f32.mrf.mxu0 }
 0x6e8   : > { %6960 = vmatprep.subr.bf16.mxu1 %v3099_v32  ;;  %v8825_v62 = vpack.c.bf16 %v3071_v38, %v3068_v23  ;;  %v3063_v0 = vadd.f32 %v3062_v36, %v2980_v35 }
 0x6e9   : > { %v6922_v27 = vpop.f32.mrf.mxu0 }
 0x6ea   : > { %v8827_v42 = vpack.c.bf16 %v3063_v0, %v3060_v29  ;;  %v3084_v8 = vadd.f32 %v6922_v27, %v2980_v35 }
 0x6eb   : > { %6961 = vmatpush3.bf16.msra.mxu1 %v3099_v32  ;;  %v3075_v31 = vpop.f32.mrf.mxu0 }
 0x6ec   : > { %6962 = vmatprep.subr.bf16.mxu1 %v3098_v3  ;;  %v3076_v47 = vadd.f32 %v3075_v31, %v2980_v35 }
 0x6ed   : > { %v6923_v5 = vpop.f32.mrf.mxu0 }
 0x6ee   : > { %v3087_v45 = vadd.f32 %v6923_v5, %v2980_v35 }
 0x6ef   : > { %6963 = vmatpush3.bf16.msra.mxu1 %v3098_v3  ;;  %v3078_v49 = vpop.f32.mrf.mxu0 }
 0x6f0   : > { %v8829_v50 = vpack.c.bf16 %v3087_v45, %v3084_v8  ;;  %v3079_v6 = vadd.f32 %v3078_v49, %v2980_v35 }
 0x6f2   : > { %v8831_v2 = vpack.c.bf16 %v3079_v6, %v3076_v47  ;;  %6972 = vmatprep.subr.bf16.mxu1 %v8829_v50 }
 0x77d   : > { %v6934_v38 = vpop.f32.mrf.mxu1 }
 0x77e   : > { %v3290_v23 = vsel %vm1227_vm2, %v6934_v38, -inf }
 0x77f   : > { %v3164_v29 = vpop.f32.mrf.mxu1 }
 0x780   : > { %v3284_v32 = vsel %vm1227_vm2, %v3164_v29, -inf }
 0x781   : > { %3285 = vmax.xlane.f32.xlu0 %v3284_v32  ;;  %v6935_v18 = vpop.f32.mrf.mxu1 }
 0x782   : > { %v3293_v35 = vsel %vm1227_vm2, %v6935_v18, -inf }
 0x783   : > { %v3167_v20 = vpop.f32.mrf.mxu1 }
 0x784   : > { %v3287_v16 = vsel %vm1227_vm2, %v3167_v20, -inf }
 0x785   : > { %3291 = vmax.xlane.f32.xlu0 %v3290_v23  ;;  %3288 = vmax.xlane.f32.xlu1 %v3287_v16  ;;  %v6938_v19 = vpop.f32.mrf.mxu1 }
 0x786   : > { %v3302_v27 = vsel %vm1227_vm2, %v6938_v19, -inf }
 0x787   : > { %v3180_v14 = vpop.f32.mrf.mxu1 }
 0x788   : > { %v3296_v36 = vsel %vm1227_vm2, %v3180_v14, -inf }
 0x789   : > { %3294 = vmax.xlane.f32.xlu1 %v3293_v35  ;;  %3297 = vmax.xlane.f32.xlu0 %v3296_v36  ;;  %v8839_v3 = vpop.f32.mrf.mxu1 }
 0x78a   : > { %v3305_v45 = vsel %vm1227_vm2, %v8839_v3, -inf }
 0x78b   : > { %v3183_v0 = vpop.f32.mrf.mxu1 }
 0x78c   : > { %v3299_v31 = vsel %vm1227_vm2, %v3183_v0, -inf }
 0x78d   : > { %v8843_v8 = vpop.f32.mrf.mxu0  ;;  %3303 = vmax.xlane.f32.xlu0 %v3302_v27  ;;  %3300 = vmax.xlane.f32.xlu1 %v3299_v31 }
 0x78e   : > { %v3314_v32 = vsel %vm1227_vm2, %v8843_v8, -inf }
 0x78f   : > { %v3253_v47 = vpop.f32.mrf.mxu0 }
 0x790   : > { %v3308_v5 = vsel %vm1227_vm2, %v3253_v47, -inf }
 0x791   : > { %v8848_v49 = vpop.f32.mrf.mxu0  ;;  %3309 = vmax.xlane.f32.xlu0 %v3308_v5  ;;  %3306 = vmax.xlane.f32.xlu1 %v3305_v45 }
 0x792   : > { %v3317_v27 = vsel %vm1227_vm2, %v8848_v49, -inf }
 0x793   : > { %v8850_v6 = vpop.f32.mrf.mxu0 }
 0x794   : > { %v3311_v23 = vsel %vm1227_vm2, %v8850_v6, -inf }
 0x795   : > { %v8856_v16 = vpop.f32.mrf.mxu0  ;;  %3315 = vmax.xlane.f32.xlu0 %v3314_v32  ;;  %3312 = vmax.xlane.f32.xlu1 %v3311_v23 }
 0x796   : > { %v3326_v45 = vsel %vm1227_vm2, %v8856_v16, -inf }
 0x797   : > { %v8858_v35 = vpop.f32.mrf.mxu0 }
 0x798   : > { %v3320_v36 = vsel %vm1227_vm2, %v8858_v35, -inf }
 0x799   : > { %v8864_v31 = vpop.f32.mrf.mxu0  ;;  %3321 = vmax.xlane.f32.xlu0 %v3320_v36  ;;  %3318 = vmax.xlane.f32.xlu1 %v3317_v27 }
 0x79a   : > { %v3329_v23 = vsel %vm1227_vm2, %v8864_v31, -inf }
 0x79b   : > { %v8866_v5 = vpop.f32.mrf.mxu0 }
 0x79c   : > { %v3323_v32 = vsel %vm1227_vm2, %v8866_v5, -inf }
 0x79d   : > { %3327 = vmax.xlane.f32.xlu0 %v3326_v45  ;;  %3324 = vmax.xlane.f32.xlu1 %v3323_v32 }
 0x7a1   : > { %3330 = vmax.xlane.f32.xlu1 %v3329_v23 }
 0x80a   : > { %v3286_v37 = vpop.xlane.xlu0 %3285 }
 0x80b   : > { %v3332_v39 = vsub.f32 %v3164_v29, %v3286_v37 }
 0x80d   : > { %v3348_v60 = vmul.f32 1.442695, %v3332_v39 }
 0x80e   : > { %v3292_v4 = vpop.xlane.xlu0 %3291  ;;  %v3289_v36 = vpop.xlane.xlu1 %3288 }
 0x80f   : > { %7481 = vpow2.f32 %v3348_v60  ;;  %v3334_v27 = vsub.f32 %v6934_v38, %v3292_v4  ;;  %v3333_v44 = vsub.f32 %v3167_v20, %v3289_v36 }
 0x811   : > { %v3352_v55 = vmul.f32 1.442695, %v3334_v27  ;;  %v3350_v54 = vmul.f32 1.442695, %v3333_v44 }
 0x812   : > { %v3295_v56 = vpop.xlane.xlu1 %3294  ;;  %v3298_v30 = vpop.xlane.xlu0 %3297 }
 0x813   : > { %7483 = vpow2.f32 %v3352_v55  ;;  %v3335_v41 = vsub.f32 %v6935_v18, %v3295_v56  ;;  %v3336_v45 = vsub.f32 %v3180_v14, %v3298_v30 }
 0x814   : > { %7485 = vpow2.f32 %v3350_v54 }
 0x815   : > { %v3354_v32 = vmul.f32 1.442695, %v3335_v41  ;;  %v3356_v17 = vmul.f32 1.442695, %v3336_v45 }
 0x816   : > { %v3304_v58 = vpop.xlane.xlu0 %3303  ;;  %v3301_v23 = vpop.xlane.xlu1 %3300 }
 0x817   : > { %7487 = vpow2.f32 %v3354_v32  ;;  %v3338_v37 = vsub.f32 %v6938_v19, %v3304_v58  ;;  %v3337_v39 = vsub.f32 %v3183_v0, %v3301_v23 }
 0x818   : > { %7489 = vpow2.f32 %v3356_v17 }
 0x819   : > { %v3360_v29 = vmul.f32 1.442695, %v3338_v37  ;;  %v3358_v60 = vmul.f32 1.442695, %v3337_v39 }
 0x81a   : > { %v3310_v4 = vpop.xlane.xlu0 %3309  ;;  %v3307_v38 = vpop.xlane.xlu1 %3306 }
 0x81b   : > { %7491 = vpow2.f32 %v3360_v29  ;;  %v3340_v44 = vsub.f32 %v3253_v47, %v3310_v4  ;;  %v3339_v20 = vsub.f32 %v8839_v3, %v3307_v38 }
 0x81c   : > { %v7482_v55 = vpop.eup %7481  ;;  %7493 = vpow2.f32 %v3358_v60 }
 0x81d   : > { %v3364_v56 = vmul.f32 1.442695, %v3340_v44  ;;  %v3362_v30 = vmul.f32 1.442695, %v3339_v20  ;;  %v3542_v41 = vsel %vm1227_vm2, %v7482_v55, 0.0 }
 0x81e   : > { %3543 = vadd.xlane.f32.xlu0 %v3542_v41  ;;  %v3316_v54 = vpop.xlane.xlu0 %3315  ;;  %v3313_v18 = vpop.xlane.xlu1 %3312 }
 0x81f   : > { %7495 = vpow2.f32 %v3364_v56  ;;  %v3342_v58 = vsub.f32 %v8843_v8, %v3316_v54  ;;  %v3341_v17 = vsub.f32 %v8850_v6, %v3313_v18 }
 0x820   : > { %v7484_v19 = vpop.eup %7483  ;;  %7497 = vpow2.f32 %v3362_v30 }
 0x821   : > { %v7486_v14 = vpop.eup %7485  ;;  %v3368_v0 = vmul.f32 1.442695, %v3342_v58  ;;  %v3366_v47 = vmul.f32 1.442695, %v3341_v17  ;;  %v3548_v3 = vsel %vm1227_vm2, %v7484_v19, 0.0 }
 0x822   : > { %3549 = vadd.xlane.f32.xlu0 %v3548_v3  ;;  %v3322_v36 = vpop.xlane.xlu0 %3321  ;;  %v3545_v27 = vsel %vm1227_vm2, %v7486_v14, 0.0  ;;  %v3319_v45 = vpop.xlane.xlu1 %3318  ;;  %v3380_v32 = vpack.c.bf16 %v7486_v14, %v7482_v55 }
 0x823   : > { %7499 = vpow2.f32 %v3368_v0  ;;  %v3344_v23 = vsub.f32 %v8858_v35, %v3322_v36  ;;  %3546 = vadd.xlane.f32.xlu1 %v3545_v27  ;;  %v3343_v8 = vsub.f32 %v8848_v49, %v3319_v45 }
 0x824   : > { %v7488_v6 = vpop.eup %7487  ;;  %7501 = vpow2.f32 %v3366_v47  ;;  %6964 = vmatprep.mubr.msk.bf16.mxu1 %vm1227_vm2, %v3380_v32 }
 0x825   : > { %v7490_v37 = vpop.eup %7489  ;;  %v3381_v39 = vpack.c.bf16 %v7488_v6, %v7484_v19  ;;  %v3372_v29 = vmul.f32 1.442695, %v3344_v23  ;;  %v3370_v60 = vmul.f32 1.442695, %v3343_v8  ;;  %v3551_v4 = vsel %vm1227_vm2, %v7488_v6, 0.0 }
 0x826   : > { %v3554_v38 = vsel %vm1227_vm2, %v7490_v37, 0.0  ;;  %v3328_v44 = vpop.xlane.xlu0 %3327  ;;  %v3325_v20 = vpop.xlane.xlu1 %3324 }
 0x827   : > { %7503 = vpow2.f32 %v3372_v29  ;;  %3555 = vadd.xlane.f32.xlu0 %v3554_v38  ;;  %v3346_v35 = vsub.f32 %v8856_v16, %v3328_v44  ;;  %3552 = vadd.xlane.f32.xlu1 %v3551_v4  ;;  %v3345_v49 = vsub.f32 %v8866_v5, %v3325_v20  ;;  %v6157_v44 = vld [vmem:[%s8617_s12 + $0x8] sm:$0xf] }
 0x828   : > { %v7492_v55 = vpop.eup %7491  ;;  %7505 = vpow2.f32 %v3370_v60  ;;  %6965 = vmatmul.mubr.msk.bf16.vlgmr.msra.gmra.mxu1 %vm1227_vm2, %v3381_v39  ;;  %7250 = vmatprep.subr.msk.bf16.mxu0 %vm2503_vm3, %v6157_v44  ;;  %v3657_v20 = vsel %vm2503_vm3, %v6157_v44, 0 }
 0x829   : > { %v7494_v56 = vpop.eup %7493  ;;  %v3376_v30 = vmul.f32 1.442695, %v3346_v35  ;;  %v3374_v41 = vmul.f32 1.442695, %v3345_v49  ;;  %6973 = vmatpush3.bf16.msra.mxu1 %v8829_v50  ;;  %v3560_v54 = vsel %vm1227_vm2, %v7492_v55, 0.0  ;;  %6989 = vmatpush3.bf16.msra.mxu0 %v3657_v20  ;;  %v8919_v35 = vld [vmem:[%s7901_s21 + $0x78] sm:$0xff]  }
 0x82a   : > { %6974 = vmatprep.subr.bf16.mxu1 %v8831_v2  ;;  %v3557_v18 = vsel %vm1227_vm2, %v7494_v56, 0.0  ;;  %v3331_v58 = vpop.xlane.xlu1 %3330  ;;  %v3382_v16 = vpack.c.bf16 %v7494_v56, %v7490_v37  ;;  %7026 = vmatprep.subr.bf16.mxu0 %v8919_v35  ;;  %v7339_v49 = vld [vmem:[%s7901_s21 + $0x38] sm:$0xff]  }
 0x82b   : > { %7507 = vpow2.f32 %v3376_v30  ;;  %3561 = vadd.xlane.f32.xlu0 %v3560_v54  ;;  %3558 = vadd.xlane.f32.xlu1 %v3557_v18  ;;  %v3347_v5 = vsub.f32 %v8864_v31, %v3331_v58 }
 0x82c   : > { %v7496_v17 = vpop.eup %7495  ;;  %7509 = vpow2.f32 %v3374_v41  ;;  %6968 = vmatprep.mubr.msk.bf16.mxu1 %vm1227_vm2, %v3382_v16 }
 0x82d   : > { %v7498_v19 = vpop.eup %7497  ;;  %v3378_v14 = vmul.f32 1.442695, %v3347_v5  ;;  %6975 = vmatpush3.bf16.msra.mxu1 %v8831_v2  ;;  %v3566_v50 = vsel %vm1227_vm2, %v7496_v17, 0.0 }
 0x82e   : > { %6976 = vmatprep.subr.bf16.mxu1 %v8825_v62  ;;  %v3563_v0 = vsel %vm1227_vm2, %v7498_v19, 0.0  ;;  %v3383_v47 = vpack.c.bf16 %v7498_v19, %v7492_v55  ;;  %v7340_v55 = vld [vmem:[%s7901_s21 + $0x30] sm:$0xff]  }
 0x82f   : > { %7511 = vpow2.f32 %v3378_v14  ;;  %3567 = vadd.xlane.f32.xlu0 %v3566_v50  ;;  %3564 = vadd.xlane.f32.xlu1 %v3563_v0 }
 0x830   : > { %v7500_v3 = vpop.eup %7499  ;;  %6969 = vmatmul.mubr.msk.bf16.gmra.mxu1 %vm1227_vm2, %v3383_v47 }
 0x831   : > { %v7502_v31 = vpop.eup %7501  ;;  %6977 = vmatpush3.bf16.msra.mxu1 %v8825_v62  ;;  %v3572_v36 = vsel %vm1227_vm2, %v7500_v3, 0.0 }
 0x832   : > { %6978 = vmatprep.subr.bf16.mxu1 %v8827_v42  ;;  %v3569_v2 = vsel %vm1227_vm2, %v7502_v31, 0.0  ;;  %v3384_v27 = vpack.c.bf16 %v7502_v31, %v7496_v17 }
 0x833   : > { %3573 = vadd.xlane.f32.xlu0 %v3572_v36  ;;  %3570 = vadd.xlane.f32.xlu1 %v3569_v2 }
 0x834   : > { %v7504_v45 = vpop.eup %7503  ;;  %6980 = vmatprep.mubr.msk.bf16.mxu1 %vm1227_vm2, %v3384_v27 }
 0x835   : > { %v7506_v32 = vpop.eup %7505  ;;  %6979 = vmatpush3.bf16.msra.mxu1 %v8827_v42  ;;  %v3578_v23 = vsel %vm1227_vm2, %v7504_v45, 0.0 }
 0x836   : > { %v3385_v8 = vpack.c.bf16 %v7506_v32, %v7500_v3  ;;  %v3575_v62 = vsel %vm1227_vm2, %v7506_v32, 0.0  ;;  %7006 = vmatprep.subr.bf16.mxu1 %v7339_v49 }
 0x837   : > { %3579 = vadd.xlane.f32.xlu0 %v3578_v23  ;;  %3576 = vadd.xlane.f32.xlu1 %v3575_v62 }
 0x838   : > { %v7508_v6 = vpop.eup %7507  ;;  %6981 = vmatmul.mubr.msk.bf16.vlgmr.msra.gmra.mxu1 %vm1227_vm2, %v3385_v8  ;;  %v7338_v8 = vld [vmem:[%s7901_s21 + $0x70] sm:$0xff]  }
 0x839   : > { %v7510_v37 = vpop.eup %7509  ;;  %v3584_v39 = vsel %vm1227_vm2, %v7508_v6, 0.0  ;;  %7007 = vmatpush3.bf16.msra.mxu1 %v7339_v49 }
 0x83a   : > { %v3581_v29 = vsel %vm1227_vm2, %v7510_v37, 0.0  ;;  %v3386_v60 = vpack.c.bf16 %v7510_v37, %v7504_v45  ;;  %7008 = vmatprep.subr.bf16.mxu1 %v7340_v55 }
 0x83b   : > { %3585 = vadd.xlane.f32.xlu0 %v3584_v39  ;;  %3582 = vadd.xlane.f32.xlu1 %v3581_v29 }
 0x83c   : > { %v7512_v42 = vpop.eup %7511  ;;  %6984 = vmatprep.mubr.msk.bf16.mxu1 %vm1227_vm2, %v3386_v60 }
 0x83d   : > { %v3587_v4 = vsel %vm1227_vm2, %v7512_v42, 0.0  ;;  %v3387_v38 = vpack.c.bf16 %v7512_v42, %v7508_v6  ;;  %7009 = vmatpush3.bf16.msra.mxu1 %v7340_v55 }
 0x83f   : > { %3588 = vadd.xlane.f32.xlu1 %v3587_v4 }
 0x840   : > { %6985 = vmatmul.mubr.msk.bf16.gmra.mxu1 %vm1227_vm2, %v3387_v38 }
 0x841   : > { %7010 = vmatprep.mubr.msk.bf16.mxu1 %vm652_vm0, %v9969_v21 }
 0x848   : > { %7011 = vmatmul.mubr.msk.bf16.vlgmr.msra.gmra.mxu1 %vm652_vm0, %v9973_v9 }
 0x849   : > { %7014 = vmatprep.mubr.msk.bf16.mxu1 %vm652_vm0, %v9974_v57 }
 0x850   : > { %7015 = vmatmul.mubr.msk.bf16.gmra.mxu1 %vm652_vm0, %v9979_v59 }
 0x851   : > { %7018 = vmatprep.mubr.msk.bf16.mxu1 %vm652_vm0, %v9980_v22 }
 0x858   : > { %7019 = vmatmul.mubr.msk.bf16.gmra.mxu1 %vm652_vm0, %v9985_v33 }
 0x859   : > { %7022 = vmatprep.mubr.msk.bf16.mxu1 %vm652_vm0, %v9986_v24 }
 0x860   : > { %7023 = vmatmul.mubr.msk.bf16.gmra.mxu1 %vm652_vm0, %v9990_v25 }
 0x861   : > { %7050 = vmatprep.mubr.msk.bf16.mxu1 %vm652_vm0, %v9961_v43 }
 0x8a7   : > { %v3544_v9 = vpop.xlane.xlu0 %3543 }
 0x8a8   : > { %7513 = vrcp.f32 %v3544_v9 }
 0x8ab   : > { %v3550_v56 = vpop.xlane.xlu0 %3549 }
 0x8ac   : > { %v3547_v21 = vpop.xlane.xlu1 %3546 }
 0x8b0   : > { %v3553_v57 = vpop.xlane.xlu1 %3552  ;;  %v3556_v30 = vpop.xlane.xlu0 %3555 }
 0x8b1   : > { %7515 = vrcp.f32 %v3553_v57 }
 0x8b2   : > { %7517 = vrcp.f32 %v3547_v21 }
 0x8b3   : > { %7519 = vrcp.f32 %v3550_v56 }
 0x8b4   : > { %v3559_v59 = vpop.xlane.xlu1 %3558  ;;  %v3562_v22 = vpop.xlane.xlu0 %3561  ;;  %7521 = vrcp.f32 %v3556_v30 }
 0x8b5   : > { %v7514_v16 = vpop.eup %7513 }
 0x8b8   : > { %v3565_v41 = vpop.xlane.xlu1 %3564  ;;  %v3568_v24 = vpop.xlane.xlu0 %3567 }
 0x8b9   : > { %7523 = vrcp.f32 %v3565_v41 }
 0x8ba   : > { %7525 = vrcp.f32 %v3559_v59 }
 0x8bb   : > { %7527 = vrcp.f32 %v3562_v22 }
 0x8bc   : > { %v3571_v33 = vpop.xlane.xlu1 %3570  ;;  %v3574_v58 = vpop.xlane.xlu0 %3573  ;;  %7529 = vrcp.f32 %v3568_v24 }
 0x8be   : > { %v7516_v17 = vpop.eup %7515 }
 0x8bf   : > { %v7518_v19 = vpop.eup %7517 }
 0x8c0   : > { %v3577_v54 = vpop.xlane.xlu1 %3576  ;;  %v7520_v0 = vpop.eup %7519 }
 0x8c1   : > { %7531 = vrcp.f32 %v3577_v54  ;;  %v3580_v27 = vpop.xlane.xlu0 %3579  ;;  %v7522_v62 = vpop.eup %7521 }
 0x8c2   : > { %7533 = vrcp.f32 %v3571_v33 }
 0x8c3   : > { %7535 = vrcp.f32 %v3574_v58 }
 0x8c4   : > { %v3583_v47 = vpop.xlane.xlu1 %3582  ;;  %7537 = vrcp.f32 %v3580_v27 }
 0x8c5   : > { %v3586_v38 = vpop.xlane.xlu0 %3585 }
 0x8c6   : > { %v7524_v37 = vpop.eup %7523 }
 0x8c7   : > { %v7526_v29 = vpop.eup %7525 }
 0x8c8   : > { %v3589_v39 = vpop.xlane.xlu1 %3588  ;;  %v7528_v4 = vpop.eup %7527 }
 0x8c9   : > { %7539 = vrcp.f32 %v3589_v39 }
 0x8ca   : > { %7541 = vrcp.f32 %v3583_v47 }
 0x8cb   : > { %7543 = vrcp.f32 %v3586_v38 }
 0x8e8   : > { %v6966_v25 = vpop.f32.mrf.mxu1 }
 0x8e9   : > { %v3608_v36 = vmul.f32 %v7520_v0, %v6966_v25 }
 0x8ea   : > { %v3434_v18 = vpop.f32.mrf.mxu1 }
 0x8eb   : > { %v3606_v3 = vmul.f32 %v7514_v16, %v3434_v18 }
 0x8ec   : > { %v6967_v5 = vpop.f32.mrf.mxu1 }
 0x8ed   : > { %v3609_v14 = vmul.f32 %v7516_v17, %v6967_v5 }
 0x8ee   : > { %v3437_v50 = vpop.f32.mrf.mxu1 }
 0x8ef   : > { %v3607_v31 = vmul.f32 %v7518_v19, %v3437_v50  ;;  %v3623_v32 = vpack.c.bf16 %v3609_v14, %v3608_v36 }
 0x8f0   : > { %v6970_v2 = vpop.f32.mrf.mxu1 }
 0x8f1   : > { %v3622_v45 = vpack.c.bf16 %v3607_v31, %v3606_v3  ;;  %v3612_v49 = vmul.f32 %v7528_v4, %v6970_v2 }
 0x8f2   : > { %v3450_v23 = vpop.f32.mrf.mxu1 }
 0x8f3   : > { %6990 = vmatprep.mubr.msk.bf16.mxu0 %vm1048_vm1, %v3622_v45  ;;  %v3610_v44 = vmul.f32 %v7522_v62, %v3450_v23  ;;  %v8981_v23 = vsub.s32 3, %v9988_v26 }
 0x8f4   : > { %v6971_v6 = vpop.f32.mrf.mxu1  ;;  %6991 = vmatmul.mubr.msk.bf16.vlgmr.msra.gmra.mxu0 %vm1048_vm1, %v3623_v32  ;;  %v7342_v32 = vld [vmem:[%s7901_s21 + $0xb0] sm:$0xff]  }
 0x8f5   : > { %7027 = vmatpush3.bf16.msra.mxu0 %v8919_v35  ;;  %v3613_v60 = vmul.f32 %v7524_v37, %v6971_v6  ;;  %v7530_v35 = vpop.eup %7529 }
 0x8f6   : > { %v3453_v42 = vpop.f32.mrf.mxu1  ;;  %7028 = vmatprep.subr.bf16.mxu0 %v7338_v8  ;;  %v7532_v59 = vpop.eup %7531 }
 0x8f7   : > { %v3611_v20 = vmul.f32 %v7526_v29, %v3453_v42  ;;  %v3625_v9 = vpack.c.bf16 %v3613_v60, %v3612_v49  ;;  %v7534_v30 = vpop.eup %7533 }
 0x8f8   : > { %v6982_v55 = vpop.f32.mrf.mxu1  ;;  %v7536_v33 = vpop.eup %7535 }
 0x8f9   : > { %v3624_v21 = vpack.c.bf16 %v3611_v20, %v3610_v44  ;;  %7029 = vmatpush3.bf16.msra.mxu0 %v7338_v8  ;;  %v3616_v54 = vmul.f32 %v7536_v33, %v6982_v55  ;;  %v7538_v17 = vpop.eup %7537  ;;  %v2674_v33 = vadd.f32 %v8690_v53, %v8778_v51  ;;  %v2690_v53 = vadd.f32 %v8702_v40, %v8786_v34 }
 0x8fa   : > { %v3511_v57 = vpop.f32.mrf.mxu1  ;;  %v7540_v14 = vpop.eup %7539 }
 0x8fb   : > { %6994 = vmatprep.mubr.msk.bf16.mxu0 %vm1048_vm1, %v3624_v21  ;;  %v3614_v24 = vmul.f32 %v7530_v35, %v3511_v57  ;;  %v7542_v50 = vpop.eup %7541 }
 0x8fc   : > { %v6983_v56 = vpop.f32.mrf.mxu1  ;;  %6995 = vmatmul.mubr.msk.bf16.gmra.mxu0 %vm1048_vm1, %v3625_v9  ;;  %v7544_v3 = vpop.eup %7543 }
 0x8fd   : > { %v3617_v41 = vmul.f32 %v7532_v59, %v6983_v56 }
 0x8fe   : > { %v3514_v22 = vpop.f32.mrf.mxu1 }
 0x8ff   : > { %v3615_v25 = vmul.f32 %v7534_v30, %v3514_v22  ;;  %v3627_v16 = vpack.c.bf16 %v3617_v41, %v3616_v54 }
 0x900   : > { %v6986_v18 = vpop.f32.mrf.mxu1 }
 0x901   : > { %v3626_v58 = vpack.c.bf16 %v3615_v25, %v3614_v24  ;;  %v3620_v2 = vmul.f32 %v7544_v3, %v6986_v18  ;;  %v2666_v25 = vadd.f32 %v8692_v48, %v8780_v11 }
 0x902   : > { %v3527_v5 = vpop.f32.mrf.mxu1 }
 0x903   : > { %6998 = vmatprep.mubr.msk.bf16.mxu0 %vm1048_vm1, %v3626_v58  ;;  %v3618_v31 = vmul.f32 %v7538_v17, %v3527_v5  ;;  %v2677_v58 = vadd.f32 %v8696_v10, %v8782_v52 }
 0x904   : > { %v6987_v19 = vpop.f32.mrf.mxu1  ;;  %6999 = vmatmul.mubr.msk.bf16.gmra.mxu0 %vm1048_vm1, %v3627_v16 }
 0x905   : > { %v3621_v0 = vmul.f32 %v7540_v14, %v6987_v19  ;;  %v10002_v14 = vld [vmem:[#allocation30_spill] sm:$0xff] }
 0x906   : > { %v3530_v47 = vpop.f32.mrf.mxu1  ;;  %v2682_v48 = vadd.f32 %v10002_v14, %v8788_v46 }
 0x907   : > { %v3619_v36 = vmul.f32 %v7542_v50, %v3530_v47  ;;  %v3629_v45 = vpack.c.bf16 %v3621_v0, %v3620_v2  ;;  %v10003_v0 = vld [vmem:[#allocation13_spill] sm:$0xff]  ;;  %v10004_v47 = vld [vmem:[#allocation32_spill] sm:$0xff] }
 0x908   : > { %v7012_v8 = vpop.f32.mrf.mxu1  ;;  %v2693_v10 = vadd.f32 %v10004_v47, %v10003_v0  ;;  %v10005_v2 = vld [vmem:[#allocation17_spill] sm:$0xff] }
 0x909   : > { %v3628_v27 = vpack.c.bf16 %v3619_v36, %v3618_v31  ;;  %v7676_v47 = vld [vmem:[%s8032_s27 + $0x4] sm:$0xf] }
 0x90b   : > { %7002 = vmatprep.mubr.msk.bf16.mxu0 %vm1048_vm1, %v3628_v27  ;;  %v10006_v27 = vld [vmem:[#allocation29_spill] sm:$0xff] }
 0x90c   : > { %7003 = vmatmul.mubr.msk.bf16.gmra.mxu0 %vm1048_vm1, %v3629_v45  ;;  %v2706_v40 = vadd.f32 %v10006_v27, %v10005_v2  ;;  %v10007_v45 = vld [vmem:[#allocation18_spill] sm:$0xff] }
 0x90d   : > { %7030 = vmatprep.mubr.msk.bf16.mxu0 %vm652_vm0, %v9961_v43  ;;  %v7341_v43 = vld [vmem:[%s7901_s21 + $0xb8] sm:$0xff]   ;;  %s5969_s21 = sshll.u32 %s7889_s28, 3 }
 0x90e   : > { %7046 = vmatprep.subr.bf16.mxu1 %v7341_v43  ;;  %s9212_s24 = scalar_lea.vmem %s9880_s9, %s5969_s21  ;;  %s558_s21 = scalar_lea.vmem %s9878_s7, %s7889_s28 }
 0x90f   : > { %7047 = vmatpush3.bf16.msra.mxu1 %v7341_v43  ;;  %v10008_v43 = vld [vmem:[#allocation11_spill] sm:$0xff] }
 0x910   : > { %7048 = vmatprep.subr.bf16.mxu1 %v7342_v32  ;;  %v2698_v46 = vadd.f32 %v10008_v43, %v10007_v45 }
 0x913   : > { %7049 = vmatpush3.bf16.msra.mxu1 %v7342_v32 }
 0x914   : > { %7031 = vmatmul.mubr.msk.bf16.vlgmr.msra.gmra.mxu0 %vm652_vm0, %v9962_v61 }
 0x915   : > { %7034 = vmatprep.mubr.msk.bf16.mxu0 %vm652_vm0, %v9963_v63 }
 0x916   : > { %7051 = vmatmul.mubr.msk.bf16.vlgmr.msra.gmra.mxu1 %vm652_vm0, %v9962_v61  ;;  %v8985_v61 = vrot.slane %v8811_v13, %v8981_v23 }
 0x917   : > { %7054 = vmatprep.mubr.msk.bf16.mxu1 %vm652_vm0, %v9963_v63  ;;  %v3837_v63 = vpop.f32.mrf.mxu1 }
 0x91c   : > { %7035 = vmatmul.mubr.msk.bf16.gmra.mxu0 %vm652_vm0, %v9964_v7 }
 0x91d   : > { %7038 = vmatprep.mubr.msk.bf16.mxu0 %vm652_vm0, %v9965_v15 }
 0x91e   : > { %7055 = vmatmul.mubr.msk.bf16.gmra.mxu1 %vm652_vm0, %v9964_v7  ;;  %v8990_v7 = vadd.f32 %v7012_v8, %v8985_v61 }
 0x91f   : > { %7058 = vmatprep.mubr.msk.bf16.mxu1 %vm652_vm0, %v9965_v15  ;;  %v7013_v15 = vpop.f32.mrf.mxu1 }
 0x921   : > { %v3840_v62 = vpop.f32.mrf.mxu1 }
 0x922   : > { %v3841_v13 = vadd.f32 %v3840_v62, %v8985_v61 }
 0x923   : > { %v7016_v37 = vpop.f32.mrf.mxu1 }
 0x924   : > { %7039 = vmatmul.mubr.msk.bf16.gmra.mxu0 %vm652_vm0, %v9966_v1 }
 0x925   : > { %7042 = vmatprep.mubr.msk.bf16.mxu0 %vm652_vm0, %v9967_v12  ;;  %v3853_v29 = vpop.f32.mrf.mxu1 }
 0x926   : > { %7059 = vmatmul.mubr.msk.bf16.gmra.mxu1 %vm652_vm0, %v9966_v1  ;;  %v3838_v1 = vadd.f32 %v3837_v63, %v8985_v61  ;;  %v9003_v60 = vadd.f32 %v3853_v29, %v8985_v61  ;;  %v10009_v63 = vld [vmem:[#allocation21_spill] sm:$0xff] }
 0x927   : > { %7062 = vmatprep.mubr.msk.bf16.mxu1 %vm652_vm0, %v9967_v12  ;;  %v8994_v12 = vadd.f32 %v7013_v15, %v8985_v61  ;;  %v7017_v42 = vpop.f32.mrf.mxu1  ;;  %v10010_v15 = vld [vmem:[#allocation15_spill] sm:$0xff]  ;;  %v10011_v29 = vld [vmem:[#allocation25_spill] sm:$0xff] }
 0x928   : > { %v3900_v39 = vpack.c.bf16 %v3841_v13, %v3838_v1  ;;  %v9007_v4 = vadd.f32 %v7017_v42, %v8985_v61  ;;  %v2709_v1 = vadd.f32 %v10010_v15, %v10009_v63  ;;  %v10012_v42 = vld [vmem:[#allocation19_spill] sm:$0xff] }
 0x929   : > { %v3901_v6 = vpack.c.bf16 %v8994_v12, %v8990_v7  ;;  %v3856_v38 = vpop.f32.mrf.mxu1 }
 0x92a   : > { %v9012_v20 = vadd.f32 %v3856_v38, %v8985_v61  ;;  %v2722_v38 = vadd.f32 %v10012_v42, %v10011_v29 }
 0x92b   : > { %v7020_v49 = vpop.f32.mrf.mxu1 }
 0x92c   : > { %7043 = vmatmul.mubr.msk.bf16.gmra.mxu0 %vm652_vm0, %v9968_v28  ;;  %v3902_v55 = vpack.c.bf16 %v9012_v20, %v9003_v60  ;;  %v9017_v21 = vadd.f32 %v7020_v49, %v8985_v61 }
 0x92d   : > { %7074 = vmatprep.mubr.msk.bf16.mxu0 %vm1048_vm1, %v3900_v39  ;;  %v3869_v9 = vpop.f32.mrf.mxu1 }
 0x92e   : > { %7063 = vmatmul.mubr.msk.bf16.gmra.mxu1 %vm652_vm0, %v9968_v28  ;;  %v9000_v28 = vadd.f32 %v7016_v37, %v8985_v61  ;;  %v3870_v35 = vadd.f32 %v3869_v9, %v8985_v61  ;;  %v10013_v9 = vld [vmem:[#allocation10_spill] sm:$0xff] }
 0x92f   : > { %v7021_v57 = vpop.f32.mrf.mxu1 }
 0x930   : > { %v3903_v44 = vpack.c.bf16 %v9007_v4, %v9000_v28  ;;  %v9021_v56 = vadd.f32 %v7021_v57, %v8985_v61  ;;  %v10014_v57 = vld [vmem:[#allocation20_spill] sm:$0xff] }
 0x931   : > { %v3872_v59 = vpop.f32.mrf.mxu1 }
 0x932   : > { %v3905_v30 = vpack.c.bf16 %v9021_v56, %v9017_v21  ;;  %v3873_v41 = vadd.f32 %v3872_v59, %v8985_v61 }
 0x934   : > { %v3904_v22 = vpack.c.bf16 %v3873_v41, %v3870_v35  ;;  %v2714_v35 = vadd.f32 %v10014_v57, %v10013_v9 }
 0x936   : > { %7090 = vmatprep.mubr.msk.bf16.mxu1 %vm1048_vm1, %v3904_v22  ;;  %v10015_v22 = vld [vmem:[#allocation33_spill] sm:$0xff] }
 0x9b4   : > { %v6992_v24 = vpop.f32.mrf.mxu0 }
 0x9b5   : > { %v9031_v54 = vadd.f32 %v6992_v24, %v2674_v33  ;;  %v10016_v33 = vld [vmem:[#allocation22_spill] sm:$0xff] }
 0x9b6   : > { %v3693_v18 = vpop.f32.mrf.mxu0  ;;  %v2725_v24 = vadd.f32 %v10016_v33, %v10015_v22 }
 0x9b7   : > { %v9035_v16 = vadd.f32 %v3693_v18, %v2666_v25 }
 0x9b8   : > { %v6993_v5 = vpop.f32.mrf.mxu0 }
 0x9b9   : > { %v9037_v17 = vadd.f32 %v6993_v5, %v2677_v58 }
 0x9ba   : > { %v9039_v19 = vpop.f32.mrf.mxu0 }
 0x9bc   : > { %v6996_v51 = vpop.f32.mrf.mxu0 }
 0x9bd   : > { %v9045_v11 = vadd.f32 %v6996_v51, %v2690_v53 }
 0x9be   : > { %v3709_v50 = vpop.f32.mrf.mxu0 }
 0x9bf   : > { %v9049_v52 = vadd.f32 %v3709_v50, %v2682_v48 }
 0x9c0   : > { %v6997_v3 = vpop.f32.mrf.mxu0 }
 0x9c1   : > { %v9051_v31 = vadd.f32 %v6997_v3, %v2693_v10  ;;  %v3911_v10 = vrot.slane %v7676_v47, %v8981_v23 }
 0x9c2   : > { %v9053_v36 = vpop.f32.mrf.mxu0 }
 0x9c4   : > { %v7000_v34 = vpop.f32.mrf.mxu0 }
 0x9c5   : > { %v9059_v32 = vadd.f32 %v7000_v34, %v2706_v40 }
 0x9c6   : > { %v3725_v8 = vpop.f32.mrf.mxu0 }
 0x9c7   : > { %v9063_v62 = vadd.f32 %v3725_v8, %v2698_v46 }
 0x9c8   : > { %v7001_v13 = vpop.f32.mrf.mxu0 }
 0x9c9   : > { %v9065_v37 = vadd.f32 %v7001_v13, %v2709_v1 }
 0x9ca   : > { %v9067_v39 = vpop.f32.mrf.mxu0 }
 0x9cc   : > { %v7004_v49 = vpop.f32.mrf.mxu0 }
 0x9cd   : > { %v9073_v59 = vadd.f32 %v7004_v49, %v2722_v38 }
 0x9ce   : > { %v3741_v41 = vpop.f32.mrf.mxu0 }
 0x9cf   : > { %v9077_v25 = vadd.f32 %v3741_v41, %v2714_v35 }
 0x9d0   : > { %v7005_v18 = vpop.f32.mrf.mxu0 }
 0x9d1   : > { %v9079_v58 = vadd.f32 %v7005_v18, %v2725_v24 }
 0x9d2   : > { %v9081_v5 = vpop.f32.mrf.mxu0 }
 0x9d4   : > { %v7032_v53 = vpop.f32.mrf.mxu0 }
 0x9d5   : > { %v3967_v42 = vadd.f32 %v7032_v53, %v3911_v10 }
 0x9d6   : > { %v3958_v51 = vpop.f32.mrf.mxu0 }
 0x9d7   : > { %v3959_v18 = vadd.f32 %v3958_v51, %v3911_v10 }
 0x9d8   : > { %v7033_v14 = vpop.f32.mrf.mxu0 }
 0x9d9   : > { %v3970_v13 = vadd.f32 %v7033_v14, %v3911_v10 }
 0x9da   : > { %v3961_v48 = vpop.f32.mrf.mxu0 }
 0x9db   : > { %v4135_v49 = vpack.c.bf16 %v3970_v13, %v3967_v42  ;;  %v3962_v41 = vadd.f32 %v3961_v48, %v3911_v10  ;;  %v7677_v42 = vld [vmem:[%s8032_s27 + $0x8] sm:$0xf] }
 0x9dc   : > { %v7036_v50 = vpop.f32.mrf.mxu0 }
 0x9dd   : > { %v3983_v2 = vadd.f32 %v7036_v50, %v3911_v10  ;;  %v4134_v14 = vpack.c.bf16 %v3962_v41, %v3959_v18  ;;  %v4166_v53 = vsel %vm1048_vm1, %v4135_v49, 0 }
 0x9de   : > { %v3974_v0 = vpop.f32.mrf.mxu0 }
 0x9df   : > { %v3975_v34 = vadd.f32 %v3974_v0, %v3911_v10 }
 0x9e0   : > { %v7037_v3 = vpop.f32.mrf.mxu0 }
 0x9e1   : > { %v3986_v27 = vadd.f32 %v7037_v3, %v3911_v10 }
 0x9e2   : > { %v3977_v40 = vpop.f32.mrf.mxu0 }
 0x9e3   : > { %v4137_v45 = vpack.c.bf16 %v3986_v27, %v3983_v2  ;;  %v3978_v43 = vadd.f32 %v3977_v40, %v3911_v10  ;;  %v4163_v40 = vsel %vm1048_vm1, %v4134_v14, 0 }
 0x9e4   : > { %v7040_v46 = vpop.f32.mrf.mxu0 }
 0x9e5   : > { %v4136_v8 = vpack.c.bf16 %v3978_v43, %v3975_v34  ;;  %7251 = vmatprep.subr.msk.bf16.mxu0 %vm1048_vm1, %v4137_v45  ;;  %v4172_v63 = vsel %vm1048_vm1, %v4137_v45, 0  ;;  %v3999_v27 = vadd.f32 %v7040_v46, %v3911_v10  ;;  %v7024_v45 = vpop.f32.mrf.mxu1 }
 0x9e6   : > { %v3990_v15 = vpop.f32.mrf.mxu0  ;;  %7067 = vmatpush3.bf16.xpose.msra.mxu0 %v4172_v63  ;;  %v3894_v28 = vadd.f32 %v7024_v45, %v8985_v61 }
 0x9e7   : > { %7252 = vmatprep.subr.msk.bf16.mxu0 %vm1048_vm1, %v4136_v8  ;;  %v4169_v9 = vsel %vm1048_vm1, %v4136_v8, 0  ;;  %v3991_v8 = vadd.f32 %v3990_v15, %v3911_v10  ;;  %v3885_v63 = vpop.f32.mrf.mxu1 }
 0x9e8   : > { %v7041_v1 = vpop.f32.mrf.mxu0  ;;  %v3886_v12 = vadd.f32 %v3885_v63, %v8985_v61 }
 0x9e9   : > { %v4002_v48 = vadd.f32 %v7041_v1, %v3911_v10  ;;  %v7025_v1 = vpop.f32.mrf.mxu1 }
 0x9ea   : > { %v3993_v29 = vpop.f32.mrf.mxu0  ;;  %v3897_v4 = vadd.f32 %v7025_v1, %v8985_v61 }
 0x9eb   : > { %v4139_v51 = vpack.c.bf16 %v4002_v48, %v3999_v27  ;;  %v3994_v43 = vadd.f32 %v3993_v29, %v3911_v10  ;;  %v3888_v29 = vpop.f32.mrf.mxu1 }
 0x9ec   : > { %v7044_v38 = vpop.f32.mrf.mxu0 }
 0x9ed   : > { %v4015_v22 = vadd.f32 %v7044_v38, %v3911_v10  ;;  %v4138_v13 = vpack.c.bf16 %v3994_v43, %v3991_v8  ;;  %v4255_v46 = vsel %vm1048_vm1, %v4139_v51, 0  ;;  %v7052_v20 = vpop.f32.mrf.mxu1  ;;  %v4024_v38 = vrot.slane %v7677_v42, %v8981_v23 }
 0x9ee   : > { %v4006_v57 = vpop.f32.mrf.mxu0  ;;  %7069 = vmatpush3.bf16.xpose.msra.mxu0 %v4169_v9 }
 0x9ef   : > { %7253 = vmatprep.subr.msk.bf16.mxu0 %vm1048_vm1, %v4135_v49  ;;  %v4007_v50 = vadd.f32 %v4006_v57, %v3911_v10  ;;  %v4252_v7 = vsel %vm1048_vm1, %v4138_v13, 0  ;;  %v4080_v41 = vadd.f32 %v7052_v20, %v4024_v38 }
 0x9f0   : > { %v7045_v35 = vpop.f32.mrf.mxu0 }
 0x9f1   : > { %v4018_v33 = vadd.f32 %v7045_v35, %v3911_v10 }
 0x9f2   : > { %v4009_v24 = vpop.f32.mrf.mxu0 }
 0x9f3   : > { %v4141_v0 = vpack.c.bf16 %v4018_v33, %v4015_v22  ;;  %v4010_v47 = vadd.f32 %v4009_v24, %v3911_v10 }
 0x9f5   : > { %v4140_v3 = vpack.c.bf16 %v4010_v47, %v4007_v50  ;;  %7255 = vmatprep.subr.msk.bf16.mxu1 %vm1048_vm1, %v4141_v0  ;;  %v4261_v2 = vsel %vm1048_vm1, %v4141_v0, 0 }
 0x9f6   : > { %7071 = vmatpush3.bf16.xpose.msra.mxu0 %v4166_v53  ;;  %7083 = vmatpush3.bf16.xpose.msra.mxu1 %v4261_v2 }
 0x9f7   : > { %7254 = vmatprep.subr.msk.bf16.mxu0 %vm1048_vm1, %v4134_v14  ;;  %7256 = vmatprep.subr.msk.bf16.mxu1 %vm1048_vm1, %v4140_v3  ;;  %v4258_v34 = vsel %vm1048_vm1, %v4140_v3, 0 }
 0x9fe   : > { %7073 = vmatpush3.bf16.xpose.msra.mxu0 %v4163_v40  ;;  %7085 = vmatpush3.bf16.xpose.msra.mxu1 %v4258_v34 }
 0x9ff   : > { %7257 = vmatprep.subr.msk.bf16.mxu1 %vm1048_vm1, %v4139_v51 }
 0xa05   : > { %7075 = vmatmul.mubr.msk.bf16.vlgmr.msra.gmra.mxu0 %vm1048_vm1, %v3901_v6  ;;  %v3889_v6 = vadd.f32 %v3888_v29, %v8985_v61 }
 0xa06   : > { %7078 = vmatprep.mubr.msk.bf16.mxu0 %vm1048_vm1, %v3902_v55  ;;  %7087 = vmatpush3.bf16.xpose.msra.mxu1 %v4255_v46  ;;  %v4071_v55 = vpop.f32.mrf.mxu1 }
 0xa07   : > { %7258 = vmatprep.subr.msk.bf16.mxu1 %vm1048_vm1, %v4138_v13  ;;  %v3906_v60 = vpack.c.bf16 %v3889_v6, %v3886_v12  ;;  %v4072_v0 = vadd.f32 %v4071_v55, %v4024_v38 }
 0xa08   : > { %v7053_v10 = vpop.f32.mrf.mxu1 }
 0xa09   : > { %v4083_v22 = vadd.f32 %v7053_v10, %v4024_v38 }
 0xa0a   : > { %v4074_v15 = vpop.f32.mrf.mxu1 }
 0xa0b   : > { %v4143_v47 = vpack.c.bf16 %v4083_v22, %v4080_v41  ;;  %v4075_v14 = vadd.f32 %v4074_v15, %v4024_v38 }
 0xa0c   : > { %v7056_v49 = vpop.f32.mrf.mxu1 }
 0xa0d   : > { %7079 = vmatmul.mubr.msk.bf16.gmra.mxu0 %vm1048_vm1, %v3903_v44  ;;  %v3907_v44 = vpack.c.bf16 %v3897_v4, %v3894_v28  ;;  %v4096_v56 = vadd.f32 %v7056_v49, %v4024_v38  ;;  %v4142_v2 = vpack.c.bf16 %v4075_v14, %v4072_v0 }
 0xa0e   : > { %7089 = vmatpush3.bf16.xpose.msra.mxu1 %v4252_v7  ;;  %v4087_v21 = vpop.f32.mrf.mxu1 }
 0xa0f   : > { %v4088_v9 = vadd.f32 %v4087_v21, %v4024_v38 }
 0xa15   : > { %7091 = vmatmul.mubr.msk.bf16.vlgmr.msra.gmra.mxu1 %vm1048_vm1, %v3905_v30  ;;  %v7057_v30 = vpop.f32.mrf.mxu1 }
 0xa16   : > { %7094 = vmatprep.mubr.msk.bf16.mxu1 %vm1048_vm1, %v3906_v60  ;;  %v4099_v57 = vadd.f32 %v7057_v30, %v4024_v38 }
 0xa17   : > { %v4090_v35 = vpop.f32.mrf.mxu1 }
 0xa18   : > { %v4145_v61 = vpack.c.bf16 %v4099_v57, %v4096_v56  ;;  %v4091_v33 = vadd.f32 %v4090_v35, %v4024_v38 }
 0xa19   : > { %v7060_v24 = vpop.f32.mrf.mxu1 }
 0xa1a   : > { %v4144_v18 = vpack.c.bf16 %v4091_v33, %v4088_v9  ;;  %7098 = vmatprep.subr.bf16.mxu0 %v4145_v61  ;;  %v4112_v8 = vadd.f32 %v7060_v24, %v4024_v38 }
 0xa1b   : > { %v4103_v50 = vpop.f32.mrf.mxu1  ;;  %7099 = vmatpush3.bf16.msra.mxu0 %v4145_v61 }
 0xa1c   : > { %7100 = vmatprep.subr.bf16.mxu0 %v4144_v18  ;;  %v4104_v29 = vadd.f32 %v4103_v50, %v4024_v38 }
 0xa1d   : > { %7095 = vmatmul.mubr.msk.bf16.gmra.mxu1 %vm1048_vm1, %v3907_v44  ;;  %v7061_v3 = vpop.f32.mrf.mxu1 }
 0xa1e   : > { %v4115_v63 = vadd.f32 %v7061_v3, %v4024_v38 }
 0xa1f   : > { %v4106_v53 = vpop.f32.mrf.mxu1  ;;  %7101 = vmatpush3.bf16.msra.mxu0 %v4144_v18 }
 0xa20   : > { %7102 = vmatprep.subr.bf16.mxu0 %v4143_v47  ;;  %v4147_v7 = vpack.c.bf16 %v4115_v63, %v4112_v8  ;;  %v4107_v12 = vadd.f32 %v4106_v53, %v4024_v38 }
 0xa21   : > { %v7064_v48 = vpop.f32.mrf.mxu1 }
 0xa22   : > { %v4128_v51 = vadd.f32 %v7064_v48, %v4024_v38  ;;  %v4146_v6 = vpack.c.bf16 %v4107_v12, %v4104_v29 }
 0xa23   : > { %v4119_v27 = vpop.f32.mrf.mxu1  ;;  %7103 = vmatpush3.bf16.msra.mxu0 %v4143_v47 }
 0xa24   : > { %7104 = vmatprep.subr.bf16.mxu0 %v4142_v2  ;;  %v4120_v34 = vadd.f32 %v4119_v27, %v4024_v38 }
 0xa25   : > { %v7065_v40 = vpop.f32.mrf.mxu1 }
 0xa26   : > { %v4131_v45 = vadd.f32 %v7065_v40, %v4024_v38 }
 0xa27   : > { %7105 = vmatpush3.bf16.msra.mxu0 %v4142_v2  ;;  %v4122_v43 = vpop.f32.mrf.mxu1 }
 0xa28   : > { %v4149_v13 = vpack.c.bf16 %v4131_v45, %v4128_v51  ;;  %v4123_v46 = vadd.f32 %v4122_v43, %v4024_v38 }
 0xa2a   : > { %v4148_v1 = vpack.c.bf16 %v4123_v46, %v4120_v34  ;;  %7114 = vmatprep.subr.bf16.mxu1 %v4149_v13 }
 0xa2b   : > { %7115 = vmatpush3.bf16.msra.mxu1 %v4149_v13 }
 0xa2c   : > { %7116 = vmatprep.subr.bf16.mxu1 %v4148_v1 }
 0xa2f   : > { %7117 = vmatpush3.bf16.msra.mxu1 %v4148_v1 }
 0xa30   : > { %7118 = vmatprep.subr.bf16.mxu1 %v4147_v7 }
 0xa33   : > { %7119 = vmatpush3.bf16.msra.mxu1 %v4147_v7 }
 0xa34   : > { %7120 = vmatprep.subr.bf16.mxu1 %v4146_v6 }
 0xa37   : > { %7121 = vmatpush3.bf16.msra.mxu1 %v4146_v6 }
 0xac5   : > { %v7076_v60 = vpop.f32.mrf.mxu0 }
 0xac6   : > { %v4334_v55 = vsel %vm1227_vm2, %v7076_v60, -inf }
 0xac7   : > { %v4208_v28 = vpop.f32.mrf.mxu0 }
 0xac8   : > { %v4328_v4 = vsel %vm1227_vm2, %v4208_v28, -inf }
 0xac9   : > { %4329 = vmax.xlane.f32.xlu0 %v4328_v4  ;;  %v7077_v44 = vpop.f32.mrf.mxu0 }
 0xaca   : > { %v4337_v38 = vsel %vm1227_vm2, %v7077_v44, -inf }
 0xacb   : > { %v4211_v20 = vpop.f32.mrf.mxu0 }
 0xacc   : > { %v4331_v10 = vsel %vm1227_vm2, %v4211_v20, -inf }
 0xacd   : > { %4335 = vmax.xlane.f32.xlu0 %v4334_v55  ;;  %4332 = vmax.xlane.f32.xlu1 %v4331_v10  ;;  %v7080_v15 = vpop.f32.mrf.mxu0 }
 0xace   : > { %v4346_v30 = vsel %vm1227_vm2, %v7080_v15, -inf }
 0xacf   : > { %v4224_v42 = vpop.f32.mrf.mxu0 }
 0xad0   : > { %v4340_v49 = vsel %vm1227_vm2, %v4224_v42, -inf }
 0xad1   : > { %4338 = vmax.xlane.f32.xlu1 %v4337_v38  ;;  %4341 = vmax.xlane.f32.xlu0 %v4340_v49  ;;  %v9130_v21 = vpop.f32.mrf.mxu0 }
 0xad2   : > { %v4349_v22 = vsel %vm1227_vm2, %v9130_v21, -inf }
 0xad3   : > { %v4227_v56 = vpop.f32.mrf.mxu0 }
 0xad4   : > { %v4343_v9 = vsel %vm1227_vm2, %v4227_v56, -inf }
 0xad5   : > { %v9134_v57 = vpop.f32.mrf.mxu1  ;;  %4347 = vmax.xlane.f32.xlu0 %v4346_v30  ;;  %4344 = vmax.xlane.f32.xlu1 %v4343_v9 }
 0xad6   : > { %v4358_v24 = vsel %vm1227_vm2, %v9134_v57, -inf }
 0xad7   : > { %v4297_v35 = vpop.f32.mrf.mxu1 }
 0xad8   : > { %v4352_v41 = vsel %vm1227_vm2, %v4297_v35, -inf }
 0xad9   : > { %v9139_v61 = vpop.f32.mrf.mxu1  ;;  %4353 = vmax.xlane.f32.xlu0 %v4352_v41  ;;  %4350 = vmax.xlane.f32.xlu1 %v4349_v22 }
 0xada   : > { %v4361_v14 = vsel %vm1227_vm2, %v9139_v61, -inf }
 0xadb   : > { %v9141_v33 = vpop.f32.mrf.mxu1 }
 0xadc   : > { %v4355_v18 = vsel %vm1227_vm2, %v9141_v33, -inf }
 0xadd   : > { %v9147_v50 = vpop.f32.mrf.mxu1  ;;  %4359 = vmax.xlane.f32.xlu0 %v4358_v24  ;;  %4356 = vmax.xlane.f32.xlu1 %v4355_v18 }
 0xade   : > { %v4370_v2 = vsel %vm1227_vm2, %v9147_v50, -inf }
 0xadf   : > { %v9149_v0 = vpop.f32.mrf.mxu1 }
 0xae0   : > { %v4364_v47 = vsel %vm1227_vm2, %v9149_v0, -inf }
 0xae1   : > { %v9155_v3 = vpop.f32.mrf.mxu1  ;;  %4365 = vmax.xlane.f32.xlu0 %v4364_v47  ;;  %4362 = vmax.xlane.f32.xlu1 %v4361_v14 }
 0xae2   : > { %v4373_v27 = vsel %vm1227_vm2, %v9155_v3, -inf }
 0xae3   : > { %v9157_v53 = vpop.f32.mrf.mxu1 }
 0xae4   : > { %v4367_v48 = vsel %vm1227_vm2, %v9157_v53, -inf }
 0xae5   : > { %4371 = vmax.xlane.f32.xlu0 %v4370_v2  ;;  %4368 = vmax.xlane.f32.xlu1 %v4367_v48 }
 0xae9   : > { %4374 = vmax.xlane.f32.xlu1 %v4373_v27 }
 0xb52   : > { %v4330_v51 = vpop.xlane.xlu0 %4329 }
 0xb53   : > { %v4376_v40 = vsub.f32 %v4208_v28, %v4330_v51 }
 0xb55   : > { %v4392_v34 = vmul.f32 1.442695, %v4376_v40 }
 0xb56   : > { %v4336_v45 = vpop.xlane.xlu0 %4335  ;;  %v4333_v43 = vpop.xlane.xlu1 %4332 }
 0xb57   : > { %7545 = vpow2.f32 %v4392_v34  ;;  %v4378_v8 = vsub.f32 %v7076_v60, %v4336_v45  ;;  %v4377_v63 = vsub.f32 %v4211_v20, %v4333_v43 }
 0xb59   : > { %v4396_v13 = vmul.f32 1.442695, %v4378_v8  ;;  %v4394_v46 = vmul.f32 1.442695, %v4377_v63 }
 0xb5a   : > { %v4339_v1 = vpop.xlane.xlu1 %4338  ;;  %v4342_v29 = vpop.xlane.xlu0 %4341 }
 0xb5b   : > { %7547 = vpow2.f32 %v4396_v13  ;;  %v4379_v7 = vsub.f32 %v7077_v44, %v4339_v1  ;;  %v4380_v12 = vsub.f32 %v4224_v42, %v4342_v29 }
 0xb5c   : > { %7549 = vpow2.f32 %v4394_v46 }
 0xb5d   : > { %v4398_v6 = vmul.f32 1.442695, %v4379_v7  ;;  %v4400_v4 = vmul.f32 1.442695, %v4380_v12 }
 0xb5e   : > { %v4348_v55 = vpop.xlane.xlu0 %4347  ;;  %v4345_v10 = vpop.xlane.xlu1 %4344 }
 0xb5f   : > { %7551 = vpow2.f32 %v4398_v6  ;;  %v4382_v28 = vsub.f32 %v7080_v15, %v4348_v55  ;;  %v4381_v38 = vsub.f32 %v4227_v56, %v4345_v10 }
 0xb60   : > { %7553 = vpow2.f32 %v4400_v4 }
 0xb61   : > { %v4404_v49 = vmul.f32 1.442695, %v4382_v28  ;;  %v4402_v30 = vmul.f32 1.442695, %v4381_v38 }
 0xb62   : > { %v4354_v60 = vpop.xlane.xlu0 %4353  ;;  %v4351_v20 = vpop.xlane.xlu1 %4350 }
 0xb63   : > { %7555 = vpow2.f32 %v4404_v49  ;;  %v4384_v9 = vsub.f32 %v4297_v35, %v4354_v60  ;;  %v4383_v41 = vsub.f32 %v9130_v21, %v4351_v20 }
 0xb64   : > { %v7546_v22 = vpop.eup %7545  ;;  %7557 = vpow2.f32 %v4402_v30 }
 0xb65   : > { %v4408_v44 = vmul.f32 1.442695, %v4384_v9  ;;  %v4406_v42 = vmul.f32 1.442695, %v4383_v41  ;;  %v4586_v24 = vsel %vm1227_vm2, %v7546_v22, 0.0 }
 0xb66   : > { %4587 = vadd.xlane.f32.xlu0 %v4586_v24  ;;  %v4360_v18 = vpop.xlane.xlu0 %4359  ;;  %v4357_v47 = vpop.xlane.xlu1 %4356 }
 0xb67   : > { %7559 = vpow2.f32 %v4408_v44  ;;  %v4386_v15 = vsub.f32 %v9134_v57, %v4360_v18  ;;  %v4385_v56 = vsub.f32 %v9141_v33, %v4357_v47 }
 0xb68   : > { %v7548_v14 = vpop.eup %7547  ;;  %7561 = vpow2.f32 %v4406_v42 }
 0xb69   : > { %v7550_v2 = vpop.eup %7549  ;;  %v4412_v35 = vmul.f32 1.442695, %v4386_v15  ;;  %v4410_v48 = vmul.f32 1.442695, %v4385_v56  ;;  %v4592_v21 = vsel %vm1227_vm2, %v7548_v14, 0.0 }
 0xb6a   : > { %4593 = vadd.xlane.f32.xlu0 %v4592_v21  ;;  %v4366_v27 = vpop.xlane.xlu0 %4365  ;;  %v4589_v51 = vsel %vm1227_vm2, %v7550_v2, 0.0  ;;  %v4363_v40 = vpop.xlane.xlu1 %4362  ;;  %v4424_v34 = vpack.c.bf16 %v7550_v2, %v7546_v22 }
 0xb6b   : > { %7563 = vpow2.f32 %v4412_v35  ;;  %v4388_v45 = vsub.f32 %v9149_v0, %v4366_v27  ;;  %4590 = vadd.xlane.f32.xlu1 %v4589_v51  ;;  %v4387_v57 = vsub.f32 %v9139_v61, %v4363_v40 }
 0xb6c   : > { %v7552_v33 = vpop.eup %7551  ;;  %7565 = vpow2.f32 %v4410_v48  ;;  %7106 = vmatprep.mubr.msk.bf16.mxu0 %vm1227_vm2, %v4424_v34 }
 0xb6d   : > { %v7554_v43 = vpop.eup %7553  ;;  %v4425_v8 = vpack.c.bf16 %v7552_v33, %v7548_v14  ;;  %v4416_v63 = vmul.f32 1.442695, %v4388_v45  ;;  %v4414_v13 = vmul.f32 1.442695, %v4387_v57  ;;  %v4595_v46 = vsel %vm1227_vm2, %v7552_v33, 0.0 }
 0xb6e   : > { %v4598_v1 = vsel %vm1227_vm2, %v7554_v43, 0.0  ;;  %v4372_v29 = vpop.xlane.xlu0 %4371  ;;  %v4369_v7 = vpop.xlane.xlu1 %4368  ;;  %v6224_v45 = vld [vmem:[%s8617_s12 + $0xc] sm:$0xf]  ;;  %s7699_s12 = sshll.u32 %s7775_s29, 4  ;;  %s7700_s12 = int_to_ptr.vmem [resolvable:$false] %s7699_s12 }
 0xb6f   : > { %7567 = vpow2.f32 %v4416_v63  ;;  %4599 = vadd.xlane.f32.xlu0 %v4598_v1  ;;  %v4390_v0 = vsub.f32 %v9147_v50, %v4372_v29  ;;  %4596 = vadd.xlane.f32.xlu1 %v4595_v46  ;;  %v4389_v61 = vsub.f32 %v9157_v53, %v4369_v7  ;;  %v4701_v57 = vsel %vm2503_vm3, %v6224_v45, 0 }
 0xb70   : > { %v7556_v12 = vpop.eup %7555  ;;  %7569 = vpow2.f32 %v4414_v13  ;;  %7107 = vmatmul.mubr.msk.bf16.vlgmr.msra.gmra.mxu0 %vm1227_vm2, %v4425_v8  ;;  %7259 = vmatprep.subr.msk.bf16.mxu0 %vm2503_vm3, %v6224_v45 }
 0xb71   : > { %v7558_v6 = vpop.eup %7557  ;;  %v4420_v4 = vmul.f32 1.442695, %v4390_v0  ;;  %v4418_v55 = vmul.f32 1.442695, %v4389_v61  ;;  %v4604_v10 = vsel %vm1227_vm2, %v7556_v12, 0.0  ;;  %7131 = vmatpush3.bf16.msra.mxu0 %v4701_v57 }
 0xb72   : > { %v4601_v28 = vsel %vm1227_vm2, %v7558_v6, 0.0  ;;  %v4375_v38 = vpop.xlane.xlu1 %4374  ;;  %v4426_v49 = vpack.c.bf16 %v7558_v6, %v7554_v43 }
 0xb73   : > { %7571 = vpow2.f32 %v4420_v4  ;;  %4605 = vadd.xlane.f32.xlu0 %v4604_v10  ;;  %4602 = vadd.xlane.f32.xlu1 %v4601_v28  ;;  %v4391_v50 = vsub.f32 %v9155_v3, %v4375_v38 }
 0xb74   : > { %v7560_v30 = vpop.eup %7559  ;;  %7573 = vpow2.f32 %v4418_v55  ;;  %7110 = vmatprep.mubr.msk.bf16.mxu0 %vm1227_vm2, %v4426_v49 }
 0xb75   : > { %v7562_v53 = vpop.eup %7561  ;;  %v4422_v60 = vmul.f32 1.442695, %v4391_v50  ;;  %v4610_v20 = vsel %vm1227_vm2, %v7560_v30, 0.0 }
 0xb76   : > { %v4607_v9 = vsel %vm1227_vm2, %v7562_v53, 0.0  ;;  %v4427_v41 = vpack.c.bf16 %v7562_v53, %v7556_v12 }
 0xb77   : > { %7575 = vpow2.f32 %v4422_v60  ;;  %4611 = vadd.xlane.f32.xlu0 %v4610_v20  ;;  %4608 = vadd.xlane.f32.xlu1 %v4607_v9 }
 0xb78   : > { %v7564_v22 = vpop.eup %7563  ;;  %7111 = vmatmul.mubr.msk.bf16.gmra.mxu0 %vm1227_vm2, %v4427_v41 }
 0xb79   : > { %v7566_v44 = vpop.eup %7565  ;;  %v4616_v3 = vsel %vm1227_vm2, %v7564_v22, 0.0 }
 0xb7a   : > { %v4613_v42 = vsel %vm1227_vm2, %v7566_v44, 0.0  ;;  %v4428_v24 = vpack.c.bf16 %v7566_v44, %v7560_v30 }
 0xb7b   : > { %4617 = vadd.xlane.f32.xlu0 %v4616_v3  ;;  %4614 = vadd.xlane.f32.xlu1 %v4613_v42 }
 0xb7c   : > { %v7568_v18 = vpop.eup %7567  ;;  %7122 = vmatprep.mubr.msk.bf16.mxu1 %vm1227_vm2, %v4428_v24 }
 0xb7d   : > { %v7570_v47 = vpop.eup %7569  ;;  %v4622_v15 = vsel %vm1227_vm2, %v7568_v18, 0.0 }
 0xb7e   : > { %v4429_v56 = vpack.c.bf16 %v7570_v47, %v7564_v22  ;;  %v4619_v14 = vsel %vm1227_vm2, %v7570_v47, 0.0 }
 0xb7f   : > { %4623 = vadd.xlane.f32.xlu0 %v4622_v15  ;;  %4620 = vadd.xlane.f32.xlu1 %v4619_v14 }
 0xb80   : > { %v7572_v2 = vpop.eup %7571  ;;  %7123 = vmatmul.mubr.msk.bf16.vlgmr.msra.gmra.mxu1 %vm1227_vm2, %v4429_v56 }
 0xb81   : > { %v7574_v35 = vpop.eup %7573  ;;  %v4628_v48 = vsel %vm1227_vm2, %v7572_v2, 0.0 }
 0xb82   : > { %v4625_v21 = vsel %vm1227_vm2, %v7574_v35, 0.0  ;;  %v4430_v27 = vpack.c.bf16 %v7574_v35, %v7568_v18 }
 0xb83   : > { %4629 = vadd.xlane.f32.xlu0 %v4628_v48  ;;  %4626 = vadd.xlane.f32.xlu1 %v4625_v21 }
 0xb84   : > { %v7576_v51 = vpop.eup %7575  ;;  %7126 = vmatprep.mubr.msk.bf16.mxu1 %vm1227_vm2, %v4430_v27 }
 0xb85   : > { %v4631_v40 = vsel %vm1227_vm2, %v7576_v51, 0.0  ;;  %v4431_v34 = vpack.c.bf16 %v7576_v51, %v7572_v2 }
 0xb87   : > { %4632 = vadd.xlane.f32.xlu1 %v4631_v40 }
 0xb88   : > { %7127 = vmatmul.mubr.msk.bf16.gmra.mxu1 %vm1227_vm2, %v4431_v34 }
 0xbef   : > { %v4588_v43 = vpop.xlane.xlu0 %4587 }
 0xbf0   : > { %7577 = vrcp.f32 %v4588_v43 }
 0xbf3   : > { %v4594_v63 = vpop.xlane.xlu0 %4593 }
 0xbf4   : > { %v4591_v33 = vpop.xlane.xlu1 %4590 }
 0xbf8   : > { %v4597_v8 = vpop.xlane.xlu1 %4596  ;;  %v4600_v46 = vpop.xlane.xlu0 %4599 }
 0xbf9   : > { %7579 = vrcp.f32 %v4597_v8 }
 0xbfa   : > { %7581 = vrcp.f32 %v4591_v33 }
 0xbfb   : > { %7583 = vrcp.f32 %v4594_v63 }
 0xbfc   : > { %v4603_v13 = vpop.xlane.xlu1 %4602  ;;  %v4606_v29 = vpop.xlane.xlu0 %4605  ;;  %7585 = vrcp.f32 %v4600_v46 }
 0xbfd   : > { %v7578_v55 = vpop.eup %7577 }
 0xc00   : > { %v4609_v1 = vpop.xlane.xlu1 %4608  ;;  %v4612_v0 = vpop.xlane.xlu0 %4611 }
 0xc01   : > { %7587 = vrcp.f32 %v4609_v1 }
 0xc02   : > { %7589 = vrcp.f32 %v4603_v13 }
 0xc03   : > { %7591 = vrcp.f32 %v4606_v29 }
 0xc04   : > { %v4615_v7 = vpop.xlane.xlu1 %4614  ;;  %v4618_v4 = vpop.xlane.xlu0 %4617  ;;  %7593 = vrcp.f32 %v4612_v0 }
 0xc06   : > { %v7580_v28 = vpop.eup %7579 }
 0xc07   : > { %v7582_v38 = vpop.eup %7581 }
 0xc08   : > { %v4621_v12 = vpop.xlane.xlu1 %4620  ;;  %v7584_v30 = vpop.eup %7583 }
 0xc09   : > { %7595 = vrcp.f32 %v4621_v12  ;;  %v4624_v22 = vpop.xlane.xlu0 %4623  ;;  %v7586_v24 = vpop.eup %7585 }
 0xc0a   : > { %7597 = vrcp.f32 %v4615_v7 }
 0xc0b   : > { %7599 = vrcp.f32 %v4618_v4 }
 0xc0c   : > { %v4627_v53 = vpop.xlane.xlu1 %4626  ;;  %7601 = vrcp.f32 %v4624_v22  ;;  %v9215_v22 = vld [vmem:[%s9212_s24] sm:$0x3f] }
 0xc0d   : > { %v4630_v48 = vpop.xlane.xlu0 %4629 }
 0xc0e   : > { %v7588_v47 = vpop.eup %7587 }
 0xc0f   : > { %v7590_v56 = vpop.eup %7589 }
 0xc10   : > { %v4633_v15 = vpop.xlane.xlu1 %4632  ;;  %v7592_v35 = vpop.eup %7591 }
 0xc11   : > { %7603 = vrcp.f32 %v4633_v15  ;;  %v7594_v33 = vpop.eup %7593  ;;  %v10019_v15 = vld [vmem:[#allocation28_spill] sm:$0xff] }
 0xc12   : > { %7605 = vrcp.f32 %v4627_v53 }
 0xc13   : > { %7607 = vrcp.f32 %v4630_v48 }
 0xc16   : > { %v7596_v8 = vpop.eup %7595 }
 0xc17   : > { %v7598_v63 = vpop.eup %7597 }
 0xc18   : > { %v7600_v1 = vpop.eup %7599 }
 0xc30   : > { %v7108_v61 = vpop.f32.mrf.mxu0 }
 0xc31   : > { %v4652_v9 = vmul.f32 %v7584_v30, %v7108_v61 }
 0xc32   : > { %v4478_v6 = vpop.f32.mrf.mxu0 }
 0xc33   : > { %v4650_v60 = vmul.f32 %v7578_v55, %v4478_v6  ;;  %v7602_v55 = vpop.eup %7601 }
 0xc34   : > { %v7109_v10 = vpop.f32.mrf.mxu0 }
 0xc35   : > { %v4653_v49 = vmul.f32 %v7580_v28, %v7109_v10  ;;  %v7604_v28 = vpop.eup %7603 }
 0xc36   : > { %v4481_v50 = vpop.f32.mrf.mxu0 }
 0xc37   : > { %v4651_v20 = vmul.f32 %v7582_v38, %v4481_v50  ;;  %v4667_v3 = vpack.c.bf16 %v4653_v49, %v4652_v9  ;;  %v7606_v38 = vpop.eup %7605 }
 0xc38   : > { %v7112_v41 = vpop.f32.mrf.mxu0  ;;  %v7608_v30 = vpop.eup %7607 }
 0xc39   : > { %v4666_v44 = vpack.c.bf16 %v4651_v20, %v4650_v60  ;;  %v4656_v51 = vmul.f32 %v7592_v35, %v7112_v41 }
 0xc3a   : > { %v4494_v42 = vpop.f32.mrf.mxu0 }
 0xc3b   : > { %7132 = vmatprep.mubr.msk.bf16.mxu0 %vm1048_vm1, %v4666_v44  ;;  %v4654_v21 = vmul.f32 %v7586_v24, %v4494_v42  ;;  %v10017_v42 = vld [vmem:[#allocation26_spill] sm:$0xff] }
 0xc3c   : > { %v7113_v18 = vpop.f32.mrf.mxu0  ;;  %7133 = vmatmul.mubr.msk.bf16.vlgmr.msra.gmra.mxu0 %vm1048_vm1, %v4667_v3  ;;  %v9220_v24 = vrot.slane %v9215_v22, %v10017_v42 }
 0xc3d   : > { %v4657_v14 = vmul.f32 %v7588_v47, %v7113_v18  ;;  %v10018_v47 = vld [vmem:[#allocation12_spill] sm:$0xff] }
 0xc3e   : > { %v4497_v2 = vpop.f32.mrf.mxu0 }
 0xc3f   : > { %v4655_v27 = vmul.f32 %v7590_v56, %v4497_v2  ;;  %v4669_v45 = vpack.c.bf16 %v4657_v14, %v4656_v51  ;;  %v2669_v56 = vadd.f32 %v10019_v15, %v10018_v47  ;;  %v7684_v15 = vld [vmem:[%s7896_s20 + $0x28] sm:$0xff] }
 0xc40   : > { %v7124_v40 = vpop.f32.mrf.mxu1 }
 0xc41   : > { %v4668_v34 = vpack.c.bf16 %v4655_v27, %v4654_v21  ;;  %v4660_v0 = vmul.f32 %v7600_v1, %v7124_v40  ;;  %v3757_v35 = vadd.f32 %v9039_v19, %v2669_v56  ;;  %v7678_v40 = vld [vmem:[%s7896_s20] sm:$0xff] }
 0xc42   : > { %v4555_v57 = vpop.f32.mrf.mxu1 }
 0xc43   : > { %7136 = vmatprep.mubr.msk.bf16.mxu0 %vm1048_vm1, %v4668_v34  ;;  %v4658_v29 = vmul.f32 %v7594_v33, %v4555_v57 }
 0xc44   : > { %v7125_v43 = vpop.f32.mrf.mxu1  ;;  %7137 = vmatmul.mubr.msk.bf16.gmra.mxu0 %vm1048_vm1, %v4669_v45 }
 0xc45   : > { %v4661_v13 = vmul.f32 %v7596_v8, %v7125_v43  ;;  %v7679_v43 = vld [vmem:[%s7896_s20 + $0x10] sm:$0xff] }
 0xc46   : > { %v4558_v46 = vpop.f32.mrf.mxu1 }
 0xc47   : > { %v4659_v7 = vmul.f32 %v7598_v63, %v4558_v46  ;;  %v4671_v6 = vpack.c.bf16 %v4661_v13, %v4660_v0  ;;  %v10021_v63 = vld [vmem:[#allocation31_spill] sm:$0xff] }
 0xc48   : > { %v7128_v61 = vpop.f32.mrf.mxu1 }
 0xc49   : > { %v4670_v12 = vpack.c.bf16 %v4659_v7, %v4658_v29  ;;  %v4664_v20 = vmul.f32 %v7608_v30, %v7128_v61  ;;  %v7680_v29 = vld [vmem:[%s7896_s20 + $0x8] sm:$0xff] }
 0xc4a   : > { %v4571_v4 = vpop.f32.mrf.mxu1 }
 0xc4b   : > { %7140 = vmatprep.mubr.msk.bf16.mxu0 %vm1048_vm1, %v4670_v12  ;;  %v4662_v53 = vmul.f32 %v7602_v55, %v4571_v4  ;;  %v7681_v12 = vld [vmem:[%s7896_s20 + $0x18] sm:$0xff] }
 0xc4c   : > { %v7129_v10 = vpop.f32.mrf.mxu1  ;;  %7141 = vmatmul.mubr.msk.bf16.gmra.mxu0 %vm1048_vm1, %v4671_v6 }
 0xc4d   : > { %v4665_v49 = vmul.f32 %v7604_v28, %v7129_v10 }
 0xc4e   : > { %v4574_v50 = vpop.f32.mrf.mxu1 }
 0xc4f   : > { %v4663_v60 = vmul.f32 %v7606_v38, %v4574_v50  ;;  %v4673_v41 = vpack.c.bf16 %v4665_v49, %v4664_v20  ;;  %v7682_v38 = vld [vmem:[%s7896_s20 + $0x20] sm:$0xff] }
 0xc51   : > { %v4672_v9 = vpack.c.bf16 %v4663_v60, %v4662_v53  ;;  %v7683_v53 = vld [vmem:[%s7896_s20 + $0x30] sm:$0xff] }
 0xc53   : > { %7144 = vmatprep.mubr.msk.bf16.mxu0 %vm1048_vm1, %v4672_v9 }
 0xc54   : > { %7145 = vmatmul.mubr.msk.bf16.gmra.mxu0 %vm1048_vm1, %v4673_v41 }
 0xcfc   : > { %v7134_v44 = vpop.f32.mrf.mxu0 }
 0xcfd   : > { %v4802_v3 = vadd.f32 %v7134_v44, %v9031_v54  ;;  %v10022_v44 = vld [vmem:[#allocation9_spill] sm:$0xff] }
 0xcfe   : > { %v4737_v18 = vpop.f32.mrf.mxu0 }
 0xcff   : > { %v4800_v14 = vadd.f32 %v4737_v18, %v9035_v16  ;;  %v4822_v48 = vadd.f32 %v9220_v24, %v4802_v3  ;;  %v10023_v3 = vld [vmem:[#allocation16_spill] sm:$0xff] }
 0xd00   : > { %v7135_v2 = vpop.f32.mrf.mxu0  ;;  %v2701_v42 = vadd.f32 %v10023_v3, %v10022_v44  ;;  %v7692_v44 = vld [vmem:[%s7896_s20 + $0x68] sm:$0xff] }
 0xd01   : > { %v4820_v21 = vadd.f32 %v9220_v24, %v4800_v14  ;;  %v4803_v54 = vadd.f32 %v7135_v2, %v9037_v17  ;;  %v9238_v8 = vadd.f32 %v7679_v43, %v4822_v48  ;;  %v10020_v17 = vld [vmem:[#allocation14_spill] sm:$0xff] }
 0xd02   : > { %v4740_v27 = vpop.f32.mrf.mxu0  ;;  %v2685_v13 = vadd.f32 %v10021_v63, %v10020_v17  ;;  %v3765_v14 = vadd.f32 %v9067_v39, %v2701_v42 }
 0xd03   : > { %v4801_v51 = vadd.f32 %v4740_v27, %v3757_v35  ;;  %v9230_v34 = vadd.f32 %v7678_v40, %v4820_v21  ;;  %v4823_v45 = vadd.f32 %v9220_v24, %v4803_v54  ;;  %v7685_v54 = vld [vmem:[%s7896_s20 + $0x38] sm:$0xff]  ;;  %v7686_v40 = vld [vmem:[%s7896_s20 + $0x40] sm:$0xff] }
 0xd04   : > { %v7138_v57 = vpop.f32.mrf.mxu0  ;;  %v3761_v0 = vadd.f32 %v9053_v36, %v2685_v13  ;;  %v10024_v13 = vld [vmem:[#allocation34_spill] sm:$0xff] }
 0xd05   : > { %v4821_v16 = vadd.f32 %v9220_v24, %v4801_v51  ;;  %v4806_v19 = vadd.f32 %v7138_v57, %v9045_v11  ;;  %v4852_v33 = vsel %vm652_vm0, %v9230_v34, 0.0  ;;  %v9249_v6 = vadd.f32 %v7681_v12, %v4823_v45 }
 0xd06   : > { %4853 = vadd.xlane.f32.xlu0 %v4852_v33  ;;  %v4753_v46 = vpop.f32.mrf.mxu0 }
 0xd07   : > { %v4804_v1 = vadd.f32 %v4753_v46, %v9049_v52  ;;  %v9244_v7 = vadd.f32 %v7680_v29, %v4821_v16  ;;  %v4826_v11 = vadd.f32 %v9220_v24, %v4806_v19  ;;  %v4858_v52 = vsel %vm652_vm0, %v9238_v8, 0.0  ;;  %v7687_v19 = vld [vmem:[%s7896_s20 + $0x50] sm:$0xff] }
 0xd08   : > { %v7139_v61 = vpop.f32.mrf.mxu0  ;;  %v4861_v30 = vsel %vm652_vm0, %v9249_v6, 0.0  ;;  %v10025_v46 = vld [vmem:[#allocation23_spill] sm:$0xff] }
 0xd09   : > { %v4824_v4 = vadd.f32 %v9220_v24, %v4804_v1  ;;  %v4807_v55 = vadd.f32 %v7139_v61, %v9051_v31  ;;  %v4855_v10 = vsel %vm652_vm0, %v9244_v7, 0.0  ;;  %v9263_v31 = vadd.f32 %v7683_v53, %v4826_v11  ;;  %v7688_v11 = vld [vmem:[%s7896_s20 + $0x48] sm:$0xff] }
 0xd0a   : > { %4859 = vadd.xlane.f32.xlu0 %v4858_v52  ;;  %4856 = vadd.xlane.f32.xlu1 %v4855_v10  ;;  %v4756_v36 = vpop.f32.mrf.mxu0  ;;  %v2717_v1 = vadd.f32 %v10025_v46, %v10024_v13 }
 0xd0b   : > { %v4805_v28 = vadd.f32 %v4756_v36, %v3761_v0  ;;  %v9258_v49 = vadd.f32 %v7682_v38, %v4824_v4  ;;  %v4827_v60 = vadd.f32 %v9220_v24, %v4807_v55  ;;  %v4870_v35 = vsel %vm652_vm0, %v9263_v31, 0.0  ;;  %v7689_v55 = vld [vmem:[%s7896_s20 + $0x58] sm:$0xff] }
 0xd0c   : > { %v7142_v50 = vpop.f32.mrf.mxu0 }
 0xd0d   : > { %v4825_v20 = vadd.f32 %v9220_v24, %v4805_v28  ;;  %v4810_v9 = vadd.f32 %v7142_v50, %v9059_v32  ;;  %v4864_v41 = vsel %vm652_vm0, %v9258_v49, 0.0  ;;  %v9285_v27 = vadd.f32 %v7685_v54, %v4827_v60  ;;  %v7690_v50 = vld [vmem:[%s7896_s20 + $0x60] sm:$0xff] }
 0xd0e   : > { %4862 = vadd.xlane.f32.xlu1 %v4861_v30  ;;  %4865 = vadd.xlane.f32.xlu0 %v4864_v41  ;;  %v4769_v18 = vpop.f32.mrf.mxu0 }
 0xd0f   : > { %v4808_v47 = vadd.f32 %v4769_v18, %v9063_v62  ;;  %v9274_v56 = vadd.f32 %v7684_v15, %v4825_v20  ;;  %v4830_v32 = vadd.f32 %v9220_v24, %v4810_v9  ;;  %v4873_v17 = vsel %vm652_vm0, %v9285_v27, 0.0  ;;  %v7691_v9 = vld [vmem:[%s7896_s20 + $0x70] sm:$0xff] }
 0xd10   : > { %v7143_v2 = vpop.f32.mrf.mxu0 }
 0xd11   : > { %v4828_v48 = vadd.f32 %v9220_v24, %v4808_v47  ;;  %v4811_v21 = vadd.f32 %v7143_v2, %v9065_v37  ;;  %v4867_v62 = vsel %vm652_vm0, %v9274_v56, 0.0  ;;  %v9292_v37 = vadd.f32 %v7687_v19, %v4830_v32  ;;  %v7693_v47 = vld [vmem:[%s7896_s20 + $0x78] sm:$0xff]  ;;  %s6253_s20 = sshll.u32 %s7763_s16, 5 }
 0xd12   : > { %4871 = vadd.xlane.f32.xlu0 %v4870_v35  ;;  %4868 = vadd.xlane.f32.xlu1 %v4867_v62  ;;  %v4772_v39 = vpop.f32.mrf.mxu0  ;;  %s9825_s30 = scalar_lea.hbm %s9881_s10, %s6253_s20 }
 0xd13   : > { %v4809_v51 = vadd.f32 %v4772_v39, %v3765_v14  ;;  %v9288_v45 = vadd.f32 %v7686_v40, %v4828_v48  ;;  %v4831_v57 = vadd.f32 %v9220_v24, %v4811_v21  ;;  %v4882_v4 = vsel %vm652_vm0, %v9292_v37, 0.0 }
 0xd14   : > { %v7146_v16 = vpop.f32.mrf.mxu0 }
 0xd15   : > { %v4829_v33 = vadd.f32 %v9220_v24, %v4809_v51  ;;  %v4814_v43 = vadd.f32 %v7146_v16, %v9073_v59  ;;  %v4876_v63 = vsel %vm652_vm0, %v9288_v45, 0.0  ;;  %v3769_v59 = vadd.f32 %v9081_v5, %v2717_v1 }
 0xd16   : > { %4874 = vadd.xlane.f32.xlu1 %v4873_v17  ;;  %4877 = vadd.xlane.f32.xlu0 %v4876_v63  ;;  %v4785_v29 = vpop.f32.mrf.mxu0  ;;  %v9310_v52 = vadd.f32 %v7689_v55, %v4831_v57 }
 0xd17   : > { %v4812_v0 = vadd.f32 %v4785_v29, %v9077_v25  ;;  %v9304_v61 = vadd.f32 %v7688_v11, %v4829_v33  ;;  %v4834_v10 = vadd.f32 %v9220_v24, %v4814_v43 }
 0xd18   : > { %v7147_v12 = vpop.f32.mrf.mxu0  ;;  %v4885_v53 = vsel %vm652_vm0, %v9310_v52, 0.0 }
 0xd19   : > { %v4832_v36 = vadd.f32 %v9220_v24, %v4812_v0  ;;  %v4815_v25 = vadd.f32 %v7147_v12, %v9079_v58  ;;  %v4879_v28 = vsel %vm652_vm0, %v9304_v61, 0.0  ;;  %v9327_v41 = vadd.f32 %v7691_v9, %v4834_v10 }
 0xd1a   : > { %4883 = vadd.xlane.f32.xlu0 %v4882_v4  ;;  %4880 = vadd.xlane.f32.xlu1 %v4879_v28  ;;  %v4788_v5 = vpop.f32.mrf.mxu0 }
 0xd1b   : > { %v4813_v38 = vadd.f32 %v4788_v5, %v3769_v59  ;;  %v9318_v30 = vadd.f32 %v7690_v50, %v4832_v36  ;;  %v4835_v60 = vadd.f32 %v9220_v24, %v4815_v25  ;;  %v4894_v42 = vsel %vm652_vm0, %v9327_v41, 0.0 }
 0xd1d   : > { %v4833_v20 = vadd.f32 %v9220_v24, %v4813_v38  ;;  %v4888_v58 = vsel %vm652_vm0, %v9318_v30, 0.0  ;;  %v9337_v15 = vadd.f32 %v7693_v47, %v4835_v60 }
 0xd1e   : > { %4886 = vadd.xlane.f32.xlu1 %v4885_v53  ;;  %4889 = vadd.xlane.f32.xlu0 %v4888_v58 }
 0xd1f   : > { %v9330_v3 = vadd.f32 %v7692_v44, %v4833_v20  ;;  %v4897_v24 = vsel %vm652_vm0, %v9337_v15, 0.0 }
 0xd21   : > { %v4891_v18 = vsel %vm652_vm0, %v9330_v3, 0.0 }
 0xd22   : > { %4895 = vadd.xlane.f32.xlu0 %v4894_v42  ;;  %4892 = vadd.xlane.f32.xlu1 %v4891_v18 }
 0xd26   : > { %4898 = vadd.xlane.f32.xlu1 %v4897_v24 }
 0xd8f   : > { %v4854_v14 = vpop.xlane.xlu0 %4853 }
 0xd90   : > { %v4901_v32 = vmul.f32 0.03125, %v4854_v14 }
 0xd92   : > { %v9342_v2 = vsub.f32 %v9230_v34, %v4901_v32 }
 0xd93   : > { %v4860_v35 = vpop.xlane.xlu0 %4859  ;;  %v4857_v48 = vpop.xlane.xlu1 %4856 }
 0xd94   : > { %v4903_v21 = vmul.f32 0.03125, %v4860_v35  ;;  %v4902_v62 = vmul.f32 0.03125, %v4857_v48  ;;  %v4933_v54 = vmul.f32 %v9342_v2, %v9342_v2 }
 0xd96   : > { %v9347_v39 = vsub.f32 %v9238_v8, %v4903_v21  ;;  %v9350_v51 = vsub.f32 %v9244_v7, %v4902_v62  ;;  %v4949_v40 = vsel %vm652_vm0, %v4933_v54, 0.0 }
 0xd97   : > { %v4866_v57 = vpop.xlane.xlu0 %4865  ;;  %4950 = vadd.xlane.f32.xlu0 %v4949_v40  ;;  %v4863_v16 = vpop.xlane.xlu1 %4862 }
 0xd98   : > { %v4905_v34 = vmul.f32 0.03125, %v4866_v57  ;;  %v4904_v19 = vmul.f32 0.03125, %v4863_v16  ;;  %v4935_v33 = vmul.f32 %v9347_v39, %v9347_v39  ;;  %v4934_v43 = vmul.f32 %v9350_v51, %v9350_v51 }
 0xd9a   : > { %v9358_v17 = vsub.f32 %v9258_v49, %v4905_v34  ;;  %v9361_v8 = vsub.f32 %v9249_v6, %v4904_v19  ;;  %v4955_v7 = vsel %vm652_vm0, %v4935_v33, 0.0  ;;  %v4952_v63 = vsel %vm652_vm0, %v4934_v43, 0.0 }
 0xd9b   : > { %v4872_v13 = vpop.xlane.xlu0 %4871  ;;  %4956 = vadd.xlane.f32.xlu0 %v4955_v7  ;;  %v4869_v46 = vpop.xlane.xlu1 %4868  ;;  %4953 = vadd.xlane.f32.xlu1 %v4952_v63 }
 0xd9c   : > { %v4907_v1 = vmul.f32 0.03125, %v4872_v13  ;;  %v4906_v29 = vmul.f32 0.03125, %v4869_v46  ;;  %v4937_v0 = vmul.f32 %v9358_v17, %v9358_v17  ;;  %v4936_v49 = vmul.f32 %v9361_v8, %v9361_v8 }
 0xd9e   : > { %v9370_v11 = vsub.f32 %v9263_v31, %v4907_v1  ;;  %v9373_v6 = vsub.f32 %v9274_v56, %v4906_v29  ;;  %v4961_v59 = vsel %vm652_vm0, %v4937_v0, 0.0  ;;  %v4958_v12 = vsel %vm652_vm0, %v4936_v49, 0.0  ;;  %v7343_v0 = vld [vmem:[%s555_s17 + $0x8] sm:$0xff]   ;;  %v7345_v49 = vld [vmem:[%s9446_s11 + $0x38] sm:$0xff]  }
 0xd9f   : > { %v4878_v4 = vpop.xlane.xlu0 %4877  ;;  %4962 = vadd.xlane.f32.xlu0 %v4961_v59  ;;  %v4875_v55 = vpop.xlane.xlu1 %4874  ;;  %4959 = vadd.xlane.f32.xlu1 %v4958_v12  ;;  %v7346_v59 = vld [vmem:[%s9446_s11 + $0x30] sm:$0xff]   ;;  %v7347_v12 = vld [vmem:[%s9446_s11 + $0x28] sm:$0xff]  }
 0xda0   : > { %v4909_v10 = vmul.f32 0.03125, %v4878_v4  ;;  %v4908_v36 = vmul.f32 0.03125, %v4875_v55  ;;  %v4939_v25 = vmul.f32 %v9370_v11, %v9370_v11  ;;  %v4938_v31 = vmul.f32 %v9373_v6, %v9373_v6  ;;  %7148 = vmatprep.subr.bf16.mxu1 %v7343_v0  ;;  %7168 = vmatprep.subr.bf16.mxu0 %v7345_v49  ;;  %v7348_v4 = vld [vmem:[%s9446_s11 + $0x20] sm:$0xff]   ;;  %v7349_v55 = vld [vmem:[%s9446_s11 + $0x18] sm:$0xff]  }
 0xda1   : > { %7149 = vmatpush3.bf16.msra.mxu1 %v7343_v0  ;;  %7169 = vmatpush3.bf16.msra.mxu0 %v7345_v49  ;;  %v10027_v49 = vld [vmem:[#allocation24_spill] sm:$0xff] }
 0xda2   : > { %v9382_v28 = vsub.f32 %v9288_v45, %v4909_v10  ;;  %v9385_v56 = vsub.f32 %v9285_v27, %v4908_v36  ;;  %v4967_v5 = vsel %vm652_vm0, %v4939_v25, 0.0  ;;  %v4964_v38 = vsel %vm652_vm0, %v4938_v31, 0.0  ;;  %7170 = vmatprep.subr.bf16.mxu0 %v7346_v59 }
 0xda3   : > { %v4884_v50 = vpop.xlane.xlu0 %4883  ;;  %4968 = vadd.xlane.f32.xlu0 %v4967_v5  ;;  %v4881_v53 = vpop.xlane.xlu1 %4880  ;;  %4965 = vadd.xlane.f32.xlu1 %v4964_v38 }
 0xda4   : > { %v4911_v60 = vmul.f32 0.03125, %v4884_v50  ;;  %v4910_v20 = vmul.f32 0.03125, %v4881_v53  ;;  %v4941_v58 = vmul.f32 %v9382_v28, %v9382_v28  ;;  %v4940_v45 = vmul.f32 %v9385_v56, %v9385_v56 }
 0xda5   : > { %7171 = vmatpush3.bf16.msra.mxu0 %v7346_v59  ;;  %v9461_v59 = vrot.slane %v9215_v22, %v10027_v49 }
 0xda6   : > { %v9394_v9 = vsub.f32 %v9292_v37, %v4911_v60  ;;  %v9397_v27 = vsub.f32 %v9304_v61, %v4910_v20  ;;  %v4973_v44 = vsel %vm652_vm0, %v4941_v58, 0.0  ;;  %v4970_v42 = vsel %vm652_vm0, %v4940_v45, 0.0  ;;  %7172 = vmatprep.subr.bf16.mxu0 %v7347_v12 }
 0xda7   : > { %4974 = vadd.xlane.f32.xlu0 %v4973_v44  ;;  %v4890_v18 = vpop.xlane.xlu0 %4889  ;;  %v4887_v47 = vpop.xlane.xlu1 %4886  ;;  %4971 = vadd.xlane.f32.xlu1 %v4970_v42 }
 0xda8   : > { %v4913_v24 = vmul.f32 0.03125, %v4890_v18  ;;  %v4912_v14 = vmul.f32 0.03125, %v4887_v47  ;;  %v4943_v32 = vmul.f32 %v9394_v9, %v9394_v9  ;;  %v4942_v37 = vmul.f32 %v9397_v27, %v9397_v27 }
 0xda9   : > { %7173 = vmatpush3.bf16.msra.mxu0 %v7347_v12 }
 0xdaa   : > { %v9406_v35 = vsub.f32 %v9318_v30, %v4913_v24  ;;  %v9409_v61 = vsub.f32 %v9310_v52, %v4912_v14  ;;  %v4979_v48 = vsel %vm652_vm0, %v4943_v32, 0.0  ;;  %v4976_v21 = vsel %vm652_vm0, %v4942_v37, 0.0  ;;  %7174 = vmatprep.subr.bf16.mxu0 %v7348_v4 }
 0xdab   : > { %4980 = vadd.xlane.f32.xlu0 %v4979_v48  ;;  %v4896_v62 = vpop.xlane.xlu0 %4895  ;;  %4977 = vadd.xlane.f32.xlu1 %v4976_v21  ;;  %v4893_v54 = vpop.xlane.xlu1 %4892 }
 0xdac   : > { %v4915_v40 = vmul.f32 0.03125, %v4896_v62  ;;  %v4914_v57 = vmul.f32 0.03125, %v4893_v54  ;;  %v4945_v16 = vmul.f32 %v9406_v35, %v9406_v35  ;;  %v4944_v30 = vmul.f32 %v9409_v61, %v9409_v61 }
 0xdad   : > { %7175 = vmatpush3.bf16.msra.mxu0 %v7348_v4 }
 0xdae   : > { %v9418_v34 = vsub.f32 %v9327_v41, %v4915_v40  ;;  %v9421_v52 = vsub.f32 %v9330_v3, %v4914_v57  ;;  %v4985_v19 = vsel %vm652_vm0, %v4945_v16, 0.0  ;;  %v4982_v33 = vsel %vm652_vm0, %v4944_v30, 0.0  ;;  %7176 = vmatprep.subr.bf16.mxu0 %v7349_v55 }
 0xdaf   : > { %4986 = vadd.xlane.f32.xlu0 %v4985_v19  ;;  %4983 = vadd.xlane.f32.xlu1 %v4982_v33  ;;  %v4899_v43 = vpop.xlane.xlu1 %4898  ;;  %v10026_v19 = vld [vmem:[#allocation27_spill] sm:$0xff] }
 0xdb0   : > { %v4916_v7 = vmul.f32 0.03125, %v4899_v43  ;;  %v4947_v63 = vmul.f32 %v9418_v34, %v9418_v34  ;;  %v4946_v13 = vmul.f32 %v9421_v52, %v9421_v52  ;;  %v9455_v33 = vrot.slane %v9215_v22, %v10026_v19 }
 0xdb1   : > { %7177 = vmatpush3.bf16.msra.mxu0 %v7349_v55 }
 0xdb2   : > { %v9430_v41 = vsub.f32 %v9337_v15, %v4916_v7  ;;  %v4991_v3 = vsel %vm652_vm0, %v4947_v63, 0.0  ;;  %v4988_v46 = vsel %vm652_vm0, %v4946_v13, 0.0  ;;  %v7344_v15 = vld [vmem:[%s555_s17] sm:$0xff]  }
 0xdb3   : > { %4992 = vadd.xlane.f32.xlu0 %v4991_v3  ;;  %4989 = vadd.xlane.f32.xlu1 %v4988_v46 }
 0xdb4   : > { %v4948_v1 = vmul.f32 %v9430_v41, %v9430_v41  ;;  %7150 = vmatprep.subr.bf16.mxu1 %v7344_v15 }
 0xdb5   : > { %7151 = vmatpush3.bf16.msra.mxu1 %v7344_v15 }
 0xdb6   : > { %v4994_v29 = vsel %vm652_vm0, %v4948_v1, 0.0 }
 0xdb7   : > { %4995 = vadd.xlane.f32.xlu1 %v4994_v29 }
 0xe20   : > { %v4951_v10 = vpop.xlane.xlu0 %4950 }
 0xe21   : > { %v4997_v36 = vmul.f32 0.03125, %v4951_v10 }
 0xe23   : > { %v5013_v25 = vadd.f32 1e-05, %v4997_v36 }
 0xe24   : > { %v4957_v31 = vpop.xlane.xlu0 %4956  ;;  %v4954_v5 = vpop.xlane.xlu1 %4953 }
 0xe25   : > { %7609 = vrsqrt.f32 %v5013_v25  ;;  %v4999_v38 = vmul.f32 0.03125, %v4957_v31  ;;  %v4998_v50 = vmul.f32 0.03125, %v4954_v5 }
 0xe27   : > { %v5015_v53 = vadd.f32 1e-05, %v4999_v38  ;;  %v5014_v60 = vadd.f32 1e-05, %v4998_v50 }
 0xe28   : > { %v4963_v20 = vpop.xlane.xlu0 %4962  ;;  %v4960_v58 = vpop.xlane.xlu1 %4959 }
 0xe29   : > { %7611 = vrsqrt.f32 %v5015_v53  ;;  %v5001_v45 = vmul.f32 0.03125, %v4963_v20  ;;  %v5000_v44 = vmul.f32 0.03125, %v4960_v58 }
 0xe2a   : > { %7613 = vrsqrt.f32 %v5014_v60 }
 0xe2b   : > { %v5017_v42 = vadd.f32 1e-05, %v5001_v45  ;;  %v5016_v18 = vadd.f32 1e-05, %v5000_v44 }
 0xe2c   : > { %v4969_v47 = vpop.xlane.xlu0 %4968  ;;  %v4966_v24 = vpop.xlane.xlu1 %4965 }
 0xe2d   : > { %7615 = vrsqrt.f32 %v5017_v42  ;;  %v5003_v14 = vmul.f32 0.03125, %v4969_v47  ;;  %v5002_v32 = vmul.f32 0.03125, %v4966_v24 }
 0xe2e   : > { %7617 = vrsqrt.f32 %v5016_v18 }
 0xe2f   : > { %v5019_v37 = vadd.f32 1e-05, %v5003_v14  ;;  %v5018_v48 = vadd.f32 1e-05, %v5002_v32 }
 0xe30   : > { %v4975_v21 = vpop.xlane.xlu0 %4974  ;;  %v4972_v62 = vpop.xlane.xlu1 %4971 }
 0xe31   : > { %7619 = vrsqrt.f32 %v5019_v37  ;;  %v5005_v54 = vmul.f32 0.03125, %v4975_v21  ;;  %v5004_v40 = vmul.f32 0.03125, %v4972_v62 }
 0xe32   : > { %v7610_v57 = vpop.eup %7609  ;;  %7621 = vrsqrt.f32 %v5018_v48 }
 0xe33   : > { %v5021_v16 = vadd.f32 1e-05, %v5005_v54  ;;  %v5020_v30 = vadd.f32 1e-05, %v5004_v40  ;;  %v5045_v63 = vmul.f32 %v7610_v57, %v9342_v2 }
 0xe34   : > { %v4981_v43 = vpop.xlane.xlu0 %4980  ;;  %v4978_v7 = vpop.xlane.xlu1 %4977 }
 0xe35   : > { %7623 = vrsqrt.f32 %v5021_v16  ;;  %v5007_v13 = vmul.f32 0.03125, %v4981_v43  ;;  %v5006_v3 = vmul.f32 0.03125, %v4978_v7  ;;  %v5065_v2 = vmul.f32 %v9455_v33, %v5045_v63 }
 0xe36   : > { %v7612_v46 = vpop.eup %7611  ;;  %7625 = vrsqrt.f32 %v5020_v30 }
 0xe37   : > { %v7614_v1 = vpop.eup %7613  ;;  %v5047_v29 = vmul.f32 %v7612_v46, %v9347_v39  ;;  %v5023_v0 = vadd.f32 1e-05, %v5007_v13  ;;  %v5022_v15 = vadd.f32 1e-05, %v5006_v3 }
 0xe38   : > { %v4987_v12 = vpop.xlane.xlu0 %4986  ;;  %v4984_v4 = vpop.xlane.xlu1 %4983  ;;  %v5046_v55 = vmul.f32 %v7614_v1, %v9350_v51  ;;  %v9469_v51 = vadd.f32 %v9461_v59, %v5065_v2 }
 0xe39   : > { %7627 = vrsqrt.f32 %v5023_v0  ;;  %v5009_v10 = vmul.f32 0.03125, %v4987_v12  ;;  %v5008_v36 = vmul.f32 0.03125, %v4984_v4  ;;  %v5067_v5 = vmul.f32 %v9455_v33, %v5047_v29 }
 0xe3a   : > { %v7616_v25 = vpop.eup %7615  ;;  %7629 = vrsqrt.f32 %v5022_v15  ;;  %v5066_v31 = vmul.f32 %v9455_v33, %v5046_v55 }
 0xe3b   : > { %v7618_v39 = vpop.eup %7617  ;;  %v5025_v38 = vadd.f32 1e-05, %v5009_v10  ;;  %v5024_v50 = vadd.f32 1e-05, %v5008_v36  ;;  %v5049_v45 = vmul.f32 %v7616_v25, %v9358_v17  ;;  %v9479_v14 = vadd.f32 %v9461_v59, %v5067_v5 }
 0xe3c   : > { %v5048_v53 = vmul.f32 %v7618_v39, %v9361_v8  ;;  %v4993_v60 = vpop.xlane.xlu0 %4992  ;;  %v4990_v20 = vpop.xlane.xlu1 %4989  ;;  %v9472_v58 = vadd.f32 %v9461_v59, %v5066_v31 }
 0xe3d   : > { %7631 = vrsqrt.f32 %v5025_v38  ;;  %v5011_v44 = vmul.f32 0.03125, %v4993_v60  ;;  %v5010_v42 = vmul.f32 0.03125, %v4990_v20  ;;  %v5069_v54 = vmul.f32 %v9455_v33, %v5049_v45 }
 0xe3e   : > { %v7620_v18 = vpop.eup %7619  ;;  %v5068_v47 = vmul.f32 %v9455_v33, %v5048_v53  ;;  %7633 = vrsqrt.f32 %v5024_v50  ;;  %v5101_v8 = vpack.c.bf16 %v9472_v58, %v9469_v51 }
 0xe3f   : > { %v7622_v24 = vpop.eup %7621  ;;  %v5027_v32 = vadd.f32 1e-05, %v5011_v44  ;;  %v5026_v37 = vadd.f32 1e-05, %v5010_v42  ;;  %v5051_v17 = vmul.f32 %v7620_v18, %v9370_v11 }
 0xe40   : > { %v9482_v48 = vadd.f32 %v9461_v59, %v5068_v47  ;;  %7152 = vmatprep.mubr.msk.bf16.mxu1 %vm652_vm0, %v5101_v8  ;;  %v4996_v21 = vpop.xlane.xlu1 %4995  ;;  %v5050_v62 = vmul.f32 %v7622_v24, %v9373_v6  ;;  %v9495_v6 = vadd.f32 %v9461_v59, %v5069_v54 }
 0xe41   : > { %7635 = vrsqrt.f32 %v5027_v32  ;;  %v5012_v40 = vmul.f32 0.03125, %v4996_v21  ;;  %v5071_v13 = vmul.f32 %v9455_v33, %v5051_v17  ;;  %v7352_v17 = vld [vmem:[%s9446_s11] sm:$0xff]  }
 0xe42   : > { %v7624_v57 = vpop.eup %7623  ;;  %v5102_v16 = vpack.c.bf16 %v9482_v48, %v9479_v14  ;;  %7637 = vrsqrt.f32 %v5026_v37  ;;  %v5070_v30 = vmul.f32 %v9455_v33, %v5050_v62  ;;  %v7350_v37 = vld [vmem:[%s9446_s11 + $0x10] sm:$0xff]   ;;  %v6233_v62 = vld [vmem:[%s558_s21] ss:$0 sm:$0xff]  ;;  %s7701_s21 = scalar_lea.vmem %s7700_s12, 64 }
 0xe43   : > { %v7626_v19 = vpop.eup %7625  ;;  %v5028_v43 = vadd.f32 1e-05, %v5012_v40  ;;  %v5053_v11 = vmul.f32 %v7624_v57, %v9382_v28  ;;  %v9508_v0 = vadd.f32 %v9461_v59, %v5071_v13  ;;  %7178 = vmatprep.subr.bf16.mxu0 %v7350_v37 }
 0xe44   : > { %v5052_v7 = vmul.f32 %v7626_v19, %v9385_v56  ;;  %7153 = vmatmul.mubr.msk.bf16.vlgmr.msra.gmra.mxu1 %vm652_vm0, %v5102_v16  ;;  %v9498_v63 = vadd.f32 %v9461_v59, %v5070_v30  ;;  %7179 = vmatpush3.bf16.msra.mxu0 %v7350_v37 }
 0xe45   : > { %7639 = vrsqrt.f32 %v5028_v43  ;;  %v5073_v56 = vmul.f32 %v9455_v33, %v5053_v11 }
 0xe46   : > { %v7628_v3 = vpop.eup %7627  ;;  %v5103_v46 = vpack.c.bf16 %v9498_v63, %v9495_v6  ;;  %v5072_v1 = vmul.f32 %v9455_v33, %v5052_v7 }
 0xe47   : > { %v7630_v28 = vpop.eup %7629  ;;  %v5055_v29 = vmul.f32 %v7628_v3, %v9394_v9  ;;  %v9518_v10 = vadd.f32 %v9461_v59, %v5073_v56 }
 0xe48   : > { %7156 = vmatprep.mubr.msk.bf16.mxu1 %vm652_vm0, %v5103_v46  ;;  %v9511_v15 = vadd.f32 %v9461_v59, %v5072_v1  ;;  %v5054_v49 = vmul.f32 %v7630_v28, %v9397_v27 }
 0xe49   : > { %v5075_v25 = vmul.f32 %v9455_v33, %v5055_v29 }
 0xe4a   : > { %v7632_v12 = vpop.eup %7631  ;;  %v5104_v4 = vpack.c.bf16 %v9511_v15, %v9508_v0  ;;  %v5074_v55 = vmul.f32 %v9455_v33, %v5054_v49 }
 0xe4b   : > { %v7634_v2 = vpop.eup %7633  ;;  %v5057_v27 = vmul.f32 %v7632_v12, %v9406_v35 }
 0xe4c   : > { %v5056_v9 = vmul.f32 %v7634_v2, %v9409_v61  ;;  %7157 = vmatmul.mubr.msk.bf16.gmra.mxu1 %vm652_vm0, %v5104_v4  ;;  %v9523_v36 = vadd.f32 %v9461_v59, %v5074_v55  ;;  %v9533_v61 = vadd.f32 %v9461_v59, %v5075_v25 }
 0xe4d   : > { %v5077_v35 = vmul.f32 %v9455_v33, %v5057_v27 }
 0xe4e   : > { %v7636_v31 = vpop.eup %7635  ;;  %v5105_v39 = vpack.c.bf16 %v9523_v36, %v9518_v10  ;;  %v5076_v5 = vmul.f32 %v9455_v33, %v5056_v9 }
 0xe4f   : > { %v7638_v38 = vpop.eup %7637  ;;  %v5059_v50 = vmul.f32 %v7636_v31, %v9418_v34  ;;  %v9547_v18 = vadd.f32 %v9461_v59, %v5077_v35 }
 0xe50   : > { %7160 = vmatprep.mubr.msk.bf16.mxu1 %vm652_vm0, %v5105_v39  ;;  %v9536_v53 = vadd.f32 %v9461_v59, %v5076_v5  ;;  %v5058_v60 = vmul.f32 %v7638_v38, %v9421_v52 }
 0xe51   : > { %v5079_v42 = vmul.f32 %v9455_v33, %v5059_v50 }
 0xe52   : > { %v7640_v20 = vpop.eup %7639  ;;  %v5106_v45 = vpack.c.bf16 %v9536_v53, %v9533_v61  ;;  %v5078_v44 = vmul.f32 %v9455_v33, %v5058_v60 }
 0xe53   : > { %v5060_v34 = vmul.f32 %v7640_v20, %v9430_v41  ;;  %v9556_v24 = vadd.f32 %v9461_v59, %v5079_v42 }
 0xe54   : > { %7161 = vmatmul.mubr.msk.bf16.gmra.mxu1 %vm652_vm0, %v5106_v45  ;;  %v9550_v52 = vadd.f32 %v9461_v59, %v5078_v44 }
 0xe55   : > { %v5080_v47 = vmul.f32 %v9455_v33, %v5060_v34  ;;  %v7351_v33 = vld [vmem:[%s9446_s11 + $0x8] sm:$0xff]   ;;  %s5758_s11 = scalar_lea.sflag [#allocation3], %s509_s22 }
 0xe56   : > { %v5107_v8 = vpack.c.bf16 %v9550_v52, %v9547_v18  ;;  %7180 = vmatprep.subr.bf16.mxu0 %v7351_v33 }
 0xe57   : > { %v9559_v41 = vadd.f32 %v9461_v59, %v5080_v47  ;;  %7181 = vmatpush3.bf16.msra.mxu0 %v7351_v33 }
 0xe58   : > { %7164 = vmatprep.mubr.msk.bf16.mxu1 %vm652_vm0, %v5107_v8  ;;  %7182 = vmatprep.subr.bf16.mxu0 %v7352_v17 }
 0xe59   : > { %v5108_v32 = vpack.c.bf16 %v9559_v41, %v9556_v24 }
 0xe5b   : > { %7183 = vmatpush3.bf16.msra.mxu0 %v7352_v17 }
 0xe5c   : > { %7165 = vmatmul.mubr.msk.bf16.gmra.mxu1 %vm652_vm0, %v5108_v32 }
 0xf04   : > { %v7154_v59 = vpop.f32.mrf.mxu1 }
 0xf05   : > { %v5198_v16 = vadd.f32 %v7154_v59, %v6233_v62 }
 0xf06   : > { %v5189_v21 = vpop.f32.mrf.mxu1 }
 0xf07   : > { %v5190_v40 = vadd.f32 %v6233_v62, %v5189_v21  ;;  %v5254_v3 = vmax.f32 %v5198_v16, 0.0 }
 0xf08   : > { %v7155_v54 = vpop.f32.mrf.mxu1 }
 0xf09   : > { %v5201_v57 = vadd.f32 %v7155_v54, %v6233_v62  ;;  %v5252_v7 = vmax.f32 %v5190_v40, 0.0 }
 0xf0a   : > { %v5192_v30 = vpop.f32.mrf.mxu1 }
 0xf0b   : > { %v5193_v19 = vadd.f32 %v6233_v62, %v5192_v30  ;;  %v5255_v43 = vmax.f32 %v5201_v57, 0.0 }
 0xf0c   : > { %v7158_v11 = vpop.f32.mrf.mxu1 }
 0xf0d   : > { %v5253_v13 = vmax.f32 %v5193_v19, 0.0  ;;  %v5269_v28 = vpack.c.bf16 %v5255_v43, %v5254_v3  ;;  %v5214_v12 = vadd.f32 %v7158_v11, %v6233_v62 }
 0xf0e   : > { %v5205_v46 = vpop.f32.mrf.mxu1 }
 0xf0f   : > { %v5268_v1 = vpack.c.bf16 %v5253_v13, %v5252_v7  ;;  %v5206_v29 = vadd.f32 %v6233_v62, %v5205_v46  ;;  %v5258_v31 = vmax.f32 %v5214_v12, 0.0 }
 0xf10   : > { %v7159_v56 = vpop.f32.mrf.mxu1 }
 0xf11   : > { %v5217_v49 = vadd.f32 %v7159_v56, %v6233_v62  ;;  %7184 = vmatprep.mubr.bf16.mxu0 %v5268_v1  ;;  %v5256_v25 = vmax.f32 %v5206_v29, 0.0 }
 0xf12   : > { %v5208_v4 = vpop.f32.mrf.mxu1  ;;  %7185 = vmatmul.mubr.bf16.vlgmr.msra.gmra.mxu0 %v5269_v28 }
 0xf13   : > { %v5209_v55 = vadd.f32 %v6233_v62, %v5208_v4  ;;  %v5259_v2 = vmax.f32 %v5217_v49, 0.0 }
 0xf14   : > { %v7162_v9 = vpop.f32.mrf.mxu1 }
 0xf15   : > { %v5257_v27 = vmax.f32 %v5209_v55, 0.0  ;;  %v5271_v38 = vpack.c.bf16 %v5259_v2, %v5258_v31  ;;  %v5230_v20 = vadd.f32 %v7162_v9, %v6233_v62  ;;  %v5295_v9 = vrot.slane %v9215_v22, %v8981_v23 }
 0xf16   : > { %v5221_v39 = vpop.f32.mrf.mxu1 }
 0xf17   : > { %v5270_v5 = vpack.c.bf16 %v5257_v27, %v5256_v25  ;;  %v5222_v60 = vadd.f32 %v6233_v62, %v5221_v39  ;;  %v5262_v32 = vmax.f32 %v5230_v20, 0.0 }
 0xf18   : > { %v7163_v50 = vpop.f32.mrf.mxu1 }
 0xf19   : > { %v5233_v35 = vadd.f32 %v7163_v50, %v6233_v62  ;;  %7188 = vmatprep.mubr.bf16.mxu0 %v5270_v5  ;;  %v5260_v47 = vmax.f32 %v5222_v60, 0.0 }
 0xf1a   : > { %v5224_v45 = vpop.f32.mrf.mxu1  ;;  %7189 = vmatmul.mubr.bf16.gmra.mxu0 %v5271_v38 }
 0xf1b   : > { %v5225_v44 = vadd.f32 %v6233_v62, %v5224_v45  ;;  %v5263_v34 = vmax.f32 %v5233_v35, 0.0 }
 0xf1c   : > { %v7166_v42 = vpop.f32.mrf.mxu1 }
 0xf1d   : > { %v5261_v8 = vmax.f32 %v5225_v44, 0.0  ;;  %v5273_v17 = vpack.c.bf16 %v5263_v34, %v5262_v32  ;;  %v5246_v40 = vadd.f32 %v7166_v42, %v6233_v62 }
 0xf1e   : > { %v5237_v37 = vpop.f32.mrf.mxu1 }
 0xf1f   : > { %v5272_v33 = vpack.c.bf16 %v5261_v8, %v5260_v47  ;;  %v5238_v21 = vadd.f32 %v6233_v62, %v5237_v37  ;;  %v5266_v11 = vmax.f32 %v5246_v40, 0.0 }
 0xf20   : > { %v7167_v59 = vpop.f32.mrf.mxu1 }
 0xf21   : > { %v5249_v54 = vadd.f32 %v7167_v59, %v6233_v62  ;;  %7192 = vmatprep.mubr.bf16.mxu0 %v5272_v33  ;;  %v5264_v19 = vmax.f32 %v5238_v21, 0.0 }
 0xf22   : > { %v5240_v57 = vpop.f32.mrf.mxu1  ;;  %7193 = vmatmul.mubr.bf16.gmra.mxu0 %v5273_v17 }
 0xf23   : > { %v5241_v16 = vadd.f32 %v6233_v62, %v5240_v57  ;;  %v5267_v30 = vmax.f32 %v5249_v54, 0.0 }
 0xf25   : > { %v5265_v43 = vmax.f32 %v5241_v16, 0.0  ;;  %v5275_v13 = vpack.c.bf16 %v5267_v30, %v5266_v11 }
 0xf27   : > { %v5274_v7 = vpack.c.bf16 %v5265_v43, %v5264_v19 }
 0xf29   : > { %7196 = vmatprep.mubr.bf16.mxu0 %v5274_v7 }
 0xf2a   : > { %7197 = vmatmul.mubr.bf16.gmra.mxu0 %v5275_v13 }
 0xfd2   : > { %v7186_v3 = vpop.f32.mrf.mxu0 }
 0xfd3   : > { %v5387_v54 = vadd.f32 %v7186_v3, %v5295_v9 }
 0xfd4   : > { %v5378_v46 = vpop.f32.mrf.mxu0 }
 0xfd5   : > { %v9628_v30 = vadd.f32 %v5387_v54, %v9479_v14  ;;  %v5379_v19 = vadd.f32 %v5378_v46, %v5295_v9 }
 0xfd6   : > { %v7187_v1 = vpop.f32.mrf.mxu0 }
 0xfd7   : > { %v5390_v43 = vadd.f32 %v7187_v1, %v5295_v9  ;;  %v9638_v7 = vadd.f32 %v5379_v19, %v9469_v51  ;;  %v5463_v3 = vsel %vm652_vm0, %v9628_v30, 0.0 }
 0xfd8   : > { %v9572_v28 = vpop.f32.mrf.mxu0 }
 0xfd9   : > { %v9641_v13 = vadd.f32 %v5390_v43, %v9482_v48  ;;  %v5382_v14 = vadd.f32 %v9572_v28, %v5295_v9  ;;  %v5457_v48 = vsel %vm652_vm0, %v9638_v7, 0.0 }
 0xfda   : > { %v7190_v56 = vpop.f32.mrf.mxu0 }
 0xfdb   : > { %v5403_v8 = vadd.f32 %v7190_v56, %v5295_v9  ;;  %v9649_v46 = vadd.f32 %v5382_v14, %v9472_v58  ;;  %v5466_v51 = vsel %vm652_vm0, %v9641_v13, 0.0 }
 0xfdc   : > { %v5394_v29 = vpop.f32.mrf.mxu0 }
 0xfdd   : > { %v9608_v33 = vadd.f32 %v5403_v8, %v9508_v0  ;;  %v5395_v17 = vadd.f32 %v5394_v29, %v5295_v9  ;;  %v5460_v1 = vsel %vm652_vm0, %v9649_v46, 0.0 }
 0xfde   : > { %v7191_v49 = vpop.f32.mrf.mxu0 }
 0xfdf   : > { %v5406_v59 = vadd.f32 %v7191_v49, %v5295_v9  ;;  %v9618_v40 = vadd.f32 %v5395_v17, %v9495_v6  ;;  %v5475_v16 = vsel %vm652_vm0, %v9608_v33, 0.0 }
 0xfe0   : > { %v5397_v12 = vpop.f32.mrf.mxu0 }
 0xfe1   : > { %v9621_v0 = vadd.f32 %v5406_v59, %v9511_v15  ;;  %v5398_v57 = vadd.f32 %v5397_v12, %v5295_v9  ;;  %v5469_v11 = vsel %vm652_vm0, %v9618_v40, 0.0 }
 0xfe2   : > { %v7194_v4 = vpop.f32.mrf.mxu0 }
 0xfe3   : > { %v5419_v38 = vadd.f32 %v7194_v4, %v5295_v9  ;;  %v9631_v6 = vadd.f32 %v5398_v57, %v9498_v63  ;;  %v5478_v15 = vsel %vm652_vm0, %v9621_v0, 0.0 }
 0xfe4   : > { %v5410_v55 = vpop.f32.mrf.mxu0 }
 0xfe5   : > { %v9588_v44 = vadd.f32 %v5419_v38, %v9533_v61  ;;  %v5472_v63 = vsel %vm652_vm0, %v9631_v6, 0.0 }
 0xfe6   : > { %v7195_v62 = vpop.f32.mrf.mxu0 }
 0xfe7   : > { %v5422_v34 = vadd.f32 %v7195_v62, %v5295_v9  ;;  %v5487_v37 = vsel %vm652_vm0, %v9588_v44, 0.0 }
 0xfe8   : > { %v5413_v2 = vpop.f32.mrf.mxu0 }
 0xfe9   : > { %v9601_v61 = vadd.f32 %v5422_v34, %v9536_v53  ;;  %v5414_v32 = vadd.f32 %v5413_v2, %v5295_v9 }
 0xfea   : > { %v7198_v25 = vpop.f32.mrf.mxu0 }
 0xfeb   : > { %v5435_v27 = vadd.f32 %v7198_v25, %v5295_v9  ;;  %v5490_v53 = vsel %vm652_vm0, %v9601_v61, 0.0 }
 0xfec   : > { %v5426_v31 = vpop.f32.mrf.mxu0 }
 0xfed   : > { %v9577_v39 = vadd.f32 %v5435_v27, %v9556_v24  ;;  %v5427_v5 = vadd.f32 %v5426_v31, %v5295_v9  ;;  %v5411_v24 = vadd.f32 %v5410_v55, %v5295_v9 }
 0xfee   : > { %v7199_v50 = vpop.f32.mrf.mxu0 }
 0xfef   : > { %v9580_v60 = vadd.f32 %v5427_v5, %v9547_v18  ;;  %v5438_v35 = vadd.f32 %v7199_v50, %v5295_v9  ;;  %v5499_v20 = vsel %vm652_vm0, %v9577_v39, 0.0 }
 0xff0   : > { %5500 = vadd.xlane.f32.xlu0 %v5499_v20  ;;  %v5429_v45 = vpop.f32.mrf.mxu0 }
 0xff1   : > { %v9585_v23 = vadd.f32 %v5438_v35, %v9559_v41  ;;  %v5430_v22 = vadd.f32 %v5429_v45, %v5295_v9  ;;  %v5493_v47 = vsel %vm652_vm0, %v9580_v60, 0.0  ;;  %v9598_v41 = vadd.f32 %v5411_v24, %v9518_v10 }
 0xff2   : > { %v9611_v10 = vadd.f32 %v5414_v32, %v9523_v36 }
 0xff3   : > { %v9591_v42 = vadd.f32 %v5430_v22, %v9550_v52  ;;  %v5502_v18 = vsel %vm652_vm0, %v9585_v23, 0.0  ;;  %v5481_v21 = vsel %vm652_vm0, %v9598_v41, 0.0 }
 0xff4   : > { %5503 = vadd.xlane.f32.xlu1 %v5502_v18  ;;  %5494 = vadd.xlane.f32.xlu0 %v5493_v47  ;;  %v5484_v36 = vsel %vm652_vm0, %v9611_v10, 0.0 }
 0xff5   : > { %v5496_v52 = vsel %vm652_vm0, %v9591_v42, 0.0 }
 0xff8   : > { %5497 = vadd.xlane.f32.xlu1 %v5496_v52  ;;  %5488 = vadd.xlane.f32.xlu0 %v5487_v37 }
 0xffc   : > { %5491 = vadd.xlane.f32.xlu1 %v5490_v53  ;;  %5482 = vadd.xlane.f32.xlu0 %v5481_v21 }
0x1000   : > { %5485 = vadd.xlane.f32.xlu1 %v5484_v36  ;;  %5476 = vadd.xlane.f32.xlu0 %v5475_v16 }
0x1004   : > { %5479 = vadd.xlane.f32.xlu1 %v5478_v15  ;;  %5470 = vadd.xlane.f32.xlu0 %v5469_v11 }
0x1008   : > { %5473 = vadd.xlane.f32.xlu1 %v5472_v63  ;;  %5464 = vadd.xlane.f32.xlu0 %v5463_v3 }
0x100c   : > { %5467 = vadd.xlane.f32.xlu1 %v5466_v51  ;;  %5458 = vadd.xlane.f32.xlu0 %v5457_v48 }
0x1010   : > { %5461 = vadd.xlane.f32.xlu1 %v5460_v1 }
0x1079   : > { %v5501_v28 = vpop.xlane.xlu0 %5500 }
0x107a   : > { %v5519_v56 = vmul.f32 0.03125, %v5501_v28 }
0x107c   : > { %v9658_v29 = vsub.f32 %v9577_v39, %v5519_v56 }
0x107d   : > { %v5504_v49 = vpop.xlane.xlu1 %5503  ;;  %v5495_v58 = vpop.xlane.xlu0 %5494 }
0x107e   : > { %v5520_v12 = vmul.f32 0.03125, %v5504_v49  ;;  %v5517_v4 = vmul.f32 0.03125, %v5495_v58  ;;  %v5551_v55 = vmul.f32 %v9658_v29, %v9658_v29 }
0x1080   : > { %v9663_v62 = vsub.f32 %v9585_v23, %v5520_v12  ;;  %v9666_v2 = vsub.f32 %v9580_v60, %v5517_v4  ;;  %v5595_v9 = vsel %vm652_vm0, %v5551_v55, 0.0 }
0x1081   : > { %v5498_v25 = vpop.xlane.xlu1 %5497  ;;  %5596 = vadd.xlane.f32.xlu0 %v5595_v9  ;;  %v5489_v27 = vpop.xlane.xlu0 %5488 }
0x1082   : > { %v5518_v31 = vmul.f32 0.03125, %v5498_v25  ;;  %v5515_v39 = vmul.f32 0.03125, %v5489_v27  ;;  %v5552_v5 = vmul.f32 %v9663_v62, %v9663_v62  ;;  %v5549_v38 = vmul.f32 %v9666_v2, %v9666_v2 }
0x1084   : > { %v9674_v50 = vsub.f32 %v9591_v42, %v5518_v31  ;;  %v9677_v35 = vsub.f32 %v9588_v44, %v5515_v39  ;;  %v5598_v60 = vsel %vm652_vm0, %v5552_v5, 0.0  ;;  %v5589_v20 = vsel %vm652_vm0, %v5549_v38, 0.0 }
0x1085   : > { %5599 = vadd.xlane.f32.xlu1 %v5598_v60  ;;  %v5492_v45 = vpop.xlane.xlu1 %5491  ;;  %5590 = vadd.xlane.f32.xlu0 %v5589_v20  ;;  %v5483_v23 = vpop.xlane.xlu0 %5482 }
0x1086   : > { %v5516_v22 = vmul.f32 0.03125, %v5492_v45  ;;  %v5513_v24 = vmul.f32 0.03125, %v5483_v23  ;;  %v5550_v34 = vmul.f32 %v9674_v50, %v9674_v50  ;;  %v5547_v42 = vmul.f32 %v9677_v35, %v9677_v35 }
0x1088   : > { %v9686_v18 = vsub.f32 %v9601_v61, %v5516_v22  ;;  %v9689_v44 = vsub.f32 %v9598_v41, %v5513_v24  ;;  %v5592_v47 = vsel %vm652_vm0, %v5550_v34, 0.0  ;;  %v5583_v8 = vsel %vm652_vm0, %v5547_v42, 0.0 }
0x1089   : > { %5593 = vadd.xlane.f32.xlu1 %v5592_v47  ;;  %v5486_v32 = vpop.xlane.xlu1 %5485  ;;  %5584 = vadd.xlane.f32.xlu0 %v5583_v8  ;;  %v5477_v52 = vpop.xlane.xlu0 %5476  ;;  %v7773_v22 = vmov 0.0  }
0x108a   : > { %v5514_v37 = vmul.f32 0.03125, %v5486_v32  ;;  %v5511_v17 = vmul.f32 0.03125, %v5477_v52  ;;  %v5548_v59 = vmul.f32 %v9686_v18, %v9686_v18  ;;  %v5545_v61 = vmul.f32 %v9689_v44, %v9689_v44  ;;  %7200 = vmatprep.subr.bf16.mxu1 %v7773_v22  ;;  %7216 = vmatprep.mubr.msk.bf16.mxu1 %vm7774_vm4, %v7773_v22 }
0x108c   : > { %v9698_v53 = vsub.f32 %v9611_v10, %v5514_v37  ;;  %v9701_v41 = vsub.f32 %v9608_v33, %v5511_v17  ;;  %v5586_v21 = vsel %vm652_vm0, %v5548_v59, 0.0  ;;  %v5577_v54 = vsel %vm652_vm0, %v5545_v61, 0.0 }
0x108d   : > { %5587 = vadd.xlane.f32.xlu1 %v5586_v21  ;;  %v5480_v57 = vpop.xlane.xlu1 %5479  ;;  %5578 = vadd.xlane.f32.xlu0 %v5577_v54  ;;  %v5471_v36 = vpop.xlane.xlu0 %5470 }
0x108e   : > { %v5512_v16 = vmul.f32 0.03125, %v5480_v57  ;;  %v5509_v19 = vmul.f32 0.03125, %v5471_v36  ;;  %v5546_v43 = vmul.f32 %v9698_v53, %v9698_v53  ;;  %v5543_v10 = vmul.f32 %v9701_v41, %v9701_v41 }
0x1090   : > { %v9710_v15 = vsub.f32 %v9621_v0, %v5512_v16  ;;  %v9713_v33 = vsub.f32 %v9618_v40, %v5509_v19  ;;  %v5580_v11 = vsel %vm652_vm0, %v5546_v43, 0.0  ;;  %v5571_v14 = vsel %vm652_vm0, %v5543_v10, 0.0 }
0x1091   : > { %5581 = vadd.xlane.f32.xlu1 %v5580_v11  ;;  %v5474_v63 = vpop.xlane.xlu1 %5473  ;;  %5572 = vadd.xlane.f32.xlu0 %v5571_v14  ;;  %v5465_v3 = vpop.xlane.xlu0 %5464  ;;  %v5667_v10 = vsub.s32 4, %v9988_v26 }
0x1092   : > { %v5510_v51 = vmul.f32 0.03125, %v5474_v63  ;;  %v5507_v48 = vmul.f32 0.03125, %v5465_v3  ;;  %v5544_v1 = vmul.f32 %v9710_v15, %v9710_v15  ;;  %v5541_v0 = vmul.f32 %v9713_v33, %v9713_v33 }
0x1094   : > { %v9722_v28 = vsub.f32 %v9631_v6, %v5510_v51  ;;  %v9725_v40 = vsub.f32 %v9628_v30, %v5507_v48  ;;  %v5574_v56 = vsel %vm652_vm0, %v5544_v1, 0.0  ;;  %v5565_v49 = vsel %vm652_vm0, %v5541_v0, 0.0  ;;  %v7694_v0 = vld [vmem:[%s9212_s24] sm:$0x3f]  ;;  %s5956_s24 = sshll.u32 %s509_s22, 1 }
0x1095   : > { %5575 = vadd.xlane.f32.xlu1 %v5574_v56  ;;  %v5468_v58 = vpop.xlane.xlu1 %5467  ;;  %5566 = vadd.xlane.f32.xlu0 %v5565_v49  ;;  %v5459_v12 = vpop.xlane.xlu0 %5458  ;;  %v9757_v56 = vrot.slane %v7694_v0, %v5667_v10  ;;  %v5687_v49 = vsub.s32 5, %v9988_v26  ;;  %s511_s15 = scalar_lea.vmem [#allocation2], %s5956_s24 }
0x1096   : > { %v5508_v4 = vmul.f32 0.03125, %v5468_v58  ;;  %v5505_v55 = vmul.f32 0.03125, %v5459_v12  ;;  %v5542_v9 = vmul.f32 %v9722_v28, %v9722_v28  ;;  %v5539_v6 = vmul.f32 %v9725_v40, %v9725_v40  ;;  %s5772_s17 = sshll.u32 %s511_s15, 4  ;;  %s9827_s17 = int_to_ptr.vmem [resolvable:$true] %s5772_s17 }
0x1097   : > { %s7695_s16 = scalar_lea.vmem %s9827_s17, 32  ;;  %p7702_p2 = scmp.lt.s32.totalorder %s9827_s17, %s7700_s12 }
0x1098   : > { %v9734_v25 = vsub.f32 %v9641_v13, %v5508_v4  ;;  %v9737_v30 = vsub.f32 %v9638_v7, %v5505_v55  ;;  %v5568_v27 = vsel %vm652_vm0, %v5542_v9, 0.0  ;;  %v5559_v31 = vsel %vm652_vm0, %v5539_v6, 0.0  ;;  %p7696_p13 = scmp.ne.s32.totalorder %s9827_s17, %s7695_s16  ;;  %p7703_p3 = scmp.lt.s32.totalorder %s7701_s21, %s7695_s16 }
0x1099   : > { %5569 = vadd.xlane.f32.xlu1 %v5568_v27  ;;  %v5462_v39 = vpop.xlane.xlu1 %5461  ;;  %5560 = vadd.xlane.f32.xlu0 %v5559_v31 }
0x109a   : > { %v5506_v5 = vmul.f32 0.03125, %v5462_v39  ;;  %v5540_v38 = vmul.f32 %v9734_v25, %v9734_v25  ;;  %v5537_v60 = vmul.f32 %v9737_v30, %v9737_v30  ;;  %p7697_p0 = pnand %p7696_p13, %p7871_p4  ;;  %p7704_p5 = por %p7703_p3, %p7702_p2 }
0x109c   : > { %v9746_v13 = vsub.f32 %v9649_v46, %v5506_v5  ;;  %v5562_v7 = vsel %vm652_vm0, %v5540_v38, 0.0  ;;  %v5553_v20 = vsel %vm652_vm0, %v5537_v60, 0.0  ;;  %v9762_v5 = vrot.slane %v7694_v0, %v5687_v49  ;;  %p7698_p1 = pneg %p7697_p0 }
0x109d   : > { %5563 = vadd.xlane.f32.xlu1 %v5562_v7  ;;  %5554 = vadd.xlane.f32.xlu0 %v5553_v20 }
0x109e   : > { %v5538_v45 = vmul.f32 %v9746_v13, %v9746_v13  ;;  %p7705_p6 = pnand %p7704_p5, %p7698_p1 }
0x10a0   : > { %v5556_v23 = vsel %vm652_vm0, %v5538_v45, 0.0 }
0x10a1   : > { %5557 = vadd.xlane.f32.xlu1 %v5556_v23 }
0x110a   : > { %v5597_v46 = vpop.xlane.xlu0 %5596 }
0x110b   : > { %v5615_v24 = vmul.f32 0.03125, %v5597_v46 }
0x110d   : > { %v5631_v34 = vadd.f32 1e-05, %v5615_v24 }
0x110e   : > { %v5600_v42 = vpop.xlane.xlu1 %5599  ;;  %v5591_v47 = vpop.xlane.xlu0 %5590 }
0x110f   : > { %7641 = vrsqrt.f32 %v5631_v34  ;;  %v5616_v8 = vmul.f32 0.03125, %v5600_v42  ;;  %v5613_v32 = vmul.f32 0.03125, %v5591_v47 }
0x1111   : > { %v5632_v52 = vadd.f32 1e-05, %v5616_v8  ;;  %v5629_v37 = vadd.f32 1e-05, %v5613_v32 }
0x1112   : > { %v5594_v17 = vpop.xlane.xlu1 %5593  ;;  %v5585_v59 = vpop.xlane.xlu0 %5584 }
0x1113   : > { %7643 = vrsqrt.f32 %v5632_v52  ;;  %v5614_v61 = vmul.f32 0.03125, %v5594_v17  ;;  %v5611_v21 = vmul.f32 0.03125, %v5585_v59 }
0x1114   : > { %7645 = vrsqrt.f32 %v5629_v37 }
0x1115   : > { %v5630_v54 = vadd.f32 1e-05, %v5614_v61  ;;  %v5627_v57 = vadd.f32 1e-05, %v5611_v21 }
0x1116   : > { %v5588_v36 = vpop.xlane.xlu1 %5587  ;;  %v5579_v16 = vpop.xlane.xlu0 %5578 }
0x1117   : > { %7647 = vrsqrt.f32 %v5630_v54  ;;  %v5612_v19 = vmul.f32 0.03125, %v5588_v36  ;;  %v5609_v43 = vmul.f32 0.03125, %v5579_v16 }
0x1118   : > { %7649 = vrsqrt.f32 %v5627_v57 }
0x1119   : > { %v5628_v11 = vadd.f32 1e-05, %v5612_v19  ;;  %v5625_v14 = vadd.f32 1e-05, %v5609_v43 }
0x111a   : > { %v5582_v63 = vpop.xlane.xlu1 %5581  ;;  %v5573_v3 = vpop.xlane.xlu0 %5572 }
0x111b   : > { %7651 = vrsqrt.f32 %v5628_v11  ;;  %v5610_v51 = vmul.f32 0.03125, %v5582_v63  ;;  %v5607_v48 = vmul.f32 0.03125, %v5573_v3 }
0x111c   : > { %v7642_v1 = vpop.eup %7641  ;;  %7653 = vrsqrt.f32 %v5625_v14 }
0x111d   : > { %v5626_v58 = vadd.f32 1e-05, %v5610_v51  ;;  %v5623_v12 = vadd.f32 1e-05, %v5607_v48  ;;  %v5663_v4 = vmul.f32 %v7642_v1, %v9658_v29 }
0x111e   : > { %v5576_v55 = vpop.xlane.xlu1 %5575  ;;  %v5567_v9 = vpop.xlane.xlu0 %5566 }
0x111f   : > { %7655 = vrsqrt.f32 %v5626_v58  ;;  %v5608_v6 = vmul.f32 0.03125, %v5576_v55  ;;  %v5605_v27 = vmul.f32 0.03125, %v5567_v9  ;;  %v5683_v39 = vmul.f32 %v9757_v56, %v5663_v4 }
0x1120   : > { %v7644_v31 = vpop.eup %7643  ;;  %7657 = vrsqrt.f32 %v5623_v12 }
0x1121   : > { %v7646_v38 = vpop.eup %7645  ;;  %v5624_v60 = vadd.f32 1e-05, %v5608_v6  ;;  %v5621_v7 = vadd.f32 1e-05, %v5605_v27  ;;  %v5664_v26 = vmul.f32 %v7644_v31, %v9663_v62  ;;  %v5703_v42 = vadd.f32 %v9762_v5, %v5683_v39 }
0x1122   : > { %v5570_v20 = vpop.xlane.xlu1 %5569  ;;  %v5561_v45 = vpop.xlane.xlu0 %5560  ;;  %v5661_v29 = vmul.f32 %v7646_v38, %v9666_v2 }
0x1123   : > { %7659 = vrsqrt.f32 %v5624_v60  ;;  %v5606_v23 = vmul.f32 0.03125, %v5570_v20  ;;  %v5603_v46 = vmul.f32 0.03125, %v5561_v45  ;;  %v5684_v24 = vmul.f32 %v9757_v56, %v5664_v26 }
0x1124   : > { %v7648_v34 = vpop.eup %7647  ;;  %7661 = vrsqrt.f32 %v5621_v7  ;;  %v5681_v2 = vmul.f32 %v9757_v56, %v5661_v29 }
0x1125   : > { %v7650_v47 = vpop.eup %7649  ;;  %v5622_v8 = vadd.f32 1e-05, %v5606_v23  ;;  %v5619_v32 = vadd.f32 1e-05, %v5603_v46  ;;  %v5704_v52 = vadd.f32 %v9762_v5, %v5684_v24  ;;  %v5662_v62 = vmul.f32 %v7648_v34, %v9674_v50 }
0x1126   : > { %v5564_v37 = vpop.xlane.xlu1 %5563  ;;  %v5555_v17 = vpop.xlane.xlu0 %5554  ;;  %v5659_v59 = vmul.f32 %v7650_v47, %v9677_v35  ;;  %v5701_v35 = vadd.f32 %v9762_v5, %v5681_v2 }
0x1127   : > { %7663 = vrsqrt.f32 %v5622_v8  ;;  %v5604_v61 = vmul.f32 0.03125, %v5564_v37  ;;  %v5601_v21 = vmul.f32 0.03125, %v5555_v17  ;;  %v5713_v54 = vpack.c.bf16 %v5704_v52, %v5703_v42 }
0x1128   : > { %v7652_v57 = vpop.eup %7651  ;;  %7665 = vrsqrt.f32 %v5619_v32  ;;  %v5682_v36 = vmul.f32 %v9757_v56, %v5662_v62  ;;  %v5679_v16 = vmul.f32 %v9757_v56, %v5659_v59 }
0x1129   : > { %v7654_v19 = vpop.eup %7653  ;;  %v5620_v43 = vadd.f32 1e-05, %v5604_v61  ;;  %v5617_v10 = vadd.f32 1e-05, %v5601_v21  ;;  %7201 = vmatpush3.bf16.msra.mxu1 %v5713_v54  ;;  %v5660_v50 = vmul.f32 %v7652_v57, %v9686_v18 }
0x112a   : > { %v5558_v11 = vpop.xlane.xlu1 %5557  ;;  %7202 = vmatprep.subr.bf16.mxu1 %v7773_v22  ;;  %v5702_v14 = vadd.f32 %v9762_v5, %v5682_v36  ;;  %v5657_v63 = vmul.f32 %v7654_v19, %v9689_v44  ;;  %v5699_v0 = vadd.f32 %v9762_v5, %v5679_v16 }
0x112b   : > { %7667 = vrsqrt.f32 %v5620_v43  ;;  %v5602_v3 = vmul.f32 0.03125, %v5558_v11  ;;  %v5680_v51 = vmul.f32 %v9757_v56, %v5660_v50 }
0x112c   : > { %v7656_v48 = vpop.eup %7655  ;;  %7669 = vrsqrt.f32 %v5617_v10  ;;  %v5712_v1 = vpack.c.bf16 %v5702_v14, %v5701_v35  ;;  %v5677_v4 = vmul.f32 %v9757_v56, %v5657_v63 }
0x112d   : > { %v7658_v49 = vpop.eup %7657  ;;  %v5618_v18 = vadd.f32 1e-05, %v5602_v3  ;;  %v5700_v58 = vadd.f32 %v9762_v5, %v5680_v51  ;;  %v5658_v12 = vmul.f32 %v7656_v48, %v9698_v53 }
0x112e   : > { %7203 = vmatpush3.bf16.msra.mxu1 %v5712_v1  ;;  %v5655_v44 = vmul.f32 %v7658_v49, %v9701_v41  ;;  %v5697_v31 = vadd.f32 %v9762_v5, %v5677_v4 }
0x112f   : > { %7671 = vrsqrt.f32 %v5618_v18  ;;  %7204 = vmatprep.subr.bf16.mxu1 %v7773_v22  ;;  %v5711_v55 = vpack.c.bf16 %v5700_v58, %v5699_v0  ;;  %v5678_v9 = vmul.f32 %v9757_v56, %v5658_v12 }
0x1130   : > { %v7660_v6 = vpop.eup %7659  ;;  %v5675_v53 = vmul.f32 %v9757_v56, %v5655_v44 }
0x1131   : > { %v7662_v27 = vpop.eup %7661  ;;  %v5698_v39 = vadd.f32 %v9762_v5, %v5678_v9  ;;  %v5656_v38 = vmul.f32 %v7660_v6, %v9710_v15 }
0x1132   : > { %7205 = vmatpush3.bf16.msra.mxu1 %v5711_v55  ;;  %v5653_v60 = vmul.f32 %v7662_v27, %v9713_v33  ;;  %v5695_v45 = vadd.f32 %v9762_v5, %v5675_v53 }
0x1133   : > { %7206 = vmatprep.subr.bf16.mxu1 %v7773_v22  ;;  %v5710_v41 = vpack.c.bf16 %v5698_v39, %v5697_v31  ;;  %v5676_v7 = vmul.f32 %v9757_v56, %v5656_v38 }
0x1134   : > { %v7664_v26 = vpop.eup %7663  ;;  %v5673_v15 = vmul.f32 %v9757_v56, %v5653_v60 }
0x1135   : > { %v7666_v20 = vpop.eup %7665  ;;  %v5696_v29 = vadd.f32 %v9762_v5, %v5676_v7  ;;  %v5654_v23 = vmul.f32 %v7664_v26, %v9722_v28 }
0x1136   : > { %7207 = vmatpush3.bf16.msra.mxu1 %v5710_v41  ;;  %v5651_v46 = vmul.f32 %v7666_v20, %v9725_v40  ;;  %v5693_v47 = vadd.f32 %v9762_v5, %v5673_v15 }
0x1137   : > { %7208 = vmatprep.subr.bf16.mxu1 %v7773_v22  ;;  %v5709_v33 = vpack.c.bf16 %v5696_v29, %v5695_v45  ;;  %v5674_v24 = vmul.f32 %v9757_v56, %v5654_v23 }
0x1138   : > { %v7668_v34 = vpop.eup %7667  ;;  %v5671_v28 = vmul.f32 %v9757_v56, %v5651_v46 }
0x1139   : > { %v7670_v42 = vpop.eup %7669  ;;  %v5694_v8 = vadd.f32 %v9762_v5, %v5674_v24  ;;  %v5652_v32 = vmul.f32 %v7668_v34, %v9734_v25 }
0x113a   : > { %7209 = vmatpush3.bf16.msra.mxu1 %v5709_v33  ;;  %v5649_v52 = vmul.f32 %v7670_v42, %v9737_v30  ;;  %v5691_v17 = vadd.f32 %v9762_v5, %v5671_v28 }
0x113b   : > { %7210 = vmatprep.subr.bf16.mxu1 %v7773_v22  ;;  %v5708_v40 = vpack.c.bf16 %v5694_v8, %v5693_v47  ;;  %v5672_v62 = vmul.f32 %v9757_v56, %v5652_v32 }
0x113c   : > { %v7672_v37 = vpop.eup %7671  ;;  %v5669_v25 = vmul.f32 %v9757_v56, %v5649_v52 }
0x113d   : > { %v5692_v2 = vadd.f32 %v9762_v5, %v5672_v62  ;;  %v5650_v59 = vmul.f32 %v7672_v37, %v9746_v13  ;;  %v5705_v13 = vld [vmem:[%s9873_s2] sm:$0x1] }
0x113e   : > { %7211 = vmatpush3.bf16.msra.mxu1 %v5708_v40  ;;  %v5689_v21 = vadd.f32 %v9762_v5, %v5669_v25 }
0x113f   : > { %7212 = vmatprep.subr.bf16.mxu1 %v7773_v22  ;;  %v5707_v30 = vpack.c.bf16 %v5692_v2, %v5691_v17  ;;  %v5670_v61 = vmul.f32 %v9757_v56, %v5650_v59 }
0x1141   : > { %v5690_v54 = vadd.f32 %v9762_v5, %v5670_v61 }
0x1142   : > { %7213 = vmatpush3.bf16.msra.mxu1 %v5707_v30 }
0x1143   : > { %7214 = vmatprep.subr.bf16.mxu1 %v7773_v22  ;;  %v5706_v57 = vpack.c.bf16 %v5690_v54, %v5689_v21 }
0x1146   : > { %7215 = vmatpush3.bf16.msra.mxu1 %v5706_v57 }
0x1149   : > { %7217 = vmatmul.mubr.bf16.vlgmr.msra.gmra.mxu1 %v5705_v13 }
0x1209   : > { %v5748_v56 = vpop.f32.mrf.mxu1 }
0x120a   : > { %v5754_v36 = vmul.f32 0.015625, %v5748_v56 }
0x120b   : > { %v7218_v22 = vpop.f32.mrf.mxu1 }
0x120c   : > { %5756 = vst.msk [vmem:[%s511_s15] sm:$0x3] %vm5755_vm5, %v5754_v36 }
0x120d   : > { %v5751_v5 = vpop.f32.mrf.mxu1 }
0x120e   : > { %7708 = shalt.err (!%p7705_p6)
}
0x120f   : > { %s7709_s28 = scalar_lea.hbm %s9825_s30, 32  ;;  %s7713_s24 = scalar_lea.hbm %s9881_s10, 64 }
0x1210   : > { %p7710_p7 = scmp.ne.s32.totalorder %s9825_s30, %s7709_s28  ;;  %p7714_p11 = scmp.lt.s32.totalorder %s9825_s30, %s9881_s10 }
0x1211   : > { %p7715_p12 = scmp.lt.s32.totalorder %s7713_s24, %s7709_s28 }
0x1212   : > { %p7711_p9 = pnand %p7710_p7, %p7871_p4 }
0x1213   : > { %p7716_p13 = por %p7715_p12, %p7714_p11 }
0x1214   : > { %p7712_p10 = pneg %p7711_p9 }
0x1216   : > { %p7717_p0 = pnand %p7716_p13, %p7712_p10 }
0x1218   : > { %7720 = shalt.err (!%p7717_p0)
}
0x1219   : > { %7262 = dma.vmem_to_hbm [thread:$0]  (%p7871_p4), %s9827_s17, 32, %s9825_s30, %s5758_s11   ;;  %v7219_v16 = vpop.f32.mrf.mxu1 }
0x121a PF: > { %p7268_p1 = scmp.ge.s32.totalorder %s7771_s18, 2  ;;  %s5784_s26 = sand.u32 1, %s7751_s13  }
0x121b   : > { %s5785_s27 = scalar_lea.sflag [#allocation3], %s5784_s26 }
0x121c   : > { %p7265_p2 = pnand %p7268_p1, %p7878_p8 }
0x121e   : > { %p7266_p3 = pneg %p7265_p2 }
0x1220   : > { %7746 = dma.done.wait (%p7266_p3), %s5785_s27, 32  }
0x1221   : > { %7748 = vsyncadd (%p7266_p3), %s5785_s27, 4294967264  ;;  %s23_s18 = sadd.s32 1, %s7771_s18   ;;  %s10028_s23 = sld [smem:[#allocation5_spill]] }
0x1222   : > { %p20_p5 = scmp.ge.s32.totalorder %s23_s18, 4   ;;  %s10029_s15 = sld [smem:[#allocation8_spill]] }
0x1223   : > { %s10030_s16 = sld [smem:[#allocation6_spill]]  ;;  %s10032_s13 = smov %s7755_s14 }
0x1224   : > { %s10031_s17 = sld [smem:[#allocation7_spill]]  ;;  %22 = sbr.rel (!%p20_p5) target bundleno = 4 (0x4), region = 133 }
0x1227   : > { %s10033_s14 = smov %s10028_s23 }
0x1229   :  { %5790 = vsyncpa [#allocation3], 1 }
0x122a   :  { %5792 = vsyncpa [#allocation3 + $0x1], 1 }

</bundles_post_ra>
